<compile_context>
chip_gen: v6e
topology: v6e:2x2x1
jax: 0.10.0
libtpu: 0.0.40
codegen_flags: <defaults>
</compile_context>

<pallas_src>
import functools
import math

import jax
import jax.numpy as jnp
from jax.experimental import pallas as pl
from jax.experimental.pallas import tpu as pltpu


def _round_up(n, m):
    return ((n + m - 1) // m) * m


def _tpu_kind():
    try:
        return jax.devices()[0].device_kind.lower()
    except Exception:
        return ""


def _auto_bf16_epilogue(kind):
    # bf16 VALU exists on v6e/v7x; on v5e and older, bf16 elementwise unpacks -> slower.
    return not any(t in kind for t in ("v2", "v3", "v4", "v5"))


def _mlp_kernel(x_ref,
                w1, b1, w2, b2, w3, b3,   # FullyConnectedEnc.fcpart hidden layers
                w45, b45,                 # fused Linear(Lv[2], out_dim) o Projector Linear(out_dim, 512)
                w6, b6, w7, b7,           # Projector hidden + output layer (bnorm=False, depth=3)
                o_ref, *, bf16_epilogue):
    """One batch tile of the fused 6-matmul MLP.

    Matmul operands are bf16 (MXU-native) with f32 accumulation.  The bias-add / ReLU
    epilogue runs in bf16 on chips with a bf16 VALU (halves the VPU passes over the
    (tile_m, 768/512) intermediates), otherwise in f32.
    """
    def lin_relu(h, w, b):
        acc = jnp.dot(h, w[...], preferred_element_type=jnp.float32)
        if bf16_epilogue:
            return jnp.maximum(acc.astype(jnp.bfloat16) + b[...], 0)      # b is bf16
        return jnp.maximum(acc + b[...], 0.0).astype(jnp.bfloat16)        # b is f32

    h = x_ref[...]                                   # (TILE_M, 128) bf16
    h = lin_relu(h, w1, b1)                          # 128 -> 768
    h = lin_relu(h, w2, b2)                          # 768 -> 512
    h = lin_relu(h, w3, b3)                          # 512 -> 256
    h = lin_relu(h, w45, b45)                        # 256 -> 512  (fused rep + proj layer 1)
    h = lin_relu(h, w6, b6)                          # 512 -> 512
    out = jnp.dot(h, w7[...], preferred_element_type=jnp.float32) + b7[...]
    o_ref[...] = out.astype(o_ref.dtype)             # 512 -> 128 (padded proj_dim), f32 out


def model_simclr_forward(x, params, *, input_size, proj_dim, multichan=True,
                         max_tile_m=None, bf16_epilogue=None):
    """Reproduces ModelSimCLR(base_model='fc_encoder', multichan=multichan).forward(x)."""
    kind = _tpu_kind()
    if max_tile_m is None:
        # v6e/v7x: big tiles amortize the per-step overhead (MXU is fast enough that
        # 0.35 us/step is ~25-30% at 512 rows).  v5e: per-step overhead is already <7%
        # at 1024 rows and scoped VMEM is tighter, so stay at 1024.
        max_tile_m = 2048 if ("v6" in kind or "v7" in kind) else 1024
    if bf16_epilogue is None:
        bf16_epilogue = _auto_bf16_epilogue(kind)

    if multichan:
        x = x.reshape(-1, 1, input_size)             # FullyConnectedEnc: x.view(-1, 1, input_size)
    lead = x.shape[:-1]
    x2d = x.reshape(-1, input_size)
    n = x2d.shape[0]

    (w1, b1), (w2, b2), (w3, b3), (w4, b4), (w5, b5), (w6, b6), (w7, b7) = params

    # --- fuse the ReLU-free pair (fcpart Linear(Lv[2], out_dim) then Projector Linear(out_dim, 512)) ---
    w45 = w4.astype(jnp.float32) @ w5.astype(jnp.float32)                   # (256, 512)
    b45 = b4.astype(jnp.float32) @ w5.astype(jnp.float32) + b5.astype(jnp.float32)

    # --- lane padding for (*,128)-aligned, unmasked blocks ---
    d_in_p = _round_up(input_size, 128)
    d_out_p = _round_up(proj_dim, 128)
    w1p = jnp.pad(w1, ((0, d_in_p - input_size), (0, 0)))
    w7p = jnp.pad(w7, ((0, 0), (0, d_out_p - proj_dim)))
    b7p = jnp.pad(b7, (0, d_out_p - proj_dim))

    # --- batch tiling: multiple of 16 (bf16 sublane tile); on v7x guarantee >= 2 grid
    # steps so the "parallel" axis shards across both TensorCores ---
    tile_m = min(max_tile_m, _round_up(max(n, 1), 16))
    min_grid_steps = 2 if "v7" in kind else 1
    if min_grid_steps > 1 and n > 16:
        tile_m = min(tile_m, _round_up(-(-n // min_grid_steps), 16))
    n_pad = _round_up(n, tile_m)

    # Pad/cast directly in bf16 (halves wrapper-side HBM traffic for the pad op).
    x_p = jnp.pad(x2d.astype(jnp.bfloat16),
                  ((0, n_pad - n), (0, d_in_p - input_size)))

    weights = [w1p, w2, w3, w45, w6, w7p]
    biases = [b1, b2, b3, b45, b6, b7p]
    hidden_bias_dtype = jnp.bfloat16 if bf16_epilogue else jnp.float32

    args = [x_p]
    wb_shapes, bb_shapes = [], []
    for li, (w, b) in enumerate(zip(weights, biases)):
        is_last = li == len(weights) - 1
        wb = w.astype(jnp.bfloat16)
        bb = b.astype(jnp.float32 if is_last else hidden_bias_dtype).reshape(1, -1)
        args += [wb, bb]
        wb_shapes.append(wb.shape)
        bb_shapes.append(bb.shape)

    def _in_specs(single_buffer_weights):
        specs = [pl.BlockSpec((tile_m, d_in_p), lambda i: (i, 0))]
        # Grid-invariant blocks (index_map -> (0,0)): weights/biases stay resident in
        # VMEM; single-buffer them since they are never re-fetched.
        extra = {"pipeline_mode": pl.Buffered(1)} if single_buffer_weights else {}
        for ws, bs in zip(wb_shapes, bb_shapes):
            specs.append(pl.BlockSpec(ws, lambda i: (0, 0), **extra))
            specs.append(pl.BlockSpec(bs, lambda i: (0, 0), **extra))
        return specs

    # Advisory cost estimate so XLA schedules the custom call sensibly.
    flops = 2 * n_pad * sum(ws[0] * ws[1] for ws in wb_shapes)
    w_bytes = sum(int(w.size) * 2 for w in weights) + sum(int(b.size) * 4 for b in biases)
    bytes_accessed = w_bytes + n_pad * d_in_p * 2 + n_pad * d_out_p * 4
    cost = pl.CostEstimate(flops=flops, transcendentals=0, bytes_accessed=bytes_accessed)

    # Explicit scoped-VMEM limit: defaults (16 MiB v5e / 32 MiB v6e,v7x) are too small
    # for the larger batch tiles.  Conservative per-step estimate, capped below v7x's
    # 64 MiB physical VMEM.
    per_row = d_in_p * 2 * 2 + d_out_p * 4 * 2 + (768 + 512 + 256 + 512 + 512) * 6
    vmem_needed = w_bytes + tile_m * per_row + (4 << 20)
    vmem_limit = int(min(max(vmem_needed, 32 << 20), 56 << 20))

    def _run(single_buffer_weights):
        return pl.pallas_call(
            functools.partial(_mlp_kernel, bf16_epilogue=bf16_epilogue),
            out_shape=jax.ShapeDtypeStruct((n_pad, d_out_p), jnp.float32),
            grid=(n_pad // tile_m,),
            in_specs=_in_specs(single_buffer_weights),
            out_specs=pl.BlockSpec((tile_m, d_out_p), lambda i: (i, 0)),
            compiler_params=pltpu.CompilerParams(
                dimension_semantics=("parallel",),
                vmem_limit_bytes=vmem_limit),
            cost_estimate=cost,
        )(*args)

    try:
        out = _run(True)
    except Exception:
        # Fallback if this jax build rejects single-buffered (Buffered(1)) blocks.
        out = _run(False)

    out = out[:n, :proj_dim]
    return out.reshape(*lead, proj_dim)


def _linear_params(key, fan_in, fan_out):
    """Deterministic init mimicking torch.nn.Linear default (uniform +/- 1/sqrt(fan_in))."""
    kw, kb = jax.random.split(key)
    bound = 1.0 / math.sqrt(fan_in)
    w = jax.random.uniform(kw, (fan_in, fan_out), jnp.float32, -bound, bound)
    b = jax.random.uniform(kb, (fan_out,), jnp.float32, -bound, bound)
    return w, b


if __name__ == "__main__":
    # ModelSimCLR(base_model='fc_encoder', out_dim=2, proj_dim=5, multichan=True, input_size=121)
    input_size = 121
    out_dim = 2            # FullyConnectedEnc out_size (representation dim)
    proj_dim = 5
    Lv = [768, 512, 256]
    Lvpj = [512, 128]      # Projector hidden width = Lvpj[0]; depth=3, bnorm=False

    dims = [
        (input_size, Lv[0]),   # fcpart Linear 1
        (Lv[0], Lv[1]),        # fcpart Linear 2
        (Lv[1], Lv[2]),        # fcpart Linear 3
        (Lv[2], out_dim),      # fcpart Linear 4 -> representation (no ReLU)
        (out_dim, Lvpj[0]),    # Projector Linear 1
        (Lvpj[0], Lvpj[0]),    # Projector Linear 2 (depth=3 -> one hidden-hidden layer)
        (Lvpj[0], proj_dim),   # Projector Linear 3
    ]

    key = jax.random.PRNGKey(0)
    keys = jax.random.split(key, len(dims) + 1)
    params = [_linear_params(k, fi, fo) for k, (fi, fo) in zip(keys[:-1], dims)]

    batch = 2
    x = jax.random.normal(keys[-1], (batch, input_size), jnp.float32)

    y = model_simclr_forward(x, params, input_size=input_size,
                             proj_dim=proj_dim, multichan=True)
    y = jax.block_until_ready(y)
    assert y.shape == (batch, 1, proj_dim), y.shape

    bf16_epi = _auto_bf16_epilogue(_tpu_kind())

    # --- reference 1: same math as the kernel (bf16 weights, f32 accum, fused 4&5,
    # matching epilogue precision) in pure JAX ---
    def _ref_matched(xin):
        h = xin.reshape(-1, input_size).astype(jnp.bfloat16)
        h = jnp.pad(h, ((0, 0), (0, 128 - input_size)))
        w45 = params[3][0] @ params[4][0]
        b45 = params[3][1] @ params[4][0] + params[4][1]
        w1p = jnp.pad(params[0][0], ((0, 128 - input_size), (0, 0)))
        layers = [(w1p, params[0][1]), (params[1][0], params[1][1]),
                  (params[2][0], params[2][1]), (w45, b45),
                  (params[5][0], params[5][1])]
        for w, b in layers:
            acc = jnp.dot(h, w.astype(jnp.bfloat16), preferred_element_type=jnp.float32)
            if bf16_epi:
                h = jnp.maximum(acc.astype(jnp.bfloat16) + b.astype(jnp.bfloat16), 0)
            else:
                h = jnp.maximum(acc + b, 0.0).astype(jnp.bfloat16)
        o = jnp.dot(h, params[6][0].astype(jnp.bfloat16),
                    preferred_element_type=jnp.float32) + params[6][1]
        return o.reshape(batch, 1, proj_dim)

    ref_m = _ref_matched(x)
    err_m = float(jnp.max(jnp.abs(y - ref_m)))
    assert jnp.allclose(y, ref_m, atol=5e-3, rtol=5e-3), err_m

    # --- reference 2: full-precision f32 reference of the original module (loose) ---
    def _ref_f32(xin):
        h = xin.reshape(-1, 1, input_size)
        lin = lambda h, p: h @ p[0] + p[1]
        h = jax.nn.relu(lin(h, params[0]))
        h = jax.nn.relu(lin(h, params[1]))
        h = jax.nn.relu(lin(h, params[2]))
        h = lin(h, params[3])
        h = jax.nn.relu(lin(h, params[4]))
        h = jax.nn.relu(lin(h, params[5]))
        return lin(h, params[6])

    ref_f = _ref_f32(x)
    err_f = float(jnp.max(jnp.abs(y - ref_f)))
    assert jnp.allclose(y, ref_f, atol=5e-2, rtol=5e-2), err_f

    print("KERNEL_OK")
</pallas_src>

<mosaic_0001>
module attributes {stable_mosaic.version = 11 : i64} {
  func.func @_mlp_kernel(%arg0: i32, %arg1: memref<16x128xbf16, #tpu.memory_space<vmem>>, %arg2: memref<128x768xbf16, #tpu.memory_space<vmem>>, %arg3: memref<1x768xbf16, #tpu.memory_space<vmem>>, %arg4: memref<768x512xbf16, #tpu.memory_space<vmem>>, %arg5: memref<1x512xbf16, #tpu.memory_space<vmem>>, %arg6: memref<512x256xbf16, #tpu.memory_space<vmem>>, %arg7: memref<1x256xbf16, #tpu.memory_space<vmem>>, %arg8: memref<256x512xbf16, #tpu.memory_space<vmem>>, %arg9: memref<1x512xbf16, #tpu.memory_space<vmem>>, %arg10: memref<512x512xbf16, #tpu.memory_space<vmem>>, %arg11: memref<1x512xbf16, #tpu.memory_space<vmem>>, %arg12: memref<512x128xbf16, #tpu.memory_space<vmem>>, %arg13: memref<1x128xf32, #tpu.memory_space<vmem>>, %arg14: memref<16x128xf32, #tpu.memory_space<vmem>>) attributes {dimension_semantics = [#tpu.dimension_semantics<parallel>], iteration_bounds = array<i64: 1>, scalar_prefetch = 0 : i64, scratch_operands = 0 : i64, tpu.core_type = #tpu.core_type<tc>, window_params = [{transform_indices = @transform_0, window_bounds = array<i64: 16, 128>}, {pipeline_mode = #tpu.pipeline_mode<synchronous>, transform_indices = @transform_1, window_bounds = array<i64: 128, 768>}, {pipeline_mode = #tpu.pipeline_mode<synchronous>, transform_indices = @transform_2, window_bounds = array<i64: 1, 768>}, {pipeline_mode = #tpu.pipeline_mode<synchronous>, transform_indices = @transform_3, window_bounds = array<i64: 768, 512>}, {pipeline_mode = #tpu.pipeline_mode<synchronous>, transform_indices = @transform_4, window_bounds = array<i64: 1, 512>}, {pipeline_mode = #tpu.pipeline_mode<synchronous>, transform_indices = @transform_5, window_bounds = array<i64: 512, 256>}, {pipeline_mode = #tpu.pipeline_mode<synchronous>, transform_indices = @transform_6, window_bounds = array<i64: 1, 256>}, {pipeline_mode = #tpu.pipeline_mode<synchronous>, transform_indices = @transform_7, window_bounds = array<i64: 256, 512>}, {pipeline_mode = #tpu.pipeline_mode<synchronous>, transform_indices = @transform_8, window_bounds = array<i64: 1, 512>}, {pipeline_mode = #tpu.pipeline_mode<synchronous>, transform_indices = @transform_9, window_bounds = array<i64: 512, 512>}, {pipeline_mode = #tpu.pipeline_mode<synchronous>, transform_indices = @transform_10, window_bounds = array<i64: 1, 512>}, {pipeline_mode = #tpu.pipeline_mode<synchronous>, transform_indices = @transform_11, window_bounds = array<i64: 512, 128>}, {pipeline_mode = #tpu.pipeline_mode<synchronous>, transform_indices = @transform_12, window_bounds = array<i64: 1, 128>}, {transform_indices = @transform_13, window_bounds = array<i64: 16, 128>}]} {
    %c0 = arith.constant 0 : index
    %c0_0 = arith.constant 0 : index
    %0 = vector.load %arg1[%c0, %c0_0] : memref<16x128xbf16, #tpu.memory_space<vmem>>, vector<16x128xbf16>
    %c0_1 = arith.constant 0 : index
    %c0_2 = arith.constant 0 : index
    %1 = vector.load %arg2[%c0_1, %c0_2] : memref<128x768xbf16, #tpu.memory_space<vmem>>, vector<128x768xbf16>
    %cst = arith.constant dense<0.000000e+00> : vector<16x768xf32>
    %2 = tpu.matmul %0, %1, %cst {dimension_numbers = #tpu.dot_dimension_numbers<[1], [0], [0], [1], [0, 0, 1, 1], [], []>} : vector<16x128xbf16>, vector<128x768xbf16>, vector<16x768xf32> -> vector<16x768xf32>
    %3 = arith.truncf %2 : vector<16x768xf32> to vector<16x768xbf16>
    %c0_3 = arith.constant 0 : index
    %c0_4 = arith.constant 0 : index
    %4 = vector.load %arg3[%c0_3, %c0_4] : memref<1x768xbf16, #tpu.memory_space<vmem>>, vector<1x768xbf16>
    %5 = vector.broadcast %4 : vector<1x768xbf16> to vector<16x768xbf16>
    %6 = arith.addf %3, %5 : vector<16x768xbf16>
    %cst_5 = arith.constant 0.000000e+00 : bf16
    %7 = vector.broadcast %cst_5 : bf16 to vector<16x768xbf16>
    %8 = arith.maximumf %6, %7 : vector<16x768xbf16>
    %c0_6 = arith.constant 0 : index
    %c0_7 = arith.constant 0 : index
    %9 = vector.load %arg4[%c0_6, %c0_7] : memref<768x512xbf16, #tpu.memory_space<vmem>>, vector<768x512xbf16>
    %cst_8 = arith.constant dense<0.000000e+00> : vector<16x512xf32>
    %10 = tpu.matmul %8, %9, %cst_8 {dimension_numbers = #tpu.dot_dimension_numbers<[1], [0], [0], [1], [0, 0, 1, 1], [], []>} : vector<16x768xbf16>, vector<768x512xbf16>, vector<16x512xf32> -> vector<16x512xf32>
    %11 = arith.truncf %10 : vector<16x512xf32> to vector<16x512xbf16>
    %c0_9 = arith.constant 0 : index
    %c0_10 = arith.constant 0 : index
    %12 = vector.load %arg5[%c0_9, %c0_10] : memref<1x512xbf16, #tpu.memory_space<vmem>>, vector<1x512xbf16>
    %13 = vector.broadcast %12 : vector<1x512xbf16> to vector<16x512xbf16>
    %14 = arith.addf %11, %13 : vector<16x512xbf16>
    %cst_11 = arith.constant 0.000000e+00 : bf16
    %15 = vector.broadcast %cst_11 : bf16 to vector<16x512xbf16>
    %16 = arith.maximumf %14, %15 : vector<16x512xbf16>
    %c0_12 = arith.constant 0 : index
    %c0_13 = arith.constant 0 : index
    %17 = vector.load %arg6[%c0_12, %c0_13] : memref<512x256xbf16, #tpu.memory_space<vmem>>, vector<512x256xbf16>
    %cst_14 = arith.constant dense<0.000000e+00> : vector<16x256xf32>
    %18 = tpu.matmul %16, %17, %cst_14 {dimension_numbers = #tpu.dot_dimension_numbers<[1], [0], [0], [1], [0, 0, 1, 1], [], []>} : vector<16x512xbf16>, vector<512x256xbf16>, vector<16x256xf32> -> vector<16x256xf32>
    %19 = arith.truncf %18 : vector<16x256xf32> to vector<16x256xbf16>
    %c0_15 = arith.constant 0 : index
    %c0_16 = arith.constant 0 : index
    %20 = vector.load %arg7[%c0_15, %c0_16] : memref<1x256xbf16, #tpu.memory_space<vmem>>, vector<1x256xbf16>
    %21 = vector.broadcast %20 : vector<1x256xbf16> to vector<16x256xbf16>
    %22 = arith.addf %19, %21 : vector<16x256xbf16>
    %cst_17 = arith.constant 0.000000e+00 : bf16
    %23 = vector.broadcast %cst_17 : bf16 to vector<16x256xbf16>
    %24 = arith.maximumf %22, %23 : vector<16x256xbf16>
    %c0_18 = arith.constant 0 : index
    %c0_19 = arith.constant 0 : index
    %25 = vector.load %arg8[%c0_18, %c0_19] : memref<256x512xbf16, #tpu.memory_space<vmem>>, vector<256x512xbf16>
    %cst_20 = arith.constant dense<0.000000e+00> : vector<16x512xf32>
    %26 = tpu.matmul %24, %25, %cst_20 {dimension_numbers = #tpu.dot_dimension_numbers<[1], [0], [0], [1], [0, 0, 1, 1], [], []>} : vector<16x256xbf16>, vector<256x512xbf16>, vector<16x512xf32> -> vector<16x512xf32>
    %27 = arith.truncf %26 : vector<16x512xf32> to vector<16x512xbf16>
    %c0_21 = arith.constant 0 : index
    %c0_22 = arith.constant 0 : index
    %28 = vector.load %arg9[%c0_21, %c0_22] : memref<1x512xbf16, #tpu.memory_space<vmem>>, vector<1x512xbf16>
    %29 = vector.broadcast %28 : vector<1x512xbf16> to vector<16x512xbf16>
    %30 = arith.addf %27, %29 : vector<16x512xbf16>
    %cst_23 = arith.constant 0.000000e+00 : bf16
    %31 = vector.broadcast %cst_23 : bf16 to vector<16x512xbf16>
    %32 = arith.maximumf %30, %31 : vector<16x512xbf16>
    %c0_24 = arith.constant 0 : index
    %c0_25 = arith.constant 0 : index
    %33 = vector.load %arg10[%c0_24, %c0_25] : memref<512x512xbf16, #tpu.memory_space<vmem>>, vector<512x512xbf16>
    %cst_26 = arith.constant dense<0.000000e+00> : vector<16x512xf32>
    %34 = tpu.matmul %32, %33, %cst_26 {dimension_numbers = #tpu.dot_dimension_numbers<[1], [0], [0], [1], [0, 0, 1, 1], [], []>} : vector<16x512xbf16>, vector<512x512xbf16>, vector<16x512xf32> -> vector<16x512xf32>
    %35 = arith.truncf %34 : vector<16x512xf32> to vector<16x512xbf16>
    %c0_27 = arith.constant 0 : index
    %c0_28 = arith.constant 0 : index
    %36 = vector.load %arg11[%c0_27, %c0_28] : memref<1x512xbf16, #tpu.memory_space<vmem>>, vector<1x512xbf16>
    %37 = vector.broadcast %36 : vector<1x512xbf16> to vector<16x512xbf16>
    %38 = arith.addf %35, %37 : vector<16x512xbf16>
    %cst_29 = arith.constant 0.000000e+00 : bf16
    %39 = vector.broadcast %cst_29 : bf16 to vector<16x512xbf16>
    %40 = arith.maximumf %38, %39 : vector<16x512xbf16>
    %c0_30 = arith.constant 0 : index
    %c0_31 = arith.constant 0 : index
    %41 = vector.load %arg12[%c0_30, %c0_31] : memref<512x128xbf16, #tpu.memory_space<vmem>>, vector<512x128xbf16>
    %cst_32 = arith.constant dense<0.000000e+00> : vector<16x128xf32>
    %42 = tpu.matmul %40, %41, %cst_32 {dimension_numbers = #tpu.dot_dimension_numbers<[1], [0], [0], [1], [0, 0, 1, 1], [], []>} : vector<16x512xbf16>, vector<512x128xbf16>, vector<16x128xf32> -> vector<16x128xf32>
    %c0_33 = arith.constant 0 : index
    %c0_34 = arith.constant 0 : index
    %43 = vector.load %arg13[%c0_33, %c0_34] : memref<1x128xf32, #tpu.memory_space<vmem>>, vector<1x128xf32>
    %44 = vector.broadcast %43 : vector<1x128xf32> to vector<16x128xf32>
    %45 = arith.addf %42, %44 : vector<16x128xf32>
    %c0_35 = arith.constant 0 : index
    %c0_36 = arith.constant 0 : index
    %46 = vector.load %arg14[%c0_35, %c0_36] : memref<16x128xf32, #tpu.memory_space<vmem>>, vector<16x128xf32>
    tpu.vector_store %arg14[%c0_35, %c0_36], %45 {strides = array<i32>} : memref<16x128xf32, #tpu.memory_space<vmem>>, vector<16x128xf32>,
    return
  }
  func.func @transform_0(%arg0: i32) -> (i32, i32) {
    %c0_i32 = arith.constant 0 : i32
    %c0_i32_0 = arith.constant 0 : i32
    return %arg0, %c0_i32 : i32, i32
  }
  func.func @transform_1(%arg0: i32) -> (i32, i32) {
    %c0_i32 = arith.constant 0 : i32
    %c0_i32_0 = arith.constant 0 : i32
    %c0_i32_1 = arith.constant 0 : i32
    return %c0_i32, %c0_i32_0 : i32, i32
  }
  func.func @transform_2(%arg0: i32) -> (i32, i32) {
    %c0_i32 = arith.constant 0 : i32
    %c0_i32_0 = arith.constant 0 : i32
    %c0_i32_1 = arith.constant 0 : i32
    return %c0_i32, %c0_i32_0 : i32, i32
  }
  func.func @transform_3(%arg0: i32) -> (i32, i32) {
    %c0_i32 = arith.constant 0 : i32
    %c0_i32_0 = arith.constant 0 : i32
    %c0_i32_1 = arith.constant 0 : i32
    return %c0_i32, %c0_i32_0 : i32, i32
  }
  func.func @transform_4(%arg0: i32) -> (i32, i32) {
    %c0_i32 = arith.constant 0 : i32
    %c0_i32_0 = arith.constant 0 : i32
    %c0_i32_1 = arith.constant 0 : i32
    return %c0_i32, %c0_i32_0 : i32, i32
  }
  func.func @transform_5(%arg0: i32) -> (i32, i32) {
    %c0_i32 = arith.constant 0 : i32
    %c0_i32_0 = arith.constant 0 : i32
    %c0_i32_1 = arith.constant 0 : i32
    return %c0_i32, %c0_i32_0 : i32, i32
  }
  func.func @transform_6(%arg0: i32) -> (i32, i32) {
    %c0_i32 = arith.constant 0 : i32
    %c0_i32_0 = arith.constant 0 : i32
    %c0_i32_1 = arith.constant 0 : i32
    return %c0_i32, %c0_i32_0 : i32, i32
  }
  func.func @transform_7(%arg0: i32) -> (i32, i32) {
    %c0_i32 = arith.constant 0 : i32
    %c0_i32_0 = arith.constant 0 : i32
    %c0_i32_1 = arith.constant 0 : i32
    return %c0_i32, %c0_i32_0 : i32, i32
  }
  func.func @transform_8(%arg0: i32) -> (i32, i32) {
    %c0_i32 = arith.constant 0 : i32
    %c0_i32_0 = arith.constant 0 : i32
    %c0_i32_1 = arith.constant 0 : i32
    return %c0_i32, %c0_i32_0 : i32, i32
  }
  func.func @transform_9(%arg0: i32) -> (i32, i32) {
    %c0_i32 = arith.constant 0 : i32
    %c0_i32_0 = arith.constant 0 : i32
    %c0_i32_1 = arith.constant 0 : i32
    return %c0_i32, %c0_i32_0 : i32, i32
  }
  func.func @transform_10(%arg0: i32) -> (i32, i32) {
    %c0_i32 = arith.constant 0 : i32
    %c0_i32_0 = arith.constant 0 : i32
    %c0_i32_1 = arith.constant 0 : i32
    return %c0_i32, %c0_i32_0 : i32, i32
  }
  func.func @transform_11(%arg0: i32) -> (i32, i32) {
    %c0_i32 = arith.constant 0 : i32
    %c0_i32_0 = arith.constant 0 : i32
    %c0_i32_1 = arith.constant 0 : i32
    return %c0_i32, %c0_i32_0 : i32, i32
  }
  func.func @transform_12(%arg0: i32) -> (i32, i32) {
    %c0_i32 = arith.constant 0 : i32
    %c0_i32_0 = arith.constant 0 : i32
    %c0_i32_1 = arith.constant 0 : i32
    return %c0_i32, %c0_i32_0 : i32, i32
  }
  func.func @transform_13(%arg0: i32) -> (i32, i32) {
    %c0_i32 = arith.constant 0 : i32
    %c0_i32_0 = arith.constant 0 : i32
    return %arg0, %c0_i32 : i32, i32
  }
}

module attributes {stable_mosaic.version = 11 : i64} {
  func.func @_mlp_kernel(%arg0: i32, %arg1: memref<16x128xbf16, #tpu.memory_space<vmem>>, %arg2: memref<128x768xbf16, #tpu.memory_space<vmem>>, %arg3: memref<1x768xbf16, #tpu.memory_space<vmem>>, %arg4: memref<768x512xbf16, #tpu.memory_space<vmem>>, %arg5: memref<1x512xbf16, #tpu.memory_space<vmem>>, %arg6: memref<512x256xbf16, #tpu.memory_space<vmem>>, %arg7: memref<1x256xbf16, #tpu.memory_space<vmem>>, %arg8: memref<256x512xbf16, #tpu.memory_space<vmem>>, %arg9: memref<1x512xbf16, #tpu.memory_space<vmem>>, %arg10: memref<512x512xbf16, #tpu.memory_space<vmem>>, %arg11: memref<1x512xbf16, #tpu.memory_space<vmem>>, %arg12: memref<512x128xbf16, #tpu.memory_space<vmem>>, %arg13: memref<1x128xf32, #tpu.memory_space<vmem>>, %arg14: memref<16x128xf32, #tpu.memory_space<vmem>>) attributes {dimension_semantics = [#tpu.dimension_semantics<parallel>], iteration_bounds = array<i64: 1>, scalar_prefetch = 0 : i64, scratch_operands = 0 : i64, tpu.core_type = #tpu.core_type<tc>, window_params = [{transform_indices = @transform_0, window_bounds = array<i64: 16, 128>}, {pipeline_mode = #tpu.pipeline_mode<synchronous>, transform_indices = @transform_1, window_bounds = array<i64: 128, 768>}, {pipeline_mode = #tpu.pipeline_mode<synchronous>, transform_indices = @transform_2, window_bounds = array<i64: 1, 768>}, {pipeline_mode = #tpu.pipeline_mode<synchronous>, transform_indices = @transform_3, window_bounds = array<i64: 768, 512>}, {pipeline_mode = #tpu.pipeline_mode<synchronous>, transform_indices = @transform_4, window_bounds = array<i64: 1, 512>}, {pipeline_mode = #tpu.pipeline_mode<synchronous>, transform_indices = @transform_5, window_bounds = array<i64: 512, 256>}, {pipeline_mode = #tpu.pipeline_mode<synchronous>, transform_indices = @transform_6, window_bounds = array<i64: 1, 256>}, {pipeline_mode = #tpu.pipeline_mode<synchronous>, transform_indices = @transform_7, window_bounds = array<i64: 256, 512>}, {pipeline_mode = #tpu.pipeline_mode<synchronous>, transform_indices = @transform_8, window_bounds = array<i64: 1, 512>}, {pipeline_mode = #tpu.pipeline_mode<synchronous>, transform_indices = @transform_9, window_bounds = array<i64: 512, 512>}, {pipeline_mode = #tpu.pipeline_mode<synchronous>, transform_indices = @transform_10, window_bounds = array<i64: 1, 512>}, {pipeline_mode = #tpu.pipeline_mode<synchronous>, transform_indices = @transform_11, window_bounds = array<i64: 512, 128>}, {pipeline_mode = #tpu.pipeline_mode<synchronous>, transform_indices = @transform_12, window_bounds = array<i64: 1, 128>}, {transform_indices = @transform_13, window_bounds = array<i64: 16, 128>}]} {
    %c0 = arith.constant 0 : index
    %c0_0 = arith.constant 0 : index
    %0 = vector.load %arg1[%c0, %c0_0] : memref<16x128xbf16, #tpu.memory_space<vmem>>, vector<16x128xbf16>
    %c0_1 = arith.constant 0 : index
    %c0_2 = arith.constant 0 : index
    %1 = vector.load %arg2[%c0_1, %c0_2] : memref<128x768xbf16, #tpu.memory_space<vmem>>, vector<128x768xbf16>
    %cst = arith.constant dense<0.000000e+00> : vector<16x768xf32>
    %2 = tpu.matmul %0, %1, %cst {dimension_numbers = #tpu.dot_dimension_numbers<[1], [0], [0], [1], [0, 0, 1, 1], [], []>} : vector<16x128xbf16>, vector<128x768xbf16>, vector<16x768xf32> -> vector<16x768xf32>
    %3 = arith.truncf %2 : vector<16x768xf32> to vector<16x768xbf16>
    %c0_3 = arith.constant 0 : index
    %c0_4 = arith.constant 0 : index
    %4 = vector.load %arg3[%c0_3, %c0_4] : memref<1x768xbf16, #tpu.memory_space<vmem>>, vector<1x768xbf16>
    %5 = vector.broadcast %4 : vector<1x768xbf16> to vector<16x768xbf16>
    %6 = arith.addf %3, %5 : vector<16x768xbf16>
    %cst_5 = arith.constant 0.000000e+00 : bf16
    %7 = vector.broadcast %cst_5 : bf16 to vector<16x768xbf16>
    %8 = arith.maximumf %6, %7 : vector<16x768xbf16>
    %c0_6 = arith.constant 0 : index
    %c0_7 = arith.constant 0 : index
    %9 = vector.load %arg4[%c0_6, %c0_7] : memref<768x512xbf16, #tpu.memory_space<vmem>>, vector<768x512xbf16>
    %cst_8 = arith.constant dense<0.000000e+00> : vector<16x512xf32>
    %10 = tpu.matmul %8, %9, %cst_8 {dimension_numbers = #tpu.dot_dimension_numbers<[1], [0], [0], [1], [0, 0, 1, 1], [], []>} : vector<16x768xbf16>, vector<768x512xbf16>, vector<16x512xf32> -> vector<16x512xf32>
    %11 = arith.truncf %10 : vector<16x512xf32> to vector<16x512xbf16>
    %c0_9 = arith.constant 0 : index
    %c0_10 = arith.constant 0 : index
    %12 = vector.load %arg5[%c0_9, %c0_10] : memref<1x512xbf16, #tpu.memory_space<vmem>>, vector<1x512xbf16>
    %13 = vector.broadcast %12 : vector<1x512xbf16> to vector<16x512xbf16>
    %14 = arith.addf %11, %13 : vector<16x512xbf16>
    %cst_11 = arith.constant 0.000000e+00 : bf16
    %15 = vector.broadcast %cst_11 : bf16 to vector<16x512xbf16>
    %16 = arith.maximumf %14, %15 : vector<16x512xbf16>
    %c0_12 = arith.constant 0 : index
    %c0_13 = arith.constant 0 : index
    %17 = vector.load %arg6[%c0_12, %c0_13] : memref<512x256xbf16, #tpu.memory_space<vmem>>, vector<512x256xbf16>
    %cst_14 = arith.constant dense<0.000000e+00> : vector<16x256xf32>
    %18 = tpu.matmul %16, %17, %cst_14 {dimension_numbers = #tpu.dot_dimension_numbers<[1], [0], [0], [1], [0, 0, 1, 1], [], []>} : vector<16x512xbf16>, vector<512x256xbf16>, vector<16x256xf32> -> vector<16x256xf32>
    %19 = arith.truncf %18 : vector<16x256xf32> to vector<16x256xbf16>
    %c0_15 = arith.constant 0 : index
    %c0_16 = arith.constant 0 : index
    %20 = vector.load %arg7[%c0_15, %c0_16] : memref<1x256xbf16, #tpu.memory_space<vmem>>, vector<1x256xbf16>
    %21 = vector.broadcast %20 : vector<1x256xbf16> to vector<16x256xbf16>
    %22 = arith.addf %19, %21 : vector<16x256xbf16>
    %cst_17 = arith.constant 0.000000e+00 : bf16
    %23 = vector.broadcast %cst_17 : bf16 to vector<16x256xbf16>
    %24 = arith.maximumf %22, %23 : vector<16x256xbf16>
    %c0_18 = arith.constant 0 : index
    %c0_19 = arith.constant 0 : index
    %25 = vector.load %arg8[%c0_18, %c0_19] : memref<256x512xbf16, #tpu.memory_space<vmem>>, vector<256x512xbf16>
    %cst_20 = arith.constant dense<0.000000e+00> : vector<16x512xf32>
    %26 = tpu.matmul %24, %25, %cst_20 {dimension_numbers = #tpu.dot_dimension_numbers<[1], [0], [0], [1], [0, 0, 1, 1], [], []>} : vector<16x256xbf16>, vector<256x512xbf16>, vector<16x512xf32> -> vector<16x512xf32>
    %27 = arith.truncf %26 : vector<16x512xf32> to vector<16x512xbf16>
    %c0_21 = arith.constant 0 : index
    %c0_22 = arith.constant 0 : index
    %28 = vector.load %arg9[%c0_21, %c0_22] : memref<1x512xbf16, #tpu.memory_space<vmem>>, vector<1x512xbf16>
    %29 = vector.broadcast %28 : vector<1x512xbf16> to vector<16x512xbf16>
    %30 = arith.addf %27, %29 : vector<16x512xbf16>
    %cst_23 = arith.constant 0.000000e+00 : bf16
    %31 = vector.broadcast %cst_23 : bf16 to vector<16x512xbf16>
    %32 = arith.maximumf %30, %31 : vector<16x512xbf16>
    %c0_24 = arith.constant 0 : index
    %c0_25 = arith.constant 0 : index
    %33 = vector.load %arg10[%c0_24, %c0_25] : memref<512x512xbf16, #tpu.memory_space<vmem>>, vector<512x512xbf16>
    %cst_26 = arith.constant dense<0.000000e+00> : vector<16x512xf32>
    %34 = tpu.matmul %32, %33, %cst_26 {dimension_numbers = #tpu.dot_dimension_numbers<[1], [0], [0], [1], [0, 0, 1, 1], [], []>} : vector<16x512xbf16>, vector<512x512xbf16>, vector<16x512xf32> -> vector<16x512xf32>
    %35 = arith.truncf %34 : vector<16x512xf32> to vector<16x512xbf16>
    %c0_27 = arith.constant 0 : index
    %c0_28 = arith.constant 0 : index
    %36 = vector.load %arg11[%c0_27, %c0_28] : memref<1x512xbf16, #tpu.memory_space<vmem>>, vector<1x512xbf16>
    %37 = vector.broadcast %36 : vector<1x512xbf16> to vector<16x512xbf16>
    %38 = arith.addf %35, %37 : vector<16x512xbf16>
    %cst_29 = arith.constant 0.000000e+00 : bf16
    %39 = vector.broadcast %cst_29 : bf16 to vector<16x512xbf16>
    %40 = arith.maximumf %38, %39 : vector<16x512xbf16>
    %c0_30 = arith.constant 0 : index
    %c0_31 = arith.constant 0 : index
    %41 = vector.load %arg12[%c0_30, %c0_31] : memref<512x128xbf16, #tpu.memory_space<vmem>>, vector<512x128xbf16>
    %cst_32 = arith.constant dense<0.000000e+00> : vector<16x128xf32>
    %42 = tpu.matmul %40, %41, %cst_32 {dimension_numbers = #tpu.dot_dimension_numbers<[1], [0], [0], [1], [0, 0, 1, 1], [], []>} : vector<16x512xbf16>, vector<512x128xbf16>, vector<16x128xf32> -> vector<16x128xf32>
    %c0_33 = arith.constant 0 : index
    %c0_34 = arith.constant 0 : index
    %43 = vector.load %arg13[%c0_33, %c0_34] : memref<1x128xf32, #tpu.memory_space<vmem>>, vector<1x128xf32>
    %44 = vector.broadcast %43 : vector<1x128xf32> to vector<16x128xf32>
    %45 = arith.addf %42, %44 : vector<16x128xf32>
    %c0_35 = arith.constant 0 : index
    %c0_36 = arith.constant 0 : index
    %46 = vector.load %arg14[%c0_35, %c0_36] : memref<16x128xf32, #tpu.memory_space<vmem>>, vector<16x128xf32>
    tpu.vector_store %arg14[%c0_35, %c0_36], %45 {strides = array<i32>} : memref<16x128xf32, #tpu.memory_space<vmem>>, vector<16x128xf32>,
    return
  }
  func.func @transform_0(%arg0: i32) -> (i32, i32) {
    %c0_i32 = arith.constant 0 : i32
    %c0_i32_0 = arith.constant 0 : i32
    return %arg0, %c0_i32 : i32, i32
  }
  func.func @transform_1(%arg0: i32) -> (i32, i32) {
    %c0_i32 = arith.constant 0 : i32
    %c0_i32_0 = arith.constant 0 : i32
    %c0_i32_1 = arith.constant 0 : i32
    return %c0_i32, %c0_i32_0 : i32, i32
  }
  func.func @transform_2(%arg0: i32) -> (i32, i32) {
    %c0_i32 = arith.constant 0 : i32
    %c0_i32_0 = arith.constant 0 : i32
    %c0_i32_1 = arith.constant 0 : i32
    return %c0_i32, %c0_i32_0 : i32, i32
  }
  func.func @transform_3(%arg0: i32) -> (i32, i32) {
    %c0_i32 = arith.constant 0 : i32
    %c0_i32_0 = arith.constant 0 : i32
    %c0_i32_1 = arith.constant 0 : i32
    return %c0_i32, %c0_i32_0 : i32, i32
  }
  func.func @transform_4(%arg0: i32) -> (i32, i32) {
    %c0_i32 = arith.constant 0 : i32
    %c0_i32_0 = arith.constant 0 : i32
    %c0_i32_1 = arith.constant 0 : i32
    return %c0_i32, %c0_i32_0 : i32, i32
  }
  func.func @transform_5(%arg0: i32) -> (i32, i32) {
    %c0_i32 = arith.constant 0 : i32
    %c0_i32_0 = arith.constant 0 : i32
    %c0_i32_1 = arith.constant 0 : i32
    return %c0_i32, %c0_i32_0 : i32, i32
  }
  func.func @transform_6(%arg0: i32) -> (i32, i32) {
    %c0_i32 = arith.constant 0 : i32
    %c0_i32_0 = arith.constant 0 : i32
    %c0_i32_1 = arith.constant 0 : i32
    return %c0_i32, %c0_i32_0 : i32, i32
  }
  func.func @transform_7(%arg0: i32) -> (i32, i32) {
    %c0_i32 = arith.constant 0 : i32
    %c0_i32_0 = arith.constant 0 : i32
    %c0_i32_1 = arith.constant 0 : i32
    return %c0_i32, %c0_i32_0 : i32, i32
  }
  func.func @transform_8(%arg0: i32) -> (i32, i32) {
    %c0_i32 = arith.constant 0 : i32
    %c0_i32_0 = arith.constant 0 : i32
    %c0_i32_1 = arith.constant 0 : i32
    return %c0_i32, %c0_i32_0 : i32, i32
  }
  func.func @transform_9(%arg0: i32) -> (i32, i32) {
    %c0_i32 = arith.constant 0 : i32
    %c0_i32_0 = arith.constant 0 : i32
    %c0_i32_1 = arith.constant 0 : i32
    return %c0_i32, %c0_i32_0 : i32, i32
  }
  func.func @transform_10(%arg0: i32) -> (i32, i32) {
    %c0_i32 = arith.constant 0 : i32
    %c0_i32_0 = arith.constant 0 : i32
    %c0_i32_1 = arith.constant 0 : i32
    return %c0_i32, %c0_i32_0 : i32, i32
  }
  func.func @transform_11(%arg0: i32) -> (i32, i32) {
    %c0_i32 = arith.constant 0 : i32
    %c0_i32_0 = arith.constant 0 : i32
    %c0_i32_1 = arith.constant 0 : i32
    return %c0_i32, %c0_i32_0 : i32, i32
  }
  func.func @transform_12(%arg0: i32) -> (i32, i32) {
    %c0_i32 = arith.constant 0 : i32
    %c0_i32_0 = arith.constant 0 : i32
    %c0_i32_1 = arith.constant 0 : i32
    return %c0_i32, %c0_i32_0 : i32, i32
  }
  func.func @transform_13(%arg0: i32) -> (i32, i32) {
    %c0_i32 = arith.constant 0 : i32
    %c0_i32_0 = arith.constant 0 : i32
    return %arg0, %c0_i32 : i32, i32
  }
}

</mosaic_0001>

<bundles_post_ra>
// kernel: tpu_custom_call.1
= control target key start
LH: loop header
LB: loop body
LE: loop exit
PB: predicated region body
PF: predicated region fallthrough
CT: control target
= control target key end

     0   :  { %18 = vsyncpa [#allocation3], 0  ;;  %s6449_s0 = inlined_call_operand.hbm [shape: bf16[16,128], index: 0, kind: input, shape index: {}]   ;;  %s6450_s1 = inlined_call_operand.hbm [shape: bf16[128,768], index: 1, kind: input, shape index: {}]   ;;  %s6451_s2 = inlined_call_operand.hbm [shape: bf16[1,768], index: 2, kind: input, shape index: {}]   ;;  %s6452_s3 = inlined_call_operand.hbm [shape: bf16[768,512], index: 3, kind: input, shape index: {}]   ;;  %s6453_s4 = inlined_call_operand.vmem [shape: bf16[1,512], index: 4, kind: input, shape index: {}]   ;;  %s6454_s5 = inlined_call_operand.hbm [shape: bf16[512,256], index: 5, kind: input, shape index: {}]   ;;  %s6455_s6 = inlined_call_operand.hbm [shape: bf16[1,256], index: 6, kind: input, shape index: {}]   ;;  %s6456_s7 = inlined_call_operand.hbm [shape: bf16[256,512], index: 7, kind: input, shape index: {}]   ;;  %s6457_s8 = inlined_call_operand.vmem [shape: bf16[1,512], index: 8, kind: input, shape index: {}]   ;;  %s6458_s9 = inlined_call_operand.hbm [shape: bf16[512,512], index: 9, kind: input, shape index: {}]   ;;  %s6459_s10 = inlined_call_operand.vmem [shape: bf16[1,512], index: 10, kind: input, shape index: {}]   ;;  %s6460_s11 = inlined_call_operand.hbm [shape: bf16[512,128], index: 11, kind: input, shape index: {}]   ;;  %s6461_s12 = inlined_call_operand.vmem [shape: f32[1,128], index: 12, kind: input, shape index: {}]   ;;  %s6462_s13 = inlined_call_operand.hbm [shape: f32[16,128], index: 13, kind: output, shape index: {}]  }
   0x1   :  { %19 = vsyncpa [#allocation6], 0 }
   0x2   :  { %20 = vsyncpa [#allocation9], 0 }
   0x3   :  { %21 = vsyncpa [#allocation12], 0 }
   0x4   :  { %22 = vsyncpa [#allocation15], 0 }
   0x5   :  { %23 = vsyncpa [#allocation4], 0  ;;  %s6186_s25 = smov [#allocation5]  }
   0x6   :  { %s41_s26 = sshll.u32 %s6186_s25, 4  ;;  %s42_s26 = int_to_ptr.vmem [resolvable:$true] %s41_s26 }
   0x7   :  { %s5982_s27 = scalar_lea.vmem %s42_s26, 6144  ;;  %p5987_p1 = scmp.lt.s32.totalorder %s42_s26, %s42_s26 }
   0x8   :  { %p5983_p0 = scmp.ne.s32.totalorder %s42_s26, %s5982_s27  ;;  %p5988_p2 = scmp.lt.s32.totalorder %s5982_s27, %s5982_s27 }
   0xa   :  { %p5989_p3 = por %p5988_p2, %p5987_p1 }
   0xc   :  { %p5990_p4 = pnand %p5989_p3, %p5983_p0 }
   0xe   :  { %5993 = shalt.err (!%p5990_p4)
}
   0xf   :  { %s6187_s28 = smov 384   ;;  %s6188_s29 = smov 24  }
  0x10   :  { %47 = dma.hbm_to_vmem [thread:$0]  %s6450_s1, 6144, %s42_s26, [#allocation6], %s6187_s28, %s6187_s28, %s6188_s29  }
  0x11   :  { %s6189_s15 = smov [#allocation8]  }
  0x12   :  { %s63_s16 = sshll.u32 %s6189_s15, 4  ;;  %s64_s16 = int_to_ptr.vmem [resolvable:$true] %s63_s16 }
  0x13   :  { %s6002_s17 = scalar_lea.vmem %s64_s16, 24576  ;;  %p6007_p6 = scmp.lt.s32.totalorder %s64_s16, %s64_s16 }
  0x14   :  { %p6003_p5 = scmp.ne.s32.totalorder %s64_s16, %s6002_s17  ;;  %p6008_p7 = scmp.lt.s32.totalorder %s6002_s17, %s6002_s17 }
  0x16   :  { %p6009_p8 = por %p6008_p7, %p6007_p6 }
  0x18   :  { %p6010_p9 = pnand %p6009_p8, %p6003_p5 }
  0x1a   :  { %6013 = shalt.err (!%p6010_p9)
}
  0x1b   :  { %s6190_s18 = smov 256   ;;  %s6191_s19 = smov 16  }
  0x1c   :  { %69 = dma.hbm_to_vmem [thread:$0]  %s6452_s3, 24576, %s64_s16, [#allocation9], %s6190_s18, %s6190_s18, %s6191_s19  }
  0x1d   :  { %s6192_s1 = smov [#allocation11]   ;;  %s6193_s23 = smov [#allocation14]  }
  0x1e   :  { %s90_s22 = sshll.u32 %s6192_s1, 4  ;;  %s113_s24 = sshll.u32 %s6193_s23, 4  ;;  %s91_s22 = int_to_ptr.vmem [resolvable:$true] %s90_s22  ;;  %s114_s24 = int_to_ptr.vmem [resolvable:$true] %s113_s24 }
  0x1f   :  { %s6022_s25 = scalar_lea.vmem %s91_s22, 32  ;;  %p6027_p11 = scmp.lt.s32.totalorder %s91_s22, %s91_s22 }
  0x20   :  { %p6023_p10 = scmp.ne.s32.totalorder %s91_s22, %s6022_s25  ;;  %p6028_p12 = scmp.lt.s32.totalorder %s6022_s25, %s6022_s25 }
  0x22   :  { %p6029_p13 = por %p6028_p12, %p6027_p11 }
  0x24   :  { %p6030_p0 = pnand %p6029_p13, %p6023_p10 }
  0x26   :  { %6033 = shalt.err (!%p6030_p0)
}
  0x27   :  { %93 = dma.hbm_to_vmem [thread:$0]  %s6455_s6, 32, %s91_s22, [#allocation12]  }
  0x28   :  { %s6042_s28 = scalar_lea.vmem %s114_s24, 16384  ;;  %p6047_p2 = scmp.lt.s32.totalorder %s114_s24, %s114_s24 }
  0x29   :  { %p6043_p1 = scmp.ne.s32.totalorder %s114_s24, %s6042_s28  ;;  %p6048_p3 = scmp.lt.s32.totalorder %s6042_s28, %s6042_s28 }
  0x2b   :  { %p6049_p4 = por %p6048_p3, %p6047_p2 }
  0x2d   :  { %p6050_p5 = pnand %p6049_p4, %p6043_p1 }
  0x2f   :  { %6053 = shalt.err (!%p6050_p5)
}
  0x30   :  { %119 = dma.hbm_to_vmem [thread:$0]  %s6458_s9, 16384, %s114_s24, [#allocation15], %s6190_s18, %s6190_s18, %s6191_s19  }
  0x31   :  { %s6194_s30 = smov [#allocation2]  }
  0x32   :  { %s29_s14 = sshll.u32 %s6194_s30, 4  ;;  %s30_s14 = int_to_ptr.vmem [resolvable:$true] %s29_s14 }
  0x33   :  { %s6062_s15 = scalar_lea.vmem %s30_s14, 128  ;;  %p6067_p7 = scmp.lt.s32.totalorder %s30_s14, %s30_s14 }
  0x34   :  { %p6063_p6 = scmp.ne.s32.totalorder %s30_s14, %s6062_s15  ;;  %p6068_p8 = scmp.lt.s32.totalorder %s6062_s15, %s6062_s15 }
  0x36   :  { %p6069_p9 = por %p6068_p8, %p6067_p7 }
  0x38   :  { %p6070_p10 = pnand %p6069_p9, %p6063_p6 }
  0x3a   :  { %6073 = shalt.err (!%p6070_p10)
}
  0x3b   :  { %s6195_s6 = smov 64   ;;  %s6196_s16 = smov 4  }
  0x3c   :  { %35 = dma.hbm_to_vmem [thread:$0]  %s6449_s0, 128, %s30_s14, [#allocation3], %s6195_s6, %s6195_s6, %s6196_s16  }
  0x3d   :  { %s6197_s9 = smov [#allocation7]   ;;  %s6198_s1 = smov [#allocation10]  }
  0x3e   :  { %s54_s21 = sshll.u32 %s6197_s9, 4  ;;  %s77_s22 = sshll.u32 %s6198_s1, 4  ;;  %s55_s21 = int_to_ptr.vmem [resolvable:$true] %s54_s21  ;;  %s78_s22 = int_to_ptr.vmem [resolvable:$true] %s77_s22 }
  0x3f   :  { %s6082_s23 = scalar_lea.vmem %s55_s21, 96  ;;  %p6087_p12 = scmp.lt.s32.totalorder %s55_s21, %s55_s21 }
  0x40   :  { %p6083_p11 = scmp.ne.s32.totalorder %s55_s21, %s6082_s23  ;;  %p6088_p13 = scmp.lt.s32.totalorder %s6082_s23, %s6082_s23 }
  0x42   :  { %p6089_p0 = por %p6088_p13, %p6087_p12 }
  0x44   :  { %p6090_p1 = pnand %p6089_p0, %p6083_p11 }
  0x46   :  { %6093 = shalt.err (!%p6090_p1)
}
  0x47   :  { %57 = dma.hbm_to_vmem [thread:$0]  %s6451_s2, 96, %s55_s21, [#allocation6]  }
  0x48   :  { %s6102_s26 = scalar_lea.vmem %s78_s22, 8192  ;;  %p6107_p3 = scmp.lt.s32.totalorder %s78_s22, %s78_s22 }
  0x49   :  { %p6103_p2 = scmp.ne.s32.totalorder %s78_s22, %s6102_s26  ;;  %p6108_p4 = scmp.lt.s32.totalorder %s6102_s26, %s6102_s26 }
  0x4b   :  { %p6109_p5 = por %p6108_p4, %p6107_p3 }
  0x4d   :  { %p6110_p6 = pnand %p6109_p5, %p6103_p2 }
  0x4f   :  { %6113 = shalt.err (!%p6110_p6)
}
  0x50   :  { %s6199_s0 = smov 128   ;;  %s6200_s27 = smov 8  }
  0x51   :  { %83 = dma.hbm_to_vmem [thread:$0]  %s6454_s5, 8192, %s78_s22, [#allocation9], %s6199_s0, %s6199_s0, %s6200_s27  }
  0x52   :  { %s6201_s29 = smov [#allocation13]   ;;  %s6202_s2 = smov [#allocation16]  }
  0x53   :  { %s99_s30 = sshll.u32 %s6201_s29, 4  ;;  %s127_s14 = sshll.u32 %s6202_s2, 4  ;;  %s100_s30 = int_to_ptr.vmem [resolvable:$true] %s99_s30  ;;  %s128_s14 = int_to_ptr.vmem [resolvable:$true] %s127_s14 }
  0x54   :  { %s6122_s15 = scalar_lea.vmem %s100_s30, 8192  ;;  %p6127_p8 = scmp.lt.s32.totalorder %s100_s30, %s100_s30 }
  0x55   :  { %p6123_p7 = scmp.ne.s32.totalorder %s100_s30, %s6122_s15  ;;  %p6128_p9 = scmp.lt.s32.totalorder %s6122_s15, %s6122_s15 }
  0x57   :  { %p6129_p10 = por %p6128_p9, %p6127_p8 }
  0x59   :  { %p6130_p11 = pnand %p6129_p10, %p6123_p7 }
  0x5b   :  { %6133 = shalt.err (!%p6130_p11)
}
  0x5c   :  { %105 = dma.hbm_to_vmem [thread:$0]  %s6456_s7, 8192, %s100_s30, [#allocation12], %s6190_s18, %s6190_s18, %s6191_s19  }
  0x5d   :  { %s6142_s5 = scalar_lea.vmem %s128_s14, 4096  ;;  %p6147_p13 = scmp.lt.s32.totalorder %s128_s14, %s128_s14 }
  0x5e   :  { %p6143_p12 = scmp.ne.s32.totalorder %s128_s14, %s6142_s5  ;;  %p6148_p0 = scmp.lt.s32.totalorder %s6142_s5, %s6142_s5 }
  0x60   :  { %p6149_p1 = por %p6148_p0, %p6147_p13 }
  0x62   :  { %p6150_p2 = pnand %p6149_p1, %p6143_p12 }
  0x64   :  { %6153 = shalt.err (!%p6150_p2)
}
  0x65   :  { %133 = dma.hbm_to_vmem [thread:$0]  %s6460_s11, 4096, %s128_s14, [#allocation15], %s6195_s6, %s6195_s6, %s6196_s16  }
  0x66   :  { %6174 = dma.done.wait [#allocation3], 128  }
  0x67   :  { %6175 = vsyncadd [#allocation3], 4294967168 }
  0x68   :  { %6176 = dma.done.wait [#allocation6], 6240  }
  0x69   :  { %6177 = vsyncadd [#allocation6], 4294961056 }
  0x6a   :  { %6178 = dma.done.wait [#allocation9], 32768  }
  0x6b   :  { %6179 = vsyncadd [#allocation9], 4294934528 }
  0x6c   :  { %6180 = dma.done.wait [#allocation12], 8224  }
  0x6d   :  { %6181 = vsyncadd [#allocation12], 4294959072 }
  0x6e   :  { %6182 = dma.done.wait [#allocation15], 20480  }
  0x6f   :  { %6183 = vsyncadd [#allocation15], 4294946816  ;;  %v6203_v0 = vmov 0   ;;  %v5196_v1 = vld [vmem:[#allocation5 + $0x154] ss:$24 sps:$4 sm:$0xff]   ;;  %v6323_v34 = vld [vmem:[#allocation2] sm:$0xff]  }
  0x70   :  { %492 = vmatprep.mubr.bf16.mxu0 %v6203_v0  ;;  %535 = vmatprep.mubr.bf16.mxu1 %v6203_v0  ;;  %v5198_v2 = vld [vmem:[#allocation5 + $0x15c] ss:$24 sps:$4 sm:$0xff]   ;;  %v5200_v3 = vld [vmem:[#allocation5 + $0x150] ss:$24 sps:$4 sm:$0xff]   ;;  %v5204_v6 = vld [vmem:[#allocation5 + $0x12c] ss:$24 sps:$4 sm:$0xff]  }
  0x71   :  { %460 = vmatprep.subr.bf16.mxu0 %v5196_v1  ;;  %v5201_v4 = vld [vmem:[#allocation5 + $0x158] ss:$24 sps:$4 sm:$0xff]   ;;  %503 = vmatprep.subr.bf16.mxu1 %v5198_v2  ;;  %v5202_v5 = vld [vmem:[#allocation5 + $0x124] ss:$24 sps:$4 sm:$0xff]   ;;  %v5207_v8 = vld [vmem:[#allocation5 + $0x128] ss:$24 sps:$4 sm:$0xff]  }
  0x72   :  { %461 = vmatpush1.bf16.msra.mxu0 %v5200_v3  ;;  %504 = vmatpush1.bf16.msra.mxu1 %v5201_v4  ;;  %v5206_v7 = vld [vmem:[#allocation5 + $0x120] ss:$24 sps:$4 sm:$0xff]   ;;  %v5208_v9 = vld [vmem:[#allocation5 + $0xf4] ss:$24 sps:$4 sm:$0xff]   ;;  %v5212_v11 = vld [vmem:[#allocation5 + $0xf0] ss:$24 sps:$4 sm:$0xff]  }
  0x73   :  { %462 = vmatprep.subr.bf16.mxu0 %v5202_v5  ;;  %505 = vmatprep.subr.bf16.mxu1 %v5204_v6  ;;  %v5210_v10 = vld [vmem:[#allocation5 + $0xfc] ss:$24 sps:$4 sm:$0xff]   ;;  %v5213_v12 = vld [vmem:[#allocation5 + $0xf8] ss:$24 sps:$4 sm:$0xff]   ;;  %v5216_v14 = vld [vmem:[#allocation5 + $0xcc] ss:$24 sps:$4 sm:$0xff]  }
  0x74   :  { %v5214_v13 = vld [vmem:[#allocation5 + $0xc4] ss:$24 sps:$4 sm:$0xff]   ;;  %v5218_v15 = vld [vmem:[#allocation5 + $0xc0] ss:$24 sps:$4 sm:$0xff]   ;;  %v5220_v17 = vld [vmem:[#allocation5 + $0x94] ss:$24 sps:$4 sm:$0xff]  }
  0x75   :  { %v5219_v16 = vld [vmem:[#allocation5 + $0xc8] ss:$24 sps:$4 sm:$0xff]   ;;  %v5222_v18 = vld [vmem:[#allocation5 + $0x9c] ss:$24 sps:$4 sm:$0xff]   ;;  %v5225_v20 = vld [vmem:[#allocation5 + $0x98] ss:$24 sps:$4 sm:$0xff]  }
  0x76   :  { %463 = vmatpush1.bf16.msra.mxu0 %v5206_v7  ;;  %506 = vmatpush1.bf16.msra.mxu1 %v5207_v8  ;;  %v5224_v19 = vld [vmem:[#allocation5 + $0x90] ss:$24 sps:$4 sm:$0xff]   ;;  %v5226_v21 = vld [vmem:[#allocation5 + $0x64] ss:$24 sps:$4 sm:$0xff]   ;;  %v5230_v23 = vld [vmem:[#allocation5 + $0x60] ss:$24 sps:$4 sm:$0xff]  }
  0x77   :  { %464 = vmatprep.subr.bf16.mxu0 %v5208_v9  ;;  %507 = vmatprep.subr.bf16.mxu1 %v5210_v10  ;;  %v5228_v22 = vld [vmem:[#allocation5 + $0x6c] ss:$24 sps:$4 sm:$0xff]   ;;  %v5231_v24 = vld [vmem:[#allocation5 + $0x68] ss:$24 sps:$4 sm:$0xff]   ;;  %v5234_v26 = vld [vmem:[#allocation5 + $0x3c] ss:$24 sps:$4 sm:$0xff]  }
  0x78   :  { %v5232_v25 = vld [vmem:[#allocation5 + $0x34] ss:$24 sps:$4 sm:$0xff]   ;;  %v5236_v27 = vld [vmem:[#allocation5 + $0x30] ss:$24 sps:$4 sm:$0xff]   ;;  %v5238_v29 = vld [vmem:[#allocation5 + $0x4] ss:$24 sps:$4 sm:$0xff]  }
  0x79   :  { %v5237_v28 = vld [vmem:[#allocation5 + $0x38] ss:$24 sps:$4 sm:$0xff]   ;;  %v5240_v30 = vld [vmem:[#allocation5 + $0xc] ss:$24 sps:$4 sm:$0xff]   ;;  %v5243_v32 = vld [vmem:[#allocation5 + $0x8] ss:$24 sps:$4 sm:$0xff]  }
  0x7a   :  { %465 = vmatpush1.bf16.msra.mxu0 %v5212_v11  ;;  %508 = vmatpush1.bf16.msra.mxu1 %v5213_v12  ;;  %v5242_v31 = vld [vmem:[#allocation5] ss:$24 sps:$4 sm:$0xff]   ;;  %v5247_v33 = vld [vmem:[#allocation5 + $0x164] ss:$24 sps:$4 sm:$0xff]   ;;  %v5250_v36 = vld [vmem:[#allocation5 + $0x134] ss:$24 sps:$4 sm:$0xff]  }
  0x7b   :  { %466 = vmatprep.subr.bf16.mxu0 %v5214_v13  ;;  %509 = vmatprep.subr.bf16.mxu1 %v5216_v14  ;;  %v5245_v35 = vld [vmem:[#allocation5 + $0x160] ss:$24 sps:$4 sm:$0xff]   ;;  %v5248_v39 = vld [vmem:[#allocation5 + $0x130] ss:$24 sps:$4 sm:$0xff]   ;;  %v5253_v41 = vld [vmem:[#allocation5 + $0x104] ss:$24 sps:$4 sm:$0xff]  }
  0x7c   :  { %v5269_v37 = vld [vmem:[#allocation8 + $0xe0] ss:$16 sps:$4 sm:$0xff]   ;;  %v5271_v38 = vld [vmem:[#allocation8 + $0xe4] ss:$16 sps:$4 sm:$0xff]   ;;  %s6205_s16 = smov [#allocation17]  }
  0x7d   :  { %v5277_v40 = vld [vmem:[#allocation8 + $0xc4] ss:$16 sps:$4 sm:$0xff]   ;;  %v5275_v42 = vld [vmem:[#allocation8 + $0xc0] ss:$16 sps:$4 sm:$0xff]   ;;  %s4582_s1 = sshll.u32 %s6205_s16, 4  ;;  %s4583_s1 = int_to_ptr.vmem [resolvable:$true] %s4582_s1 }
  0x7e   :  { %467 = vmatpush1.bf16.msra.mxu0 %v5218_v15  ;;  %510 = vmatpush1.bf16.msra.mxu1 %v5219_v16  ;;  %v5283_v43 = vld [vmem:[#allocation8 + $0xa4] ss:$16 sps:$4 sm:$0xff]   ;;  %v5281_v46 = vld [vmem:[#allocation8 + $0xa0] ss:$16 sps:$4 sm:$0xff]   ;;  %s6154_s22 = scalar_lea.vmem %s4583_s1, 256  ;;  %p6159_p4 = scmp.lt.s32.totalorder %s4583_s1, %s4583_s1 }
  0x7f   :  { %468 = vmatprep.subr.bf16.mxu0 %v5220_v17  ;;  %511 = vmatprep.subr.bf16.mxu1 %v5222_v18  ;;  %v5251_v44 = vld [vmem:[#allocation5 + $0x100] ss:$24 sps:$4 sm:$0xff]   ;;  %v5256_v45 = vld [vmem:[#allocation5 + $0xd4] ss:$24 sps:$4 sm:$0xff]   ;;  %v5254_v48 = vld [vmem:[#allocation5 + $0xd0] ss:$24 sps:$4 sm:$0xff]   ;;  %p6155_p3 = scmp.ne.s32.totalorder %s4583_s1, %s6154_s22  ;;  %p6160_p5 = scmp.lt.s32.totalorder %s6154_s22, %s6154_s22 }
  0x80   :  { %v5289_v47 = vld [vmem:[#allocation8 + $0x84] ss:$16 sps:$4 sm:$0xff]   ;;  %v5287_v50 = vld [vmem:[#allocation8 + $0x80] ss:$16 sps:$4 sm:$0xff]  }
  0x81   :  { %v5259_v49 = vld [vmem:[#allocation5 + $0xa4] ss:$24 sps:$4 sm:$0xff]   ;;  %v5257_v52 = vld [vmem:[#allocation5 + $0xa0] ss:$24 sps:$4 sm:$0xff]   ;;  %v5262_v53 = vld [vmem:[#allocation5 + $0x74] ss:$24 sps:$4 sm:$0xff]   ;;  %p6161_p6 = por %p6160_p5, %p6159_p4 }
  0x82   :  { %469 = vmatpush1.bf16.msra.mxu0 %v5224_v19  ;;  %512 = vmatpush1.bf16.msra.mxu1 %v5225_v20  ;;  %v5295_v51 = vld [vmem:[#allocation8 + $0x64] ss:$16 sps:$4 sm:$0xff]   ;;  %v5293_v54 = vld [vmem:[#allocation8 + $0x60] ss:$16 sps:$4 sm:$0xff]  }
  0x83   :  { %470 = vmatprep.subr.bf16.mxu0 %v5226_v21  ;;  %513 = vmatprep.subr.bf16.mxu1 %v5228_v22  ;;  %v5301_v55 = vld [vmem:[#allocation8 + $0x44] ss:$16 sps:$4 sm:$0xff]   ;;  %v5299_v58 = vld [vmem:[#allocation8 + $0x40] ss:$16 sps:$4 sm:$0xff]   ;;  %p6162_p7 = pnand %p6161_p6, %p6155_p3 }
  0x84   :  { %v5260_v56 = vld [vmem:[#allocation5 + $0x70] ss:$24 sps:$4 sm:$0xff]   ;;  %v5265_v57 = vld [vmem:[#allocation5 + $0x44] ss:$24 sps:$4 sm:$0xff]   ;;  %v5263_v60 = vld [vmem:[#allocation5 + $0x40] ss:$24 sps:$4 sm:$0xff]  }
  0x85   :  { %v5307_v59 = vld [vmem:[#allocation8 + $0x24] ss:$16 sps:$4 sm:$0xff]   ;;  %v5305_v62 = vld [vmem:[#allocation8 + $0x20] ss:$16 sps:$4 sm:$0xff]  }
  0x86   :  { %471 = vmatpush1.bf16.msra.mxu0 %v5230_v23  ;;  %514 = vmatpush1.bf16.msra.mxu1 %v5231_v24  ;;  %v5268_v61 = vld [vmem:[#allocation5 + $0x14] ss:$24 sps:$4 sm:$0xff]   ;;  %v5266_v1 = vld [vmem:[#allocation5 + $0x10] ss:$24 sps:$4 sm:$0xff]  }
  0x87   :  { %472 = vmatprep.subr.bf16.mxu0 %v5232_v25  ;;  %515 = vmatprep.subr.bf16.mxu1 %v5234_v26  ;;  %v5313_v63 = vld [vmem:[#allocation8 + $0x4] ss:$16 sps:$4 sm:$0xff]   ;;  %v5311_v3 = vld [vmem:[#allocation8] ss:$16 sps:$4 sm:$0xff]  }
  0x88   :  { %v5274_v2 = vld [vmem:[#allocation8 + $0x2e4] ss:$16 sps:$4 sm:$0xff]   ;;  %v5272_v5 = vld [vmem:[#allocation8 + $0x2e0] ss:$16 sps:$4 sm:$0xff]  }
  0x89   :  { %v5319_v4 = vld [vmem:[#allocation8 + $0x1e4] ss:$16 sps:$4 sm:$0xff]   ;;  %v5278_v7 = vld [vmem:[#allocation8 + $0x2c0] ss:$16 sps:$4 sm:$0xff]  }
  0x8a   :  { %473 = vmatpush1.bf16.msra.mxu0 %v5236_v27  ;;  %516 = vmatpush1.bf16.msra.mxu1 %v5237_v28  ;;  %v5280_v6 = vld [vmem:[#allocation8 + $0x2c4] ss:$16 sps:$4 sm:$0xff]   ;;  %v5317_v8 = vld [vmem:[#allocation8 + $0x1e0] ss:$16 sps:$4 sm:$0xff]  }
  0x8b   :  { %474 = vmatprep.subr.bf16.mxu0 %v5238_v29  ;;  %517 = vmatprep.subr.bf16.mxu1 %v5240_v30  ;;  %v5286_v9 = vld [vmem:[#allocation8 + $0x2a4] ss:$16 sps:$4 sm:$0xff]   ;;  %v5323_v11 = vld [vmem:[#allocation8 + $0x1c0] ss:$16 sps:$4 sm:$0xff]  }
  0x8c   :  { %v5325_v10 = vld [vmem:[#allocation8 + $0x1c4] ss:$16 sps:$4 sm:$0xff]   ;;  %v5284_v13 = vld [vmem:[#allocation8 + $0x2a0] ss:$16 sps:$4 sm:$0xff]  }
  0x8d   :  { %v5331_v12 = vld [vmem:[#allocation8 + $0x1a4] ss:$16 sps:$4 sm:$0xff]   ;;  %v5329_v15 = vld [vmem:[#allocation8 + $0x1a0] ss:$16 sps:$4 sm:$0xff]  }
  0x8e   :  { %475 = vmatpush1.bf16.msra.mxu0 %v5242_v31  ;;  %518 = vmatpush1.bf16.msra.mxu1 %v5243_v32  ;;  %v5292_v14 = vld [vmem:[#allocation8 + $0x284] ss:$16 sps:$4 sm:$0xff]   ;;  %v5290_v17 = vld [vmem:[#allocation8 + $0x280] ss:$16 sps:$4 sm:$0xff]  }
  0x8f   :  { %546 = vmatprep.subr.bf16.mxu0 %v5247_v33  ;;  %1850 = vmatprep.subr.bf16.mxu1 %v5271_v38  ;;  %v5337_v16 = vld [vmem:[#allocation8 + $0x184] ss:$16 sps:$4 sm:$0xff]   ;;  %v5335_v19 = vld [vmem:[#allocation8 + $0x180] ss:$16 sps:$4 sm:$0xff]  }
  0x90   :  { %v5298_v18 = vld [vmem:[#allocation8 + $0x264] ss:$16 sps:$4 sm:$0xff]   ;;  %v5296_v21 = vld [vmem:[#allocation8 + $0x260] ss:$16 sps:$4 sm:$0xff]  }
  0x91   :  { %493 = vmatmul.mubr.bf16.vlgmr.msra.gmra.mxu0 %v6323_v34  ;;  %536 = vmatmul.mubr.bf16.vlgmr.msra.gmra.mxu1 %v6323_v34  ;;  %v5343_v20 = vld [vmem:[#allocation8 + $0x164] ss:$16 sps:$4 sm:$0xff]   ;;  %v5341_v23 = vld [vmem:[#allocation8 + $0x160] ss:$16 sps:$4 sm:$0xff]  }
  0x92   :  { %547 = vmatpush1.bf16.msra.mxu0 %v5245_v35  ;;  %578 = vmatprep.mubr.bf16.mxu0 %v6203_v0  ;;  %v5304_v22 = vld [vmem:[#allocation8 + $0x244] ss:$16 sps:$4 sm:$0xff]   ;;  %v5302_v24 = vld [vmem:[#allocation8 + $0x240] ss:$16 sps:$4 sm:$0xff]  }
  0x93   :  { %548 = vmatprep.subr.bf16.mxu0 %v5250_v36  ;;  %1851 = vmatpush1.bf16.msra.mxu1 %v5269_v37  ;;  %v5310_v25 = vld [vmem:[#allocation8 + $0x224] ss:$16 sps:$4 sm:$0xff]   ;;  %v5308_v26 = vld [vmem:[#allocation8 + $0x220] ss:$16 sps:$4 sm:$0xff]  }
  0x94   :  { %1852 = vmatprep.subr.bf16.mxu1 %v5277_v40  ;;  %v5316_v27 = vld [vmem:[#allocation8 + $0x204] ss:$16 sps:$4 sm:$0xff]   ;;  %v5314_v28 = vld [vmem:[#allocation8 + $0x200] ss:$16 sps:$4 sm:$0xff]  }
  0x95   :  { %v5322_v29 = vld [vmem:[#allocation8 + $0x3e4] ss:$16 sps:$4 sm:$0xff]   ;;  %v5320_v30 = vld [vmem:[#allocation8 + $0x3e0] ss:$16 sps:$4 sm:$0xff]  }
  0x96   :  { %549 = vmatpush1.bf16.msra.mxu0 %v5248_v39  ;;  %v5328_v31 = vld [vmem:[#allocation8 + $0x3c4] ss:$16 sps:$4 sm:$0xff]   ;;  %v5326_v32 = vld [vmem:[#allocation8 + $0x3c0] ss:$16 sps:$4 sm:$0xff]  }
  0x97   :  { %550 = vmatprep.subr.bf16.mxu0 %v5253_v41  ;;  %1853 = vmatpush1.bf16.msra.mxu1 %v5275_v42  ;;  %v5349_v33 = vld [vmem:[#allocation8 + $0x144] ss:$16 sps:$4 sm:$0xff]   ;;  %v5347_v35 = vld [vmem:[#allocation8 + $0x140] ss:$16 sps:$4 sm:$0xff]  }
  0x98   :  { %1854 = vmatprep.subr.bf16.mxu1 %v5283_v43  ;;  %v5332_v36 = vld [vmem:[#allocation8 + $0x3a0] ss:$16 sps:$4 sm:$0xff]   ;;  %v5355_v37 = vld [vmem:[#allocation8 + $0x124] ss:$16 sps:$4 sm:$0xff]  }
  0x99   :  { %v5340_v38 = vld [vmem:[#allocation8 + $0x384] ss:$16 sps:$4 sm:$0xff]   ;;  %v5353_v39 = vld [vmem:[#allocation8 + $0x120] ss:$16 sps:$4 sm:$0xff]  }
  0x9a   :  { %551 = vmatpush1.bf16.msra.mxu0 %v5251_v44  ;;  %v5338_v40 = vld [vmem:[#allocation8 + $0x380] ss:$16 sps:$4 sm:$0xff]   ;;  %v5361_v41 = vld [vmem:[#allocation8 + $0x104] ss:$16 sps:$4 sm:$0xff]  }
  0x9b   :  { %552 = vmatprep.subr.bf16.mxu0 %v5256_v45  ;;  %1855 = vmatpush1.bf16.msra.mxu1 %v5281_v46  ;;  %v5346_v42 = vld [vmem:[#allocation8 + $0x364] ss:$16 sps:$4 sm:$0xff]   ;;  %v5359_v43 = vld [vmem:[#allocation8 + $0x100] ss:$16 sps:$4 sm:$0xff]  }
  0x9c   :  { %1856 = vmatprep.subr.bf16.mxu1 %v5289_v47  ;;  %v5367_v44 = vld [vmem:[#allocation8 + $0x4e4] ss:$16 sps:$4 sm:$0xff]   ;;  %v5344_v45 = vld [vmem:[#allocation8 + $0x360] ss:$16 sps:$4 sm:$0xff]  }
  0x9d   :  { %v5352_v46 = vld [vmem:[#allocation8 + $0x344] ss:$16 sps:$4 sm:$0xff]   ;;  %v5350_v47 = vld [vmem:[#allocation8 + $0x340] ss:$16 sps:$4 sm:$0xff]  }
  0x9e   :  { %553 = vmatpush1.bf16.msra.mxu0 %v5254_v48  ;;  %v5358_v48 = vld [vmem:[#allocation8 + $0x324] ss:$16 sps:$4 sm:$0xff]  }
  0x9f   :  { %554 = vmatprep.subr.bf16.mxu0 %v5259_v49  ;;  %1857 = vmatpush1.bf16.msra.mxu1 %v5287_v50  ;;  %v5356_v49 = vld [vmem:[#allocation8 + $0x320] ss:$16 sps:$4 sm:$0xff]   ;;  %v5364_v50 = vld [vmem:[#allocation8 + $0x304] ss:$16 sps:$4 sm:$0xff]  }
  0xa0   :  { %1858 = vmatprep.subr.bf16.mxu1 %v5295_v51  ;;  %v5362_v51 = vld [vmem:[#allocation8 + $0x300] ss:$16 sps:$4 sm:$0xff]  }
  0xa2   :  { %555 = vmatpush1.bf16.msra.mxu0 %v5257_v52  ;;  %v5370_v52 = vld [vmem:[#allocation8 + $0xec] ss:$16 sps:$4 sm:$0xff]  }
  0xa3   :  { %556 = vmatprep.subr.bf16.mxu0 %v5262_v53  ;;  %1859 = vmatpush1.bf16.msra.mxu1 %v5293_v54  ;;  %v6204_v53 = vmov 1966171168  }
  0xa4   :  { %1860 = vmatprep.subr.bf16.mxu1 %v5301_v55  ;;  %v599_v54 = vunpack.c.l.s4 %v6204_v53  ;;  %v601_v55 = vlaneseq  ;;  %v5397_v53 = vld [vmem:[#allocation8 + $0x444] ss:$16 sps:$4 sm:$0xff]  }
  0xa6   :  { %557 = vmatpush1.bf16.msra.mxu0 %v5260_v56  ;;  %v600_v56 = vunpack.c.0.s8 %v599_v54  ;;  %v5400_v54 = vld [vmem:[#allocation8 + $0x4c] ss:$16 sps:$4 sm:$0xff]  }
  0xa7   :  { %558 = vmatprep.subr.bf16.mxu0 %v5265_v57  ;;  %1861 = vmatpush1.bf16.msra.mxu1 %v5299_v58  ;;  %v602_v57 = vshrl.u32 %v601_v55, 7  ;;  %v6329_v58 = vld [vmem:[#allocation7] sm:$0x3f]  ;;  %v5395_v55 = vld [vmem:[#allocation8 + $0x440] ss:$16 sps:$4 sm:$0xff]  }
  0xa8   :  { %1862 = vmatprep.subr.bf16.mxu1 %v5307_v59 }
  0xa9   :  { %v6331_v59 = vsub.s32 %v600_v56, %v602_v57  ;;  %v5398_v56 = vld [vmem:[#allocation8 + $0x48] ss:$16 sps:$4 sm:$0xff]  }
  0xaa   :  { %559 = vmatpush1.bf16.msra.mxu0 %v5263_v60 }
  0xab   :  { %560 = vmatprep.subr.bf16.mxu0 %v5268_v61  ;;  %1863 = vmatpush1.bf16.msra.mxu1 %v5305_v62  ;;  %v604_v60 = vrot.slane %v6329_v58, %v6331_v59 }
  0xac   :  { %1864 = vmatprep.subr.bf16.mxu1 %v5313_v63 }
  0xad   :  { %v612_v61 = vcombine.high %v604_v60, %v604_v60  ;;  %v620_v62 = vrot.slane %v604_v60, %v6331_v59  ;;  %v5406_v60 = vld [vmem:[#allocation8 + $0x2c] ss:$16 sps:$4 sm:$0xff]  }
  0xae   :  { %561 = vmatpush1.bf16.msra.mxu0 %v5266_v1 }
  0xaf   :  { %1893 = vmatprep.subr.bf16.mxu0 %v5274_v2  ;;  %1865 = vmatpush1.bf16.msra.mxu1 %v5311_v3  ;;  %v634_v63 = vrot.slane %v612_v61, %v6331_v59  ;;  %v642_v1 = vcombine.high %v620_v62, %v620_v62 }
  0xb0   :  { %1866 = vmatprep.subr.bf16.mxu1 %v5319_v4 }
  0xb1   :  { %579 = vmatmul.mubr.bf16.vlgmr.msra.gmra.mxu0 %v6323_v34  ;;  %v5334_v34 = vld [vmem:[#allocation8 + $0x3a4] ss:$16 sps:$4 sm:$0xff]   ;;  %v643_v2 = vcombine.high %v634_v63, %v634_v63 }
  0xb2   :  { %1894 = vmatpush1.bf16.msra.mxu0 %v5272_v5  ;;  %v645_v5 = vpack.i.b16 %v620_v62, %v620_v62  ;;  %v5401_v62 = vld [vmem:[#allocation8 + $0x420] ss:$16 sps:$4 sm:$0xff]  }
  0xb3   :  { %1895 = vmatprep.subr.bf16.mxu0 %v5280_v6  ;;  %1867 = vmatpush2.bf16.msra.mxu1 %v5317_v8  ;;  %v6337_v6 = vsub.s32 0, %v602_v57  ;;  %v652_v8 = vpack.i.b16 %v634_v63, %v634_v63  ;;  %v5404_v63 = vld [vmem:[#allocation8 + $0x28] ss:$16 sps:$4 sm:$0xff]  }
  0xb4   :  { %1868 = vmatprep.subr.bf16.mxu1 %v5325_v10 }
  0xb6   :  { %1896 = vmatpush1.bf16.msra.mxu0 %v5278_v7  ;;  %v659_v7 = vpack.i.b16 %v642_v1, %v642_v1 }
  0xb7   :  { %1897 = vmatprep.subr.bf16.mxu0 %v5286_v9  ;;  %1869 = vmatpush2.bf16.msra.mxu1 %v5323_v11  ;;  %v666_v9 = vpack.i.b16 %v643_v2, %v643_v2  ;;  %v5409_v2 = vld [vmem:[#allocation8 + $0x404] ss:$16 sps:$4 sm:$0xff]  }
  0xb8   :  { %1870 = vmatprep.subr.bf16.mxu1 %v5331_v12 }
  0xba   :  { %1898 = vmatpush1.bf16.msra.mxu0 %v5284_v13  ;;  %v650_v13 = vrot.slane %v645_v5, %v6337_v6 }
  0xbb   :  { %1899 = vmatprep.subr.bf16.mxu0 %v5292_v14  ;;  %1871 = vmatpush2.bf16.msra.mxu1 %v5329_v15  ;;  %v664_v15 = vrot.slane %v659_v7, %v6337_v6  ;;  %v5407_v7 = vld [vmem:[#allocation8 + $0x400] ss:$16 sps:$4 sm:$0xff]  }
  0xbc   :  { %1872 = vmatprep.subr.bf16.mxu1 %v5337_v16 }
  0xbe   :  { %1900 = vmatpush1.bf16.msra.mxu0 %v5290_v17 }
  0xbf   :  { %1901 = vmatprep.subr.bf16.mxu0 %v5298_v18  ;;  %1873 = vmatpush2.bf16.msra.mxu1 %v5335_v19  ;;  %v657_v18 = vrot.slane %v652_v8, %v6337_v6  ;;  %v671_v19 = vrot.slane %v666_v9, %v6337_v6  ;;  %v5410_v8 = vld [vmem:[#allocation8 + $0x8] ss:$16 sps:$4 sm:$0xff]  }
  0xc0   :  { %1874 = vmatprep.subr.bf16.mxu1 %v5343_v20 }
  0xc2   :  { %1902 = vmatpush1.bf16.msra.mxu0 %v5296_v21 }
  0xc3   :  { %1903 = vmatprep.subr.bf16.mxu0 %v5304_v22  ;;  %1875 = vmatpush2.bf16.msra.mxu1 %v5341_v23 }
  0xc4   :  { %1876 = vmatprep.subr.bf16.mxu1 %v5349_v33  ;;  %v5376_v33 = vld [vmem:[#allocation8 + $0xcc] ss:$16 sps:$4 sm:$0xff]  }
  0xc6   :  { %1904 = vmatpush1.bf16.msra.mxu0 %v5302_v24 }
  0xc7   :  { %1905 = vmatprep.subr.bf16.mxu0 %v5310_v25  ;;  %1877 = vmatpush2.bf16.msra.mxu1 %v5347_v35 }
  0xc8   :  { %1878 = vmatprep.subr.bf16.mxu1 %v5355_v37  ;;  %v5374_v37 = vld [vmem:[#allocation8 + $0xc8] ss:$16 sps:$4 sm:$0xff]  }
  0xca   :  { %1906 = vmatpush1.bf16.msra.mxu0 %v5308_v26 }
  0xcb   :  { %1907 = vmatprep.subr.bf16.mxu0 %v5316_v27  ;;  %1879 = vmatpush2.bf16.msra.mxu1 %v5353_v39  ;;  %v5382_v39 = vld [vmem:[#allocation8 + $0xac] ss:$16 sps:$4 sm:$0xff]  }
  0xcc   :  { %1880 = vmatprep.subr.bf16.mxu1 %v5361_v41  ;;  %v5380_v41 = vld [vmem:[#allocation8 + $0xa8] ss:$16 sps:$4 sm:$0xff]  }
  0xce   :  { %1908 = vmatpush1.bf16.msra.mxu0 %v5314_v28  ;;  %v5365_v28 = vld [vmem:[#allocation8 + $0x4e0] ss:$16 sps:$4 sm:$0xff]  }
  0xcf   :  { %1909 = vmatprep.subr.bf16.mxu0 %v5322_v29  ;;  %1881 = vmatpush2.bf16.msra.mxu1 %v5359_v43  ;;  %v5368_v29 = vld [vmem:[#allocation8 + $0xe8] ss:$16 sps:$4 sm:$0xff]   ;;  %v5385_v43 = vld [vmem:[#allocation8 + $0x484] ss:$16 sps:$4 sm:$0xff]  }
  0xd0   :  { %1936 = vmatprep.subr.bf16.mxu1 %v5367_v44  ;;  %v5388_v44 = vld [vmem:[#allocation8 + $0x8c] ss:$16 sps:$4 sm:$0xff]  }
  0xd2   :  { %1910 = vmatpush2.bf16.msra.mxu0 %v5320_v30  ;;  %v5373_v30 = vld [vmem:[#allocation8 + $0x4c4] ss:$16 sps:$4 sm:$0xff]  }
  0xd3   :  { %1911 = vmatprep.subr.bf16.mxu0 %v5328_v31 }
  0xd6   :  { %1912 = vmatpush2.bf16.msra.mxu0 %v5326_v32 }
  0xd7   :  { %1913 = vmatprep.subr.bf16.mxu0 %v5334_v34 }
  0xda   :  { %1914 = vmatpush2.bf16.msra.mxu0 %v5332_v36  ;;  %v5371_v36 = vld [vmem:[#allocation8 + $0x4c0] ss:$16 sps:$4 sm:$0xff]  }
  0xdb   :  { %1915 = vmatprep.subr.bf16.mxu0 %v5340_v38  ;;  %v5379_v38 = vld [vmem:[#allocation8 + $0x4a4] ss:$16 sps:$4 sm:$0xff]  }
  0xde   :  { %1916 = vmatpush2.bf16.msra.mxu0 %v5338_v40  ;;  %v5377_v40 = vld [vmem:[#allocation8 + $0x4a0] ss:$16 sps:$4 sm:$0xff]  }
  0xdf   :  { %1917 = vmatprep.subr.bf16.mxu0 %v5346_v42  ;;  %v597_v42 = vcombine.high %v6329_v58, %v6329_v58  ;;  %v5403_v58 = vld [vmem:[#allocation8 + $0x424] ss:$16 sps:$4 sm:$0xff]  }
  0xe2   :  { %1918 = vmatpush2.bf16.msra.mxu0 %v5344_v45  ;;  %v5383_v45 = vld [vmem:[#allocation8 + $0x480] ss:$16 sps:$4 sm:$0xff]  }
  0xe3   :  { %1919 = vmatprep.subr.bf16.mxu0 %v5352_v46  ;;  %v5386_v46 = vld [vmem:[#allocation8 + $0x88] ss:$16 sps:$4 sm:$0xff]  }
  0xe6   :  { %1920 = vmatpush2.bf16.msra.mxu0 %v5350_v47  ;;  %v6359_v47 = vrot.slane %v597_v42, %v6331_v59 }
  0xe7   :  { %1921 = vmatprep.subr.bf16.mxu0 %v5358_v48  ;;  %v5391_v48 = vld [vmem:[#allocation8 + $0x464] ss:$16 sps:$4 sm:$0xff]  }
  0xea   :  { %1922 = vmatpush2.bf16.msra.mxu0 %v5356_v49  ;;  %v5394_v49 = vld [vmem:[#allocation8 + $0x6c] ss:$16 sps:$4 sm:$0xff]  }
  0xeb   :  { %1923 = vmatprep.subr.bf16.mxu0 %v5364_v50  ;;  %v5389_v50 = vld [vmem:[#allocation8 + $0x460] ss:$16 sps:$4 sm:$0xff]  }
  0xee   :  { %1924 = vmatpush2.bf16.msra.mxu0 %v5362_v51  ;;  %v5392_v51 = vld [vmem:[#allocation8 + $0x68] ss:$16 sps:$4 sm:$0xff]  }
  0xef   :  { %1979 = vmatprep.subr.bf16.mxu0 %v5370_v52  ;;  %v613_v52 = vcombine.high %v6359_v47, %v6359_v47 }
  0xf1   :  { %v641_v57 = vrot.slane %v613_v52, %v6331_v59  ;;  %v5459_v52 = vld [vmem:[#allocation8 + $0x108] ss:$16 sps:$4 sm:$0xff]  }
  0xf3   :  { %v680_v1 = vpack.i.b16 %v641_v57, %v641_v57 }
  0xf5   :  { %v685_v9 = vrot.slane %v680_v1, %v6337_v6  ;;  %v5476_v1 = vld [vmem:[#allocation8 + $0x2ac] ss:$16 sps:$4 sm:$0xff]  }
 0x151   :  { %v494_v3 = vpop.f32.mrf.mxu0  ;;  %v537_v4 = vpop.f32.mrf.mxu1 }
 0x153   :  { %v496_v10 = vpop.f32.mrf.mxu0  ;;  %v539_v11 = vpop.f32.mrf.mxu1 }
 0x155   :  { %v498_v12 = vpop.f32.mrf.mxu0  ;;  %v541_v14 = vpop.f32.mrf.mxu1 }
 0x156   :  { %v589_v16 = vpack.c.bf16 %v498_v12, %v494_v3  ;;  %v591_v17 = vpack.c.bf16 %v541_v14, %v537_v4  ;;  %v5412_v3 = vld [vmem:[#allocation8 + $0xc] ss:$16 sps:$4 sm:$0xff]  }
 0x157   :  { %v500_v20 = vpop.f32.mrf.mxu0  ;;  %v543_v21 = vpop.f32.mrf.mxu1 }
 0x158   :  { %v590_v22 = vpack.c.bf16 %v500_v20, %v496_v10  ;;  %v592_v23 = vpack.c.bf16 %v543_v21, %v539_v11  ;;  %v686_v24 = vadd.bf16 %v650_v13, %v589_v16  ;;  %v688_v25 = vadd.bf16 %v664_v15, %v591_v17  ;;  %v5415_v10 = vld [vmem:[#allocation8 + $0x5e4] ss:$16 sps:$4 sm:$0xff]   ;;  %v5418_v11 = vld [vmem:[#allocation8 + $0x1ec] ss:$16 sps:$4 sm:$0xff]   ;;  %v5413_v15 = vld [vmem:[#allocation8 + $0x5e0] ss:$16 sps:$4 sm:$0xff]  }
 0x159   :  { %v5416_v16 = vld [vmem:[#allocation8 + $0x1e8] ss:$16 sps:$4 sm:$0xff]   ;;  %v5419_v20 = vld [vmem:[#allocation8 + $0x5c0] ss:$16 sps:$4 sm:$0xff]  }
 0x15a   :  { %v687_v26 = vadd.bf16 %v657_v18, %v590_v22  ;;  %v689_v27 = vadd.bf16 %v671_v19, %v592_v23  ;;  %v6348_v34 = vmax.bf16 %v6203_v0, %v686_v24  ;;  %v6351_v35 = vmax.bf16 %v6203_v0, %v688_v25  ;;  %v5421_v18 = vld [vmem:[#allocation8 + $0x5c4] ss:$16 sps:$4 sm:$0xff]   ;;  %v5424_v19 = vld [vmem:[#allocation8 + $0x1cc] ss:$16 sps:$4 sm:$0xff]   ;;  %v5422_v21 = vld [vmem:[#allocation8 + $0x1c8] ss:$16 sps:$4 sm:$0xff]  }
 0x15b   :  { %v5427_v22 = vld [vmem:[#allocation8 + $0x5a4] ss:$16 sps:$4 sm:$0xff]   ;;  %v5430_v23 = vld [vmem:[#allocation8 + $0x1ac] ss:$16 sps:$4 sm:$0xff]   ;;  %v5425_v24 = vld [vmem:[#allocation8 + $0x5a0] ss:$16 sps:$4 sm:$0xff]  }
 0x15c   :  { %v693_v31 = vmax.bf16 %v6203_v0, %v687_v26  ;;  %v6345_v32 = vmax.bf16 %v6203_v0, %v689_v27  ;;  %v5428_v25 = vld [vmem:[#allocation8 + $0x1a8] ss:$16 sps:$4 sm:$0xff]   ;;  %v5433_v26 = vld [vmem:[#allocation8 + $0x584] ss:$16 sps:$4 sm:$0xff]   ;;  %v5436_v27 = vld [vmem:[#allocation8 + $0x18c] ss:$16 sps:$4 sm:$0xff]  }
 0x15e   :  { %1882 = vmatprep.mubr.bf16.mxu1 %v693_v31  ;;  %1925 = vmatprep.mubr.bf16.mxu0 %v6345_v32 }
 0x15f   :  { %1883 = vmatmul.mubr.bf16.vlgmr.msra.gmra.mxu1 %v6348_v34  ;;  %1926 = vmatmul.mubr.bf16.vlgmr.msra.gmra.mxu0 %v6351_v35 }
 0x160   :  { %1937 = vmatpush1.bf16.msra.mxu1 %v5365_v28  ;;  %1980 = vmatpush1.bf16.msra.mxu0 %v5368_v29  ;;  %v5431_v28 = vld [vmem:[#allocation8 + $0x580] ss:$16 sps:$4 sm:$0xff]   ;;  %v5434_v29 = vld [vmem:[#allocation8 + $0x188] ss:$16 sps:$4 sm:$0xff]  }
 0x161   :  { %2011 = vmatprep.mubr.bf16.mxu0 %v693_v31  ;;  %1938 = vmatprep.subr.bf16.mxu1 %v5373_v30  ;;  %v5439_v30 = vld [vmem:[#allocation8 + $0x564] ss:$16 sps:$4 sm:$0xff]   ;;  %v5442_v31 = vld [vmem:[#allocation8 + $0x16c] ss:$16 sps:$4 sm:$0xff]  }
 0x162   :  { %1981 = vmatprep.subr.bf16.mxu0 %v5376_v33  ;;  %v5437_v33 = vld [vmem:[#allocation8 + $0x560] ss:$16 sps:$4 sm:$0xff]  }
 0x164   :  { %1939 = vmatpush1.bf16.msra.mxu1 %v5371_v36  ;;  %1982 = vmatpush1.bf16.msra.mxu0 %v5374_v37  ;;  %v5440_v36 = vld [vmem:[#allocation8 + $0x168] ss:$16 sps:$4 sm:$0xff]   ;;  %v627_v37 = vrot.slane %v6359_v47, %v6331_v59 }
 0x165   :  { %1940 = vmatprep.subr.bf16.mxu1 %v5379_v38  ;;  %1983 = vmatprep.subr.bf16.mxu0 %v5382_v39  ;;  %v5446_v38 = vld [vmem:[#allocation8 + $0x544] ss:$16 sps:$4 sm:$0xff]   ;;  %v5449_v39 = vld [vmem:[#allocation8 + $0x14c] ss:$16 sps:$4 sm:$0xff]  }
 0x166   :  { %v673_v42 = vpack.i.b16 %v627_v37, %v627_v37  ;;  %v5522_v37 = vld [vmem:[#allocation8 + $0x3a8] ss:$16 sps:$4 sm:$0xff]  }
 0x168   :  { %1941 = vmatpush1.bf16.msra.mxu1 %v5377_v40  ;;  %1984 = vmatpush1.bf16.msra.mxu0 %v5380_v41  ;;  %v5444_v40 = vld [vmem:[#allocation8 + $0x540] ss:$16 sps:$4 sm:$0xff]   ;;  %v5447_v41 = vld [vmem:[#allocation8 + $0x148] ss:$16 sps:$4 sm:$0xff]   ;;  %v678_v47 = vrot.slane %v673_v42, %v6337_v6 }
 0x169   :  { %1942 = vmatprep.subr.bf16.mxu1 %v5385_v43  ;;  %1985 = vmatprep.subr.bf16.mxu0 %v5388_v44  ;;  %v5452_v43 = vld [vmem:[#allocation8 + $0x524] ss:$16 sps:$4 sm:$0xff]   ;;  %v5455_v44 = vld [vmem:[#allocation8 + $0x12c] ss:$16 sps:$4 sm:$0xff]   ;;  %v5531_v42 = vld [vmem:[#allocation8 + $0x588] ss:$16 sps:$4 sm:$0xff]  }
 0x16c   :  { %1943 = vmatpush1.bf16.msra.mxu1 %v5383_v45  ;;  %1986 = vmatpush1.bf16.msra.mxu0 %v5386_v46  ;;  %v5450_v45 = vld [vmem:[#allocation8 + $0x520] ss:$16 sps:$4 sm:$0xff]   ;;  %v5453_v46 = vld [vmem:[#allocation8 + $0x128] ss:$16 sps:$4 sm:$0xff]  }
 0x16d   :  { %1944 = vmatprep.subr.bf16.mxu1 %v5391_v48  ;;  %1987 = vmatprep.subr.bf16.mxu0 %v5394_v49  ;;  %v5458_v49 = vld [vmem:[#allocation8 + $0x504] ss:$16 sps:$4 sm:$0xff]  }
 0x170   :  { %1945 = vmatpush1.bf16.msra.mxu1 %v5389_v50  ;;  %1988 = vmatpush1.bf16.msra.mxu0 %v5392_v51  ;;  %v5461_v50 = vld [vmem:[#allocation8 + $0x10c] ss:$16 sps:$4 sm:$0xff]   ;;  %v5456_v51 = vld [vmem:[#allocation8 + $0x500] ss:$16 sps:$4 sm:$0xff]  }
 0x171   :  { %1946 = vmatprep.subr.bf16.mxu1 %v5397_v53  ;;  %1989 = vmatprep.subr.bf16.mxu0 %v5400_v54  ;;  %v6364_v61 = vpop.f32.mrf.mxu0  ;;  %v5464_v54 = vld [vmem:[#allocation8 + $0x2ec] ss:$16 sps:$4 sm:$0xff]  }
 0x173   :  { %v582_v4 = vpop.f32.mrf.mxu0 }
 0x174   :  { %1947 = vmatpush1.bf16.msra.mxu1 %v5395_v55  ;;  %1990 = vmatpush1.bf16.msra.mxu0 %v5398_v56  ;;  %v5467_v55 = vld [vmem:[#allocation8 + $0x4ec] ss:$16 sps:$4 sm:$0xff]   ;;  %v5462_v56 = vld [vmem:[#allocation8 + $0x2e8] ss:$16 sps:$4 sm:$0xff]  }
 0x175   :  { %1948 = vmatprep.subr.bf16.mxu1 %v5403_v58  ;;  %1991 = vmatprep.subr.bf16.mxu0 %v5406_v60  ;;  %v6366_v5 = vpop.f32.mrf.mxu0  ;;  %v5465_v58 = vld [vmem:[#allocation8 + $0x4e8] ss:$16 sps:$4 sm:$0xff]   ;;  %v5470_v60 = vld [vmem:[#allocation8 + $0x2cc] ss:$16 sps:$4 sm:$0xff]  }
 0x176   :  { %v593_v48 = vpack.c.bf16 %v6366_v5, %v6364_v61  ;;  %v5473_v61 = vld [vmem:[#allocation8 + $0x4cc] ss:$16 sps:$4 sm:$0xff]  }
 0x177   :  { %v586_v12 = vpop.f32.mrf.mxu0  ;;  %v5482_v5 = vld [vmem:[#allocation8 + $0x28c] ss:$16 sps:$4 sm:$0xff]  }
 0x178   :  { %1949 = vmatpush1.bf16.msra.mxu1 %v5401_v62  ;;  %1992 = vmatpush1.bf16.msra.mxu0 %v5404_v63  ;;  %v594_v13 = vpack.c.bf16 %v586_v12, %v582_v4  ;;  %v690_v53 = vadd.bf16 %v678_v47, %v593_v48  ;;  %v5468_v62 = vld [vmem:[#allocation8 + $0x2c8] ss:$16 sps:$4 sm:$0xff]   ;;  %v5494_v12 = vld [vmem:[#allocation8 + $0x24c] ss:$16 sps:$4 sm:$0xff]  }
 0x179   :  { %1950 = vmatprep.subr.bf16.mxu1 %v5409_v2  ;;  %1993 = vmatprep.subr.bf16.mxu0 %v5412_v3  ;;  %v5471_v63 = vld [vmem:[#allocation8 + $0x4c8] ss:$16 sps:$4 sm:$0xff]   ;;  %v5479_v2 = vld [vmem:[#allocation8 + $0x4ac] ss:$16 sps:$4 sm:$0xff]  }
 0x17a   :  { %v691_v14 = vadd.bf16 %v685_v9, %v594_v13  ;;  %v6379_v57 = vmax.bf16 %v6203_v0, %v690_v53  ;;  %v5474_v3 = vld [vmem:[#allocation8 + $0x2a8] ss:$16 sps:$4 sm:$0xff]   ;;  %v5491_v9 = vld [vmem:[#allocation8 + $0x46c] ss:$16 sps:$4 sm:$0xff]  }
 0x17b   :  { %v5477_v4 = vld [vmem:[#allocation8 + $0x4a8] ss:$16 sps:$4 sm:$0xff]   ;;  %v5497_v13 = vld [vmem:[#allocation8 + $0x44c] ss:$16 sps:$4 sm:$0xff]  }
 0x17c   :  { %1951 = vmatpush1.bf16.msra.mxu1 %v5407_v7  ;;  %1994 = vmatpush1.bf16.msra.mxu0 %v5410_v8  ;;  %v6370_v17 = vmax.bf16 %v6203_v0, %v691_v14  ;;  %v5480_v7 = vld [vmem:[#allocation8 + $0x288] ss:$16 sps:$4 sm:$0xff]   ;;  %v5488_v8 = vld [vmem:[#allocation8 + $0x26c] ss:$16 sps:$4 sm:$0xff]  }
 0x17d   :  { %1952 = vmatprep.subr.bf16.mxu1 %v5415_v10  ;;  %1995 = vmatprep.subr.bf16.mxu0 %v5418_v11  ;;  %v5486_v10 = vld [vmem:[#allocation8 + $0x268] ss:$16 sps:$4 sm:$0xff]   ;;  %v5542_v48 = vld [vmem:[#allocation8 + $0x34c] ss:$16 sps:$4 sm:$0xff]  }
 0x17e   :  { %1968 = vmatprep.mubr.bf16.mxu1 %v6370_v17  ;;  %v5489_v11 = vld [vmem:[#allocation8 + $0x468] ss:$16 sps:$4 sm:$0xff]   ;;  %v5545_v47 = vld [vmem:[#allocation8 + $0x54c] ss:$16 sps:$4 sm:$0xff]  }
 0x17f   :  { %v5492_v14 = vld [vmem:[#allocation8 + $0x248] ss:$16 sps:$4 sm:$0xff]  }
 0x180   :  { %1953 = vmatpush2.bf16.msra.mxu1 %v5413_v15  ;;  %1996 = vmatpush2.bf16.msra.mxu0 %v5416_v16  ;;  %v5495_v15 = vld [vmem:[#allocation8 + $0x448] ss:$16 sps:$4 sm:$0xff]   ;;  %v5500_v16 = vld [vmem:[#allocation8 + $0x22c] ss:$16 sps:$4 sm:$0xff]  }
 0x181   :  { %1954 = vmatprep.subr.bf16.mxu1 %v5421_v18  ;;  %1997 = vmatprep.subr.bf16.mxu0 %v5424_v19  ;;  %v5498_v18 = vld [vmem:[#allocation8 + $0x228] ss:$16 sps:$4 sm:$0xff]  }
 0x182   :  { %v5501_v19 = vld [vmem:[#allocation8 + $0x428] ss:$16 sps:$4 sm:$0xff]  }
 0x183   :  { %v5546_v53 = vld [vmem:[#allocation8 + $0x328] ss:$16 sps:$4 sm:$0xff]  }
 0x184   :  { %1955 = vmatpush2.bf16.msra.mxu1 %v5419_v20  ;;  %1998 = vmatpush2.bf16.msra.mxu0 %v5422_v21  ;;  %v5506_v20 = vld [vmem:[#allocation8 + $0x20c] ss:$16 sps:$4 sm:$0xff]  }
 0x185   :  { %1956 = vmatprep.subr.bf16.mxu1 %v5427_v22  ;;  %1999 = vmatprep.subr.bf16.mxu0 %v5430_v23  ;;  %v5509_v21 = vld [vmem:[#allocation8 + $0x40c] ss:$16 sps:$4 sm:$0xff]   ;;  %v5504_v22 = vld [vmem:[#allocation8 + $0x208] ss:$16 sps:$4 sm:$0xff]  }
 0x186   :  { %v5507_v23 = vld [vmem:[#allocation8 + $0x408] ss:$16 sps:$4 sm:$0xff]  }
 0x188   :  { %1957 = vmatpush2.bf16.msra.mxu1 %v5425_v24  ;;  %2000 = vmatpush2.bf16.msra.mxu0 %v5428_v25  ;;  %v5512_v24 = vld [vmem:[#allocation8 + $0x3ec] ss:$16 sps:$4 sm:$0xff]  }
 0x189   :  { %1958 = vmatprep.subr.bf16.mxu1 %v5433_v26  ;;  %2001 = vmatprep.subr.bf16.mxu0 %v5436_v27  ;;  %v5515_v25 = vld [vmem:[#allocation8 + $0x5ec] ss:$16 sps:$4 sm:$0xff]   ;;  %v5510_v26 = vld [vmem:[#allocation8 + $0x3e8] ss:$16 sps:$4 sm:$0xff]  }
 0x18a   :  { %v5513_v27 = vld [vmem:[#allocation8 + $0x5e8] ss:$16 sps:$4 sm:$0xff]  }
 0x18c   :  { %1959 = vmatpush2.bf16.msra.mxu1 %v5431_v28  ;;  %2002 = vmatpush2.bf16.msra.mxu0 %v5434_v29  ;;  %v5518_v28 = vld [vmem:[#allocation8 + $0x3cc] ss:$16 sps:$4 sm:$0xff]  }
 0x18d   :  { %1960 = vmatprep.subr.bf16.mxu1 %v5439_v30  ;;  %2003 = vmatprep.subr.bf16.mxu0 %v5442_v31  ;;  %v5521_v29 = vld [vmem:[#allocation8 + $0x5cc] ss:$16 sps:$4 sm:$0xff]   ;;  %v5516_v30 = vld [vmem:[#allocation8 + $0x3c8] ss:$16 sps:$4 sm:$0xff]  }
 0x18e   :  { %v5519_v31 = vld [vmem:[#allocation8 + $0x5c8] ss:$16 sps:$4 sm:$0xff]  }
 0x190   :  { %1961 = vmatpush2.bf16.msra.mxu1 %v5437_v33  ;;  %2004 = vmatpush2.bf16.msra.mxu0 %v5440_v36  ;;  %v5524_v33 = vld [vmem:[#allocation8 + $0x3ac] ss:$16 sps:$4 sm:$0xff]  }
 0x191   :  { %1962 = vmatprep.subr.bf16.mxu1 %v5446_v38  ;;  %2005 = vmatprep.subr.bf16.mxu0 %v5449_v39  ;;  %v5527_v36 = vld [vmem:[#allocation8 + $0x5ac] ss:$16 sps:$4 sm:$0xff]   ;;  %v5525_v38 = vld [vmem:[#allocation8 + $0x5a8] ss:$16 sps:$4 sm:$0xff]  }
 0x192   :  { %v5530_v39 = vld [vmem:[#allocation8 + $0x38c] ss:$16 sps:$4 sm:$0xff]  }
 0x194   :  { %1963 = vmatpush2.bf16.msra.mxu1 %v5444_v40  ;;  %2006 = vmatpush2.bf16.msra.mxu0 %v5447_v41  ;;  %v5533_v40 = vld [vmem:[#allocation8 + $0x58c] ss:$16 sps:$4 sm:$0xff]   ;;  %v5528_v41 = vld [vmem:[#allocation8 + $0x388] ss:$16 sps:$4 sm:$0xff]  }
 0x195   :  { %1964 = vmatprep.subr.bf16.mxu1 %v5452_v43  ;;  %2007 = vmatprep.subr.bf16.mxu0 %v5455_v44  ;;  %v5536_v43 = vld [vmem:[#allocation8 + $0x36c] ss:$16 sps:$4 sm:$0xff]  }
 0x196   :  { %v5539_v44 = vld [vmem:[#allocation8 + $0x56c] ss:$16 sps:$4 sm:$0xff]  }
 0x198   :  { %1965 = vmatpush2.bf16.msra.mxu1 %v5450_v45  ;;  %2008 = vmatpush2.bf16.msra.mxu0 %v5453_v46  ;;  %v5534_v45 = vld [vmem:[#allocation8 + $0x368] ss:$16 sps:$4 sm:$0xff]  }
 0x199   :  { %1966 = vmatprep.subr.bf16.mxu1 %v5458_v49  ;;  %2009 = vmatprep.subr.bf16.mxu0 %v5461_v50  ;;  %v5537_v46 = vld [vmem:[#allocation8 + $0x568] ss:$16 sps:$4 sm:$0xff]  }
 0x19a   :  { %v5540_v49 = vld [vmem:[#allocation8 + $0x348] ss:$16 sps:$4 sm:$0xff]  }
 0x19b   :  { %v5543_v50 = vld [vmem:[#allocation8 + $0x548] ss:$16 sps:$4 sm:$0xff]  }
 0x19c   :  { %1967 = vmatpush2.bf16.msra.mxu1 %v5456_v51  ;;  %2010 = vmatpush2.bf16.msra.mxu0 %v5459_v52  ;;  %v5548_v51 = vld [vmem:[#allocation8 + $0x32c] ss:$16 sps:$4 sm:$0xff]  }
 0x19d   :  { %2022 = vmatprep.subr.bf16.mxu1 %v5464_v54  ;;  %2065 = vmatprep.subr.bf16.mxu0 %v5467_v55  ;;  %v5551_v52 = vld [vmem:[#allocation8 + $0x52c] ss:$16 sps:$4 sm:$0xff]   ;;  %v5549_v54 = vld [vmem:[#allocation8 + $0x528] ss:$16 sps:$4 sm:$0xff]  }
 0x19e   :  { %v5554_v55 = vld [vmem:[#allocation8 + $0x30c] ss:$16 sps:$4 sm:$0xff]  }
 0x19f   :  { %1969 = vmatmul.mubr.bf16.vlgmr.msra.gmra.mxu1 %v6379_v57  ;;  %2012 = vmatmul.mubr.bf16.vlgmr.msra.gmra.mxu0 %v6348_v34  ;;  %v5485_v34 = vld [vmem:[#allocation8 + $0x48c] ss:$16 sps:$4 sm:$0xff]  }
 0x1a0   :  { %2023 = vmatpush1.bf16.msra.mxu1 %v5462_v56  ;;  %2054 = vmatprep.mubr.bf16.mxu1 %v6345_v32  ;;  %v5483_v32 = vld [vmem:[#allocation8 + $0x488] ss:$16 sps:$4 sm:$0xff]   ;;  %v5557_v56 = vld [vmem:[#allocation8 + $0x50c] ss:$16 sps:$4 sm:$0xff]  }
 0x1a1   :  { %2066 = vmatpush1.bf16.msra.mxu0 %v5465_v58  ;;  %2097 = vmatprep.mubr.bf16.mxu0 %v6370_v17  ;;  %v5503_v17 = vld [vmem:[#allocation8 + $0x42c] ss:$16 sps:$4 sm:$0xff]   ;;  %v5552_v58 = vld [vmem:[#allocation8 + $0x308] ss:$16 sps:$4 sm:$0xff]  }
 0x1a2   :  { %2024 = vmatprep.subr.bf16.mxu1 %v5470_v60  ;;  %2067 = vmatprep.subr.bf16.mxu0 %v5473_v61  ;;  %v5555_v60 = vld [vmem:[#allocation8 + $0x508] ss:$16 sps:$4 sm:$0xff]   ;;  %v5560_v61 = vld [vmem:[#allocation10 + $0x74] ss:$8 sps:$4 sm:$0xff]  }
 0x1a4   :  { %2025 = vmatpush1.bf16.msra.mxu1 %v5468_v62  ;;  %v5558_v62 = vld [vmem:[#allocation10 + $0x70] ss:$8 sps:$4 sm:$0xff]  }
 0x1a5   :  { %2068 = vmatpush1.bf16.msra.mxu0 %v5471_v63  ;;  %2026 = vmatprep.subr.bf16.mxu1 %v5476_v1  ;;  %v5563_v63 = vld [vmem:[#allocation10 + $0x64] ss:$8 sps:$4 sm:$0xff]   ;;  %v5561_v1 = vld [vmem:[#allocation10 + $0x60] ss:$8 sps:$4 sm:$0xff]  }
 0x1a6   :  { %2069 = vmatprep.subr.bf16.mxu0 %v5479_v2  ;;  %v5566_v2 = vld [vmem:[#allocation10 + $0x54] ss:$8 sps:$4 sm:$0xff]  }
 0x1a8   :  { %2027 = vmatpush1.bf16.msra.mxu1 %v5474_v3  ;;  %v5564_v3 = vld [vmem:[#allocation10 + $0x50] ss:$8 sps:$4 sm:$0xff]  }
 0x1a9   :  { %2070 = vmatpush1.bf16.msra.mxu0 %v5477_v4  ;;  %2028 = vmatprep.subr.bf16.mxu1 %v5482_v5  ;;  %v5569_v4 = vld [vmem:[#allocation10 + $0x44] ss:$8 sps:$4 sm:$0xff]   ;;  %v5567_v5 = vld [vmem:[#allocation10 + $0x40] ss:$8 sps:$4 sm:$0xff]  }
 0x1aa   :  { %2071 = vmatprep.subr.bf16.mxu0 %v5485_v34  ;;  %v5572_v34 = vld [vmem:[#allocation10 + $0x34] ss:$8 sps:$4 sm:$0xff]  }
 0x1ac   :  { %2029 = vmatpush1.bf16.msra.mxu1 %v5480_v7  ;;  %v5570_v7 = vld [vmem:[#allocation10 + $0x30] ss:$8 sps:$4 sm:$0xff]  }
 0x1ad   :  { %2072 = vmatpush1.bf16.msra.mxu0 %v5483_v32  ;;  %2030 = vmatprep.subr.bf16.mxu1 %v5488_v8  ;;  %v5575_v32 = vld [vmem:[#allocation10 + $0x24] ss:$8 sps:$4 sm:$0xff]   ;;  %v5606_v8 = vld [vmem:[#allocation10 + $0x170] ss:$8 sps:$4 sm:$0xff]  }
 0x1ae   :  { %2073 = vmatprep.subr.bf16.mxu0 %v5491_v9  ;;  %v5611_v9 = vld [vmem:[#allocation10 + $0x164] ss:$8 sps:$4 sm:$0xff]  }
 0x1b0   :  { %2031 = vmatpush1.bf16.msra.mxu1 %v5486_v10  ;;  %v5578_v10 = vld [vmem:[#allocation10 + $0x14] ss:$8 sps:$4 sm:$0xff]  }
 0x1b1   :  { %2074 = vmatpush1.bf16.msra.mxu0 %v5489_v11  ;;  %2032 = vmatprep.subr.bf16.mxu1 %v5494_v12  ;;  %v5609_v11 = vld [vmem:[#allocation10 + $0x160] ss:$8 sps:$4 sm:$0xff]   ;;  %v5614_v12 = vld [vmem:[#allocation10 + $0x154] ss:$8 sps:$4 sm:$0xff]  }
 0x1b2   :  { %2075 = vmatprep.subr.bf16.mxu0 %v5497_v13  ;;  %v5576_v13 = vld [vmem:[#allocation10 + $0x10] ss:$8 sps:$4 sm:$0xff]  }
 0x1b4   :  { %2033 = vmatpush1.bf16.msra.mxu1 %v5492_v14  ;;  %v5581_v14 = vld [vmem:[#allocation10 + $0x4] ss:$8 sps:$4 sm:$0xff]  }
 0x1b5   :  { %2076 = vmatpush1.bf16.msra.mxu0 %v5495_v15  ;;  %2034 = vmatprep.subr.bf16.mxu1 %v5500_v16  ;;  %v5612_v15 = vld [vmem:[#allocation10 + $0x150] ss:$8 sps:$4 sm:$0xff]   ;;  %v5617_v16 = vld [vmem:[#allocation10 + $0x144] ss:$8 sps:$4 sm:$0xff]  }
 0x1b6   :  { %2077 = vmatprep.subr.bf16.mxu0 %v5503_v17  ;;  %v5579_v17 = vld [vmem:[#allocation10] ss:$8 sps:$4 sm:$0xff]  }
 0x1b8   :  { %2035 = vmatpush1.bf16.msra.mxu1 %v5498_v18  ;;  %v5584_v18 = vld [vmem:[#allocation10 + $0xf4] ss:$8 sps:$4 sm:$0xff]  }
 0x1b9   :  { %2078 = vmatpush1.bf16.msra.mxu0 %v5501_v19  ;;  %2036 = vmatprep.subr.bf16.mxu1 %v5506_v20  ;;  %v5615_v19 = vld [vmem:[#allocation10 + $0x140] ss:$8 sps:$4 sm:$0xff]   ;;  %v5620_v20 = vld [vmem:[#allocation10 + $0x134] ss:$8 sps:$4 sm:$0xff]  }
 0x1ba   :  { %2079 = vmatprep.subr.bf16.mxu0 %v5509_v21  ;;  %v5582_v21 = vld [vmem:[#allocation10 + $0xf0] ss:$8 sps:$4 sm:$0xff]  }
 0x1bc   :  { %2037 = vmatpush1.bf16.msra.mxu1 %v5504_v22  ;;  %v5587_v22 = vld [vmem:[#allocation10 + $0xe4] ss:$8 sps:$4 sm:$0xff]  }
 0x1bd   :  { %2080 = vmatpush1.bf16.msra.mxu0 %v5507_v23  ;;  %2038 = vmatprep.subr.bf16.mxu1 %v5512_v24  ;;  %v5618_v23 = vld [vmem:[#allocation10 + $0x130] ss:$8 sps:$4 sm:$0xff]   ;;  %v5623_v24 = vld [vmem:[#allocation10 + $0x124] ss:$8 sps:$4 sm:$0xff]  }
 0x1be   :  { %2081 = vmatprep.subr.bf16.mxu0 %v5515_v25  ;;  %v5585_v25 = vld [vmem:[#allocation10 + $0xe0] ss:$8 sps:$4 sm:$0xff]  }
 0x1c0   :  { %2039 = vmatpush2.bf16.msra.mxu1 %v5510_v26  ;;  %v5590_v26 = vld [vmem:[#allocation10 + $0xd4] ss:$8 sps:$4 sm:$0xff]  }
 0x1c1   :  { %2082 = vmatpush2.bf16.msra.mxu0 %v5513_v27  ;;  %2040 = vmatprep.subr.bf16.mxu1 %v5518_v28  ;;  %v5621_v27 = vld [vmem:[#allocation10 + $0x120] ss:$8 sps:$4 sm:$0xff]   ;;  %v5626_v28 = vld [vmem:[#allocation10 + $0x114] ss:$8 sps:$4 sm:$0xff]  }
 0x1c2   :  { %2083 = vmatprep.subr.bf16.mxu0 %v5521_v29  ;;  %v5588_v29 = vld [vmem:[#allocation10 + $0xd0] ss:$8 sps:$4 sm:$0xff]  }
 0x1c4   :  { %2041 = vmatpush2.bf16.msra.mxu1 %v5516_v30  ;;  %v5593_v30 = vld [vmem:[#allocation10 + $0xc4] ss:$8 sps:$4 sm:$0xff]  }
 0x1c5   :  { %2084 = vmatpush2.bf16.msra.mxu0 %v5519_v31  ;;  %2042 = vmatprep.subr.bf16.mxu1 %v5524_v33  ;;  %v5624_v31 = vld [vmem:[#allocation10 + $0x110] ss:$8 sps:$4 sm:$0xff]   ;;  %v5629_v33 = vld [vmem:[#allocation10 + $0x104] ss:$8 sps:$4 sm:$0xff]  }
 0x1c6   :  { %2085 = vmatprep.subr.bf16.mxu0 %v5527_v36  ;;  %v5591_v36 = vld [vmem:[#allocation10 + $0xc0] ss:$8 sps:$4 sm:$0xff]  }
 0x1c8   :  { %2043 = vmatpush2.bf16.msra.mxu1 %v5522_v37  ;;  %v5596_v37 = vld [vmem:[#allocation10 + $0xb4] ss:$8 sps:$4 sm:$0xff]  }
 0x1c9   :  { %2086 = vmatpush2.bf16.msra.mxu0 %v5525_v38  ;;  %2044 = vmatprep.subr.bf16.mxu1 %v5530_v39  ;;  %v5627_v38 = vld [vmem:[#allocation10 + $0x100] ss:$8 sps:$4 sm:$0xff]   ;;  %v5632_v39 = vld [vmem:[#allocation10 + $0x1f4] ss:$8 sps:$4 sm:$0xff]  }
 0x1ca   :  { %2087 = vmatprep.subr.bf16.mxu0 %v5533_v40  ;;  %v5594_v40 = vld [vmem:[#allocation10 + $0xb0] ss:$8 sps:$4 sm:$0xff]  }
 0x1cc   :  { %2045 = vmatpush2.bf16.msra.mxu1 %v5528_v41  ;;  %v5599_v41 = vld [vmem:[#allocation10 + $0xa4] ss:$8 sps:$4 sm:$0xff]  }
 0x1cd   :  { %2088 = vmatpush2.bf16.msra.mxu0 %v5531_v42  ;;  %2046 = vmatprep.subr.bf16.mxu1 %v5536_v43  ;;  %v5630_v42 = vld [vmem:[#allocation10 + $0x1f0] ss:$8 sps:$4 sm:$0xff]   ;;  %v5635_v43 = vld [vmem:[#allocation10 + $0x1e4] ss:$8 sps:$4 sm:$0xff]  }
 0x1ce   :  { %2089 = vmatprep.subr.bf16.mxu0 %v5539_v44  ;;  %v5597_v44 = vld [vmem:[#allocation10 + $0xa0] ss:$8 sps:$4 sm:$0xff]  }
 0x1d0   :  { %2047 = vmatpush2.bf16.msra.mxu1 %v5534_v45  ;;  %v5602_v45 = vld [vmem:[#allocation10 + $0x94] ss:$8 sps:$4 sm:$0xff]  }
 0x1d1   :  { %2090 = vmatpush2.bf16.msra.mxu0 %v5537_v46  ;;  %2048 = vmatprep.subr.bf16.mxu1 %v5542_v48  ;;  %v5633_v46 = vld [vmem:[#allocation10 + $0x1e0] ss:$8 sps:$4 sm:$0xff]   ;;  %v5638_v48 = vld [vmem:[#allocation10 + $0x1d4] ss:$8 sps:$4 sm:$0xff]  }
 0x1d2   :  { %2091 = vmatprep.subr.bf16.mxu0 %v5545_v47  ;;  %v5600_v47 = vld [vmem:[#allocation10 + $0x90] ss:$8 sps:$4 sm:$0xff]  }
 0x1d4   :  { %2049 = vmatpush2.bf16.msra.mxu1 %v5540_v49  ;;  %v5605_v49 = vld [vmem:[#allocation10 + $0x84] ss:$8 sps:$4 sm:$0xff]  }
 0x1d5   :  { %2092 = vmatpush2.bf16.msra.mxu0 %v5543_v50  ;;  %2050 = vmatprep.subr.bf16.mxu1 %v5548_v51  ;;  %v5636_v50 = vld [vmem:[#allocation10 + $0x1d0] ss:$8 sps:$4 sm:$0xff]   ;;  %v5641_v51 = vld [vmem:[#allocation10 + $0x1c4] ss:$8 sps:$4 sm:$0xff]  }
 0x1d6   :  { %2093 = vmatprep.subr.bf16.mxu0 %v5551_v52  ;;  %v5603_v52 = vld [vmem:[#allocation10 + $0x80] ss:$8 sps:$4 sm:$0xff]  }
 0x1d8   :  { %2051 = vmatpush2.bf16.msra.mxu1 %v5546_v53  ;;  %v5639_v53 = vld [vmem:[#allocation10 + $0x1c0] ss:$8 sps:$4 sm:$0xff]  }
 0x1d9   :  { %2094 = vmatpush2.bf16.msra.mxu0 %v5549_v54  ;;  %2052 = vmatprep.subr.bf16.mxu1 %v5554_v55  ;;  %v5644_v54 = vld [vmem:[#allocation10 + $0x1b4] ss:$8 sps:$4 sm:$0xff]   ;;  %v5642_v55 = vld [vmem:[#allocation10 + $0x1b0] ss:$8 sps:$4 sm:$0xff]  }
 0x1da   :  { %2095 = vmatprep.subr.bf16.mxu0 %v5557_v56  ;;  %v5647_v56 = vld [vmem:[#allocation10 + $0x1a4] ss:$8 sps:$4 sm:$0xff]  }
 0x1dc   :  { %2053 = vmatpush2.bf16.msra.mxu1 %v5552_v58  ;;  %v5645_v58 = vld [vmem:[#allocation10 + $0x1a0] ss:$8 sps:$4 sm:$0xff]  }
 0x1dd   :  { %2096 = vmatpush2.bf16.msra.mxu0 %v5555_v60  ;;  %2558 = vmatprep.subr.bf16.mxu1 %v5560_v61  ;;  %v5650_v60 = vld [vmem:[#allocation10 + $0x194] ss:$8 sps:$4 sm:$0xff]   ;;  %v5648_v61 = vld [vmem:[#allocation10 + $0x190] ss:$8 sps:$4 sm:$0xff]  }
 0x1df   :  { %2055 = vmatmul.mubr.bf16.vlgmr.msra.gmra.mxu1 %v6351_v35  ;;  %v5608_v35 = vld [vmem:[#allocation10 + $0x174] ss:$8 sps:$4 sm:$0xff]  }
 0x1e0   :  { %2098 = vmatmul.mubr.bf16.vlgmr.msra.gmra.mxu0 %v6379_v57  ;;  %2559 = vmatpush1.bf16.msra.mxu1 %v5558_v62  ;;  %v5573_v57 = vld [vmem:[#allocation10 + $0x20] ss:$8 sps:$4 sm:$0xff]  }
 0x1e1   :  { %2560 = vmatprep.subr.bf16.mxu1 %v5563_v63  ;;  %2601 = vmatprep.subr.bf16.mxu0 %v5608_v35  ;;  %v5651_v62 = vld [vmem:[#allocation10 + $0x180] ss:$8 sps:$4 sm:$0xff]   ;;  %v5653_v63 = vld [vmem:[#allocation10 + $0x184] ss:$8 sps:$4 sm:$0xff]  }
 0x1e2   :  { %2602 = vmatpush1.bf16.msra.mxu0 %v5606_v8 }
 0x1e3   :  { %2603 = vmatprep.subr.bf16.mxu0 %v5611_v9 }
 0x1e4   :  { %2561 = vmatpush1.bf16.msra.mxu1 %v5561_v1 }
 0x1e5   :  { %2562 = vmatprep.subr.bf16.mxu1 %v5566_v2 }
 0x1e6   :  { %2604 = vmatpush1.bf16.msra.mxu0 %v5609_v11 }
 0x1e7   :  { %2605 = vmatprep.subr.bf16.mxu0 %v5614_v12 }
 0x1e8   :  { %2563 = vmatpush1.bf16.msra.mxu1 %v5564_v3 }
 0x1e9   :  { %2564 = vmatprep.subr.bf16.mxu1 %v5569_v4  ;;  %v4839_v4 = vld.sshfl [vmem:[%s6453_s4] sm:$0x33 pattern:$0x75316420] }
 0x1ea   :  { %2606 = vmatpush1.bf16.msra.mxu0 %v5612_v15  ;;  %v2128_v35 = vrot.slane %v4839_v4, %v6331_v59 }
 0x1eb   :  { %2607 = vmatprep.subr.bf16.mxu0 %v5617_v16 }
 0x1ec   :  { %2565 = vmatpush1.bf16.msra.mxu1 %v5567_v5  ;;  %v2139_v12 = vpack.i.b16 %v2128_v35, %v2128_v35 }
 0x1ed   :  { %2566 = vmatprep.subr.bf16.mxu1 %v5572_v34 }
 0x1ee   :  { %2608 = vmatpush1.bf16.msra.mxu0 %v5615_v19 }
 0x1ef   :  { %2609 = vmatprep.subr.bf16.mxu0 %v5620_v20 }
 0x1f0   :  { %2567 = vmatpush1.bf16.msra.mxu1 %v5570_v7  ;;  %v2121_v7 = vcombine.high %v4839_v4, %v4839_v4 }
 0x1f1   :  { %2568 = vmatprep.subr.bf16.mxu1 %v5575_v32 }
 0x1f2   :  { %2610 = vmatpush1.bf16.msra.mxu0 %v5618_v23 }
 0x1f3   :  { %2611 = vmatprep.subr.bf16.mxu0 %v5623_v24 }
 0x1f4   :  { %2569 = vmatpush1.bf16.msra.mxu1 %v5573_v57  ;;  %v2135_v57 = vrot.slane %v2121_v7, %v6331_v59  ;;  %v5656_v7 = vld [vmem:[#allocation13 + $0xe4] ss:$16 sps:$4 sm:$0xff]  }
 0x1f5   :  { %2570 = vmatprep.subr.bf16.mxu1 %v5578_v10 }
 0x1f6   :  { %2612 = vmatpush1.bf16.msra.mxu0 %v5621_v27  ;;  %v2146_v15 = vpack.i.b16 %v2135_v57, %v2135_v57 }
 0x1f7   :  { %2613 = vmatprep.subr.bf16.mxu0 %v5626_v28 }
 0x1f8   :  { %2571 = vmatpush1.bf16.msra.mxu1 %v5576_v13 }
 0x1f9   :  { %2572 = vmatprep.subr.bf16.mxu1 %v5581_v14 }
 0x1fa   :  { %2614 = vmatpush1.bf16.msra.mxu0 %v5624_v31 }
 0x1fb   :  { %2615 = vmatprep.subr.bf16.mxu0 %v5629_v33 }
 0x1fc   :  { %2573 = vmatpush1.bf16.msra.mxu1 %v5579_v17 }
 0x1fd   :  { %2574 = vmatprep.subr.bf16.mxu1 %v5584_v18 }
 0x1fe   :  { %2616 = vmatpush1.bf16.msra.mxu0 %v5627_v38 }
 0x1ff   :  { %2617 = vmatprep.subr.bf16.mxu0 %v5632_v39 }
 0x200   :  { %2575 = vmatpush2.bf16.msra.mxu1 %v5582_v21  ;;  %v2144_v21 = vrot.slane %v2139_v12, %v6337_v6  ;;  %v5671_v12 = vld [vmem:[#allocation13 + $0xac] ss:$16 sps:$4 sm:$0xff]  }
 0x201   :  { %2576 = vmatprep.subr.bf16.mxu1 %v5587_v22 }
 0x202   :  { %2618 = vmatpush2.bf16.msra.mxu0 %v5630_v42  ;;  %v2137_v42 = vcombine.high %v2135_v57, %v2135_v57  ;;  %v5665_v57 = vld [vmem:[#allocation13 + $0xcc] ss:$16 sps:$4 sm:$0xff]  }
 0x203   :  { %2619 = vmatprep.subr.bf16.mxu0 %v5635_v43 }
 0x204   :  { %2577 = vmatpush2.bf16.msra.mxu1 %v5585_v25 }
 0x205   :  { %2578 = vmatprep.subr.bf16.mxu1 %v5590_v26  ;;  %v2151_v26 = vrot.slane %v2146_v15, %v6337_v6  ;;  %v5674_v15 = vld [vmem:[#allocation13 + $0x84] ss:$16 sps:$4 sm:$0xff]  }
 0x206   :  { %2620 = vmatpush2.bf16.msra.mxu0 %v5633_v46 }
 0x207   :  { %2621 = vmatprep.subr.bf16.mxu0 %v5638_v48 }
 0x208   :  { %2579 = vmatpush2.bf16.msra.mxu1 %v5588_v29 }
 0x209   :  { %2580 = vmatprep.subr.bf16.mxu1 %v5593_v30 }
 0x20a   :  { %2622 = vmatpush2.bf16.msra.mxu0 %v5636_v50 }
 0x20b   :  { %2623 = vmatprep.subr.bf16.mxu0 %v5641_v51  ;;  %v2160_v51 = vpack.i.b16 %v2137_v42, %v2137_v42  ;;  %v5710_v42 = vld [vmem:[#allocation13 + $0x1c4] ss:$16 sps:$4 sm:$0xff]  }
 0x20c   :  { %2581 = vmatpush2.bf16.msra.mxu1 %v5591_v36 }
 0x20d   :  { %2582 = vmatprep.subr.bf16.mxu1 %v5596_v37 }
 0x20e   :  { %2624 = vmatpush2.bf16.msra.mxu0 %v5639_v53 }
 0x20f   :  { %2625 = vmatprep.subr.bf16.mxu0 %v5644_v54 }
 0x210   :  { %2583 = vmatpush2.bf16.msra.mxu1 %v5594_v40  ;;  %v2136_v40 = vcombine.high %v2128_v35, %v2128_v35  ;;  %v5662_v35 = vld [vmem:[#allocation13 + $0xc4] ss:$16 sps:$4 sm:$0xff]  }
 0x211   :  { %2584 = vmatprep.subr.bf16.mxu1 %v5599_v41 }
 0x212   :  { %2626 = vmatpush2.bf16.msra.mxu0 %v5642_v55  ;;  %v2153_v48 = vpack.i.b16 %v2136_v40, %v2136_v40  ;;  %v5702_v40 = vld [vmem:[#allocation13 + $0x1e0] ss:$16 sps:$4 sm:$0xff]  }
 0x213   :  { %2627 = vmatprep.subr.bf16.mxu0 %v5647_v56 }
 0x214   :  { %2585 = vmatpush2.bf16.msra.mxu1 %v5597_v44  ;;  %v2158_v56 = vrot.slane %v2153_v48, %v6337_v6  ;;  %v5719_v48 = vld [vmem:[#allocation13 + $0x1ac] ss:$16 sps:$4 sm:$0xff]  }
 0x215   :  { %2586 = vmatprep.subr.bf16.mxu1 %v5602_v45 }
 0x216   :  { %2628 = vmatpush2.bf16.msra.mxu0 %v5645_v58 }
 0x217   :  { %2629 = vmatprep.subr.bf16.mxu0 %v5650_v60 }
 0x218   :  { %2587 = vmatpush2.bf16.msra.mxu1 %v5600_v47 }
 0x219   :  { %2588 = vmatprep.subr.bf16.mxu1 %v5605_v49 }
 0x21a   :  { %2630 = vmatpush2.bf16.msra.mxu0 %v5648_v61 }
 0x21b   :  { %2631 = vmatprep.subr.bf16.mxu0 %v5653_v63  ;;  %v2165_v63 = vrot.slane %v2160_v51, %v6337_v6  ;;  %v5725_v51 = vld [vmem:[#allocation13 + $0x18c] ss:$16 sps:$4 sm:$0xff]  }
 0x21c   :  { %2589 = vmatpush2.bf16.msra.mxu1 %v5603_v52 }
 0x21d   :  { %3072 = vmatprep.subr.bf16.mxu1 %v5656_v7  ;;  %v5747_v7 = vld [vmem:[#allocation13 + $0x108] ss:$16 sps:$4 sm:$0xff]  }
 0x21e   :  { %2632 = vmatpush2.bf16.msra.mxu0 %v5651_v62 }
 0x21f   :  { %v1884_v1 = vpop.f32.mrf.mxu1  ;;  %v1927_v2 = vpop.f32.mrf.mxu0 }
 0x220   :  { %v1928_v13 = vadd.f32 %v1927_v2, %v1884_v1 }
 0x221   :  { %v1886_v3 = vpop.f32.mrf.mxu1  ;;  %v1929_v5 = vpop.f32.mrf.mxu0 }
 0x222   :  { %v1930_v17 = vadd.f32 %v1929_v5, %v1886_v3 }
 0x223   :  { %v1888_v34 = vpop.f32.mrf.mxu1  ;;  %v1931_v32 = vpop.f32.mrf.mxu0 }
 0x224   :  { %v1932_v14 = vadd.f32 %v1931_v32, %v1888_v34  ;;  %v5654_v34 = vld [vmem:[#allocation13 + $0xe0] ss:$16 sps:$4 sm:$0xff]   ;;  %v5657_v32 = vld [vmem:[#allocation13 + $0xe8] ss:$16 sps:$4 sm:$0xff]  }
 0x225   :  { %v1890_v8 = vpop.f32.mrf.mxu1  ;;  %v1933_v10 = vpop.f32.mrf.mxu0 }
 0x226   :  { %v1934_v18 = vadd.f32 %v1933_v10, %v1890_v8  ;;  %v5659_v8 = vld [vmem:[#allocation13 + $0xec] ss:$16 sps:$4 sm:$0xff]   ;;  %v5663_v10 = vld [vmem:[#allocation13 + $0xc8] ss:$16 sps:$4 sm:$0xff]  }
 0x227   :  { %3115 = vmatprep.subr.bf16.mxu0 %v5659_v8  ;;  %v5752_v8 = vld [vmem:[#allocation14 + $0xe4] ss:$16 sps:$4 sm:$0xff]  }
 0x25f   :  { %v1970_v9 = vpop.f32.mrf.mxu1  ;;  %v2013_v33 = vpop.f32.mrf.mxu0 }
 0x260   :  { %v1971_v19 = vadd.f32 %v1970_v9, %v1928_v13  ;;  %v5660_v9 = vld [vmem:[#allocation13 + $0xc0] ss:$16 sps:$4 sm:$0xff]  }
 0x261   :  { %v1972_v11 = vpop.f32.mrf.mxu1  ;;  %v2015_v36 = vpop.f32.mrf.mxu0  ;;  %v5666_v13 = vld [vmem:[#allocation13 + $0xa0] ss:$16 sps:$4 sm:$0xff]  }
 0x262   :  { %v1973_v23 = vadd.f32 %v1972_v11, %v1930_v17  ;;  %v5668_v11 = vld [vmem:[#allocation13 + $0xa4] ss:$16 sps:$4 sm:$0xff]   ;;  %v5672_v17 = vld [vmem:[#allocation13 + $0x80] ss:$16 sps:$4 sm:$0xff]  }
 0x263   :  { %v1974_v16 = vpop.f32.mrf.mxu1  ;;  %v2017_v37 = vpop.f32.mrf.mxu0 }
 0x264   :  { %v1975_v20 = vadd.f32 %v1974_v16, %v1932_v14  ;;  %v5669_v14 = vld [vmem:[#allocation13 + $0xa8] ss:$16 sps:$4 sm:$0xff]   ;;  %v5677_v16 = vld [vmem:[#allocation13 + $0x8c] ss:$16 sps:$4 sm:$0xff]  }
 0x265   :  { %v1976_v22 = vpop.f32.mrf.mxu1  ;;  %v2019_v38 = vpop.f32.mrf.mxu0 }
 0x266   :  { %v2108_v24 = vpack.c.bf16 %v1975_v20, %v1971_v19  ;;  %v1977_v25 = vadd.f32 %v1976_v22, %v1934_v18  ;;  %v5675_v18 = vld [vmem:[#allocation13 + $0x88] ss:$16 sps:$4 sm:$0xff]   ;;  %v5680_v19 = vld [vmem:[#allocation13 + $0x64] ss:$16 sps:$4 sm:$0xff]   ;;  %v5683_v20 = vld [vmem:[#allocation13 + $0x6c] ss:$16 sps:$4 sm:$0xff]  }
 0x267   :  { %v5681_v22 = vld [vmem:[#allocation13 + $0x68] ss:$16 sps:$4 sm:$0xff]  }
 0x268   :  { %v2109_v27 = vpack.c.bf16 %v1977_v25, %v1973_v23  ;;  %v2166_v28 = vadd.bf16 %v2144_v21, %v2108_v24  ;;  %v5678_v21 = vld [vmem:[#allocation13 + $0x60] ss:$16 sps:$4 sm:$0xff]   ;;  %v5686_v23 = vld [vmem:[#allocation13 + $0x44] ss:$16 sps:$4 sm:$0xff]   ;;  %v5689_v24 = vld [vmem:[#allocation13 + $0x4c] ss:$16 sps:$4 sm:$0xff]  }
 0x269   :  { %v5684_v25 = vld [vmem:[#allocation13 + $0x40] ss:$16 sps:$4 sm:$0xff]  }
 0x26a   :  { %v2167_v29 = vadd.bf16 %v2151_v26, %v2109_v27  ;;  %v2170_v31 = vmax.bf16 %v6203_v0, %v2166_v28  ;;  %v5687_v26 = vld [vmem:[#allocation13 + $0x48] ss:$16 sps:$4 sm:$0xff]   ;;  %v5692_v27 = vld [vmem:[#allocation13 + $0x24] ss:$16 sps:$4 sm:$0xff]   ;;  %v5695_v28 = vld [vmem:[#allocation13 + $0x2c] ss:$16 sps:$4 sm:$0xff]  }
 0x26c   :  { %v2171_v30 = vmax.bf16 %v6203_v0, %v2167_v29  ;;  %v5690_v29 = vld [vmem:[#allocation13 + $0x20] ss:$16 sps:$4 sm:$0xff]  }
 0x26e   :  { %2590 = vmatprep.mubr.bf16.mxu1 %v2171_v30  ;;  %v5693_v30 = vld [vmem:[#allocation13 + $0x28] ss:$16 sps:$4 sm:$0xff]  }
 0x26f   :  { %2591 = vmatmul.mubr.bf16.vlgmr.msra.gmra.mxu1 %v2170_v31  ;;  %v5698_v31 = vld [vmem:[#allocation13 + $0x4] ss:$16 sps:$4 sm:$0xff]  }
 0x270   :  { %3073 = vmatpush1.bf16.msra.mxu1 %v5654_v34  ;;  %v5746_v34 = vld [vmem:[#allocation13 + $0x104] ss:$16 sps:$4 sm:$0xff]  }
 0x271   :  { %3074 = vmatprep.subr.bf16.mxu1 %v5662_v35  ;;  %v5755_v35 = vld [vmem:[#allocation14 + $0x2e4] ss:$16 sps:$4 sm:$0xff]  }
 0x274   :  { %3075 = vmatpush1.bf16.msra.mxu1 %v5660_v9 }
 0x275   :  { %3076 = vmatprep.subr.bf16.mxu1 %v5668_v11 }
 0x278   :  { %3077 = vmatpush1.bf16.msra.mxu1 %v5666_v13 }
 0x279   :  { %3078 = vmatprep.subr.bf16.mxu1 %v5674_v15 }
 0x27c   :  { %3079 = vmatpush1.bf16.msra.mxu1 %v5672_v17 }
 0x27d   :  { %3080 = vmatprep.subr.bf16.mxu1 %v5680_v19 }
 0x280   :  { %3081 = vmatpush1.bf16.msra.mxu1 %v5678_v21 }
 0x281   :  { %3082 = vmatprep.subr.bf16.mxu1 %v5686_v23 }
 0x284   :  { %3083 = vmatpush1.bf16.msra.mxu1 %v5684_v25 }
 0x285   :  { %3084 = vmatprep.subr.bf16.mxu1 %v5692_v27 }
 0x288   :  { %3085 = vmatpush1.bf16.msra.mxu1 %v5690_v29 }
 0x289   :  { %3086 = vmatprep.subr.bf16.mxu1 %v5698_v31 }
 0x29f   :  { %v2056_v39 = vpop.f32.mrf.mxu1 }
 0x2a0   :  { %v2099_v41 = vpop.f32.mrf.mxu0  ;;  %v2057_v44 = vadd.f32 %v2056_v39, %v2013_v33  ;;  %v5701_v33 = vld [vmem:[#allocation13 + $0xc] ss:$16 sps:$4 sm:$0xff]  }
 0x2a1   :  { %v2058_v43 = vpop.f32.mrf.mxu1  ;;  %v5707_v39 = vld [vmem:[#allocation13 + $0x1ec] ss:$16 sps:$4 sm:$0xff]  }
 0x2a2   :  { %v2101_v45 = vpop.f32.mrf.mxu0  ;;  %v2059_v47 = vadd.f32 %v2058_v43, %v2015_v36  ;;  %v2100_v53 = vadd.f32 %v2099_v41, %v2057_v44  ;;  %v5696_v36 = vld [vmem:[#allocation13] ss:$16 sps:$4 sm:$0xff]   ;;  %v5705_v41 = vld [vmem:[#allocation13 + $0x1e8] ss:$16 sps:$4 sm:$0xff]   ;;  %v5713_v43 = vld [vmem:[#allocation13 + $0x1cc] ss:$16 sps:$4 sm:$0xff]  }
 0x2a3   :  { %v2060_v46 = vpop.f32.mrf.mxu1  ;;  %3087 = vmatpush1.bf16.msra.mxu1 %v5696_v36  ;;  %v5708_v44 = vld [vmem:[#allocation13 + $0x1c0] ss:$16 sps:$4 sm:$0xff]  }
 0x2a4   :  { %v2061_v49 = vadd.f32 %v2060_v46, %v2017_v37  ;;  %v2103_v50 = vpop.f32.mrf.mxu0  ;;  %v2102_v60 = vadd.f32 %v2101_v45, %v2059_v47  ;;  %v5699_v37 = vld [vmem:[#allocation13 + $0x8] ss:$16 sps:$4 sm:$0xff]   ;;  %v5716_v46 = vld [vmem:[#allocation13 + $0x1a4] ss:$16 sps:$4 sm:$0xff]   ;;  %v5714_v47 = vld [vmem:[#allocation13 + $0x1a0] ss:$16 sps:$4 sm:$0xff]  }
 0x2a5   :  { %v2062_v52 = vpop.f32.mrf.mxu1  ;;  %v5711_v45 = vld [vmem:[#allocation13 + $0x1c8] ss:$16 sps:$4 sm:$0xff]   ;;  %v5750_v36 = vld [vmem:[#allocation14 + $0xe0] ss:$16 sps:$4 sm:$0xff]  }
 0x2a6   :  { %v2104_v54 = vadd.f32 %v2103_v50, %v2061_v49  ;;  %v2063_v55 = vadd.f32 %v2062_v52, %v2019_v38  ;;  %v2105_v58 = vpop.f32.mrf.mxu0  ;;  %v5704_v38 = vld [vmem:[#allocation13 + $0x1e4] ss:$16 sps:$4 sm:$0xff]   ;;  %v5717_v49 = vld [vmem:[#allocation13 + $0x1a8] ss:$16 sps:$4 sm:$0xff]   ;;  %v5720_v52 = vld [vmem:[#allocation13 + $0x180] ss:$16 sps:$4 sm:$0xff]  }
 0x2a7   :  { %3088 = vmatprep.subr.bf16.mxu1 %v5704_v38  ;;  %v5722_v50 = vld [vmem:[#allocation13 + $0x184] ss:$16 sps:$4 sm:$0xff]  }
 0x2a8   :  { %v2110_v61 = vpack.c.bf16 %v2104_v54, %v2100_v53  ;;  %v2106_v62 = vadd.f32 %v2105_v58, %v2063_v55  ;;  %3089 = vmatpush2.bf16.msra.mxu1 %v5702_v40  ;;  %v5723_v53 = vld [vmem:[#allocation13 + $0x188] ss:$16 sps:$4 sm:$0xff]   ;;  %v5728_v54 = vld [vmem:[#allocation13 + $0x164] ss:$16 sps:$4 sm:$0xff]   ;;  %v5731_v55 = vld [vmem:[#allocation13 + $0x16c] ss:$16 sps:$4 sm:$0xff]  }
 0x2a9   :  { %3090 = vmatprep.subr.bf16.mxu1 %v5710_v42  ;;  %v5729_v58 = vld [vmem:[#allocation13 + $0x168] ss:$16 sps:$4 sm:$0xff]   ;;  %v5761_v40 = vld [vmem:[#allocation14 + $0x2c4] ss:$16 sps:$4 sm:$0xff]   ;;  %v5759_v42 = vld [vmem:[#allocation14 + $0x2c0] ss:$16 sps:$4 sm:$0xff]  }
 0x2aa   :  { %v2111_v1 = vpack.c.bf16 %v2106_v62, %v2102_v60  ;;  %v2168_v2 = vadd.bf16 %v2158_v56, %v2110_v61  ;;  %v5726_v56 = vld [vmem:[#allocation13 + $0x160] ss:$16 sps:$4 sm:$0xff]   ;;  %v5734_v60 = vld [vmem:[#allocation13 + $0x144] ss:$16 sps:$4 sm:$0xff]   ;;  %v5735_v62 = vld [vmem:[#allocation13 + $0x148] ss:$16 sps:$4 sm:$0xff]  }
 0x2ab   :  { %v5732_v61 = vld [vmem:[#allocation13 + $0x140] ss:$16 sps:$4 sm:$0xff]  }
 0x2ac   :  { %v2169_v3 = vadd.bf16 %v2165_v63, %v2111_v1  ;;  %v2172_v5 = vmax.bf16 %v6203_v0, %v2168_v2  ;;  %3091 = vmatpush2.bf16.msra.mxu1 %v5708_v44  ;;  %v5737_v63 = vld [vmem:[#allocation13 + $0x14c] ss:$16 sps:$4 sm:$0xff]   ;;  %v5740_v1 = vld [vmem:[#allocation13 + $0x124] ss:$16 sps:$4 sm:$0xff]  }
 0x2ad   :  { %3092 = vmatprep.subr.bf16.mxu1 %v5716_v46  ;;  %v5743_v2 = vld [vmem:[#allocation13 + $0x12c] ss:$16 sps:$4 sm:$0xff]   ;;  %v5767_v44 = vld [vmem:[#allocation14 + $0x2a4] ss:$16 sps:$4 sm:$0xff]   ;;  %v5765_v46 = vld [vmem:[#allocation14 + $0x2a0] ss:$16 sps:$4 sm:$0xff]  }
 0x2ae   :  { %v2173_v4 = vmax.bf16 %v6203_v0, %v2169_v3  ;;  %v5738_v3 = vld [vmem:[#allocation13 + $0x120] ss:$16 sps:$4 sm:$0xff]  }
 0x2b0   :  { %2633 = vmatprep.mubr.bf16.mxu0 %v2173_v4  ;;  %3093 = vmatpush2.bf16.msra.mxu1 %v5714_v47  ;;  %v5741_v4 = vld [vmem:[#allocation13 + $0x128] ss:$16 sps:$4 sm:$0xff]   ;;  %v5773_v47 = vld [vmem:[#allocation14 + $0x284] ss:$16 sps:$4 sm:$0xff]  }
 0x2b1   :  { %2634 = vmatmul.mubr.bf16.vlgmr.msra.gmra.mxu0 %v2172_v5  ;;  %3094 = vmatprep.subr.bf16.mxu1 %v5722_v50  ;;  %v5744_v5 = vld [vmem:[#allocation13 + $0x100] ss:$16 sps:$4 sm:$0xff]  }
 0x2b2   :  { %3116 = vmatpush1.bf16.msra.mxu0 %v5657_v32  ;;  %v5749_v32 = vld [vmem:[#allocation13 + $0x10c] ss:$16 sps:$4 sm:$0xff]   ;;  %v5771_v50 = vld [vmem:[#allocation14 + $0x280] ss:$16 sps:$4 sm:$0xff]  }
 0x2b3   :  { %3117 = vmatprep.subr.bf16.mxu0 %v5665_v57  ;;  %v4904_v57 = vld.sshfl [vmem:[#allocation11] sm:$0x11 pattern:$0x75316420] }
 0x2b4   :  { %3095 = vmatpush2.bf16.msra.mxu1 %v5720_v52  ;;  %v5779_v52 = vld [vmem:[#allocation14 + $0x264] ss:$16 sps:$4 sm:$0xff]  }
 0x2b5   :  { %3096 = vmatprep.subr.bf16.mxu1 %v5728_v54  ;;  %v5777_v54 = vld [vmem:[#allocation14 + $0x260] ss:$16 sps:$4 sm:$0xff]  }
 0x2b6   :  { %3118 = vmatpush1.bf16.msra.mxu0 %v5663_v10  ;;  %v2655_v10 = vcombine.high %v4904_v57, %v4904_v57 }
 0x2b7   :  { %3119 = vmatprep.subr.bf16.mxu0 %v5671_v12  ;;  %v2662_v12 = vrot.slane %v4904_v57, %v6331_v59  ;;  %v5809_v57 = vld [vmem:[#allocation14 + $0x3c4] ss:$16 sps:$4 sm:$0xff]  }
 0x2b8   :  { %3097 = vmatpush2.bf16.msra.mxu1 %v5726_v56  ;;  %v2669_v13 = vrot.slane %v2655_v10, %v6331_v59  ;;  %v5785_v56 = vld [vmem:[#allocation14 + $0x244] ss:$16 sps:$4 sm:$0xff]   ;;  %v5807_v10 = vld [vmem:[#allocation14 + $0x3c0] ss:$16 sps:$4 sm:$0xff]  }
 0x2b9   :  { %3098 = vmatprep.subr.bf16.mxu1 %v5734_v60  ;;  %v2671_v17 = vpack.i.b16 %v2662_v12, %v2662_v12  ;;  %v5783_v60 = vld [vmem:[#allocation14 + $0x240] ss:$16 sps:$4 sm:$0xff]   ;;  %v5815_v12 = vld [vmem:[#allocation14 + $0x3a4] ss:$16 sps:$4 sm:$0xff]  }
 0x2ba   :  { %3120 = vmatpush1.bf16.msra.mxu0 %v5669_v14 }
 0x2bb   :  { %3121 = vmatprep.subr.bf16.mxu0 %v5677_v16  ;;  %v2676_v23 = vrot.slane %v2671_v17, %v6337_v6  ;;  %v5816_v17 = vld [vmem:[#allocation14 + $0x180] ss:$16 sps:$4 sm:$0xff]  }
 0x2bc   :  { %3099 = vmatpush2.bf16.msra.mxu1 %v5732_v61  ;;  %v5788_v61 = vld [vmem:[#allocation14 + $0x24] ss:$16 sps:$4 sm:$0xff]  }
 0x2bd   :  { %3100 = vmatprep.subr.bf16.mxu1 %v5740_v1  ;;  %v5789_v1 = vld [vmem:[#allocation14 + $0x220] ss:$16 sps:$4 sm:$0xff]  }
 0x2be   :  { %3122 = vmatpush1.bf16.msra.mxu0 %v5675_v18  ;;  %v2678_v18 = vpack.i.b16 %v2669_v13, %v2669_v13  ;;  %v5810_v13 = vld [vmem:[#allocation14 + $0x1a0] ss:$16 sps:$4 sm:$0xff]  }
 0x2bf   :  { %3123 = vmatprep.subr.bf16.mxu0 %v5683_v20 }
 0x2c0   :  { %3101 = vmatpush2.bf16.msra.mxu1 %v5738_v3  ;;  %v5797_v3 = vld [vmem:[#allocation14 + $0x204] ss:$16 sps:$4 sm:$0xff]  }
 0x2c1   :  { %3102 = vmatprep.subr.bf16.mxu1 %v5746_v34  ;;  %v5800_v34 = vld [vmem:[#allocation14 + $0x1e4] ss:$16 sps:$4 sm:$0xff]  }
 0x2c2   :  { %3124 = vmatpush1.bf16.msra.mxu0 %v5681_v22 }
 0x2c3   :  { %3125 = vmatprep.subr.bf16.mxu0 %v5689_v24 }
 0x2c4   :  { %3103 = vmatpush2.bf16.msra.mxu1 %v5744_v5  ;;  %v5795_v5 = vld [vmem:[#allocation14 + $0x200] ss:$16 sps:$4 sm:$0xff]  }
 0x2c5   :  { %3992 = vmatprep.subr.bf16.mxu1 %v5752_v8  ;;  %v5801_v8 = vld [vmem:[#allocation14 + $0x3e0] ss:$16 sps:$4 sm:$0xff]  }
 0x2c6   :  { %3126 = vmatpush1.bf16.msra.mxu0 %v5687_v26 }
 0x2c7   :  { %3127 = vmatprep.subr.bf16.mxu0 %v5695_v28  ;;  %v2683_v28 = vrot.slane %v2678_v18, %v6337_v6  ;;  %v5819_v18 = vld [vmem:[#allocation14 + $0x380] ss:$16 sps:$4 sm:$0xff]  }
 0x2ca   :  { %3128 = vmatpush1.bf16.msra.mxu0 %v5693_v30 }
 0x2cb   :  { %3129 = vmatprep.subr.bf16.mxu0 %v5701_v33 }
 0x2ce   :  { %3130 = vmatpush1.bf16.msra.mxu0 %v5699_v37  ;;  %v5753_v37 = vld [vmem:[#allocation14 + $0x2e0] ss:$16 sps:$4 sm:$0xff]  }
 0x2cf   :  { %3131 = vmatprep.subr.bf16.mxu0 %v5707_v39  ;;  %v5758_v39 = vld [vmem:[#allocation14 + $0xc4] ss:$16 sps:$4 sm:$0xff]  }
 0x2d2   :  { %3132 = vmatpush2.bf16.msra.mxu0 %v5705_v41  ;;  %v5756_v41 = vld [vmem:[#allocation14 + $0xc0] ss:$16 sps:$4 sm:$0xff]  }
 0x2d3   :  { %3133 = vmatprep.subr.bf16.mxu0 %v5713_v43  ;;  %v5764_v43 = vld [vmem:[#allocation14 + $0xa4] ss:$16 sps:$4 sm:$0xff]  }
 0x2d6   :  { %3134 = vmatpush2.bf16.msra.mxu0 %v5711_v45  ;;  %v5762_v45 = vld [vmem:[#allocation14 + $0xa0] ss:$16 sps:$4 sm:$0xff]  }
 0x2d7   :  { %3135 = vmatprep.subr.bf16.mxu0 %v5719_v48  ;;  %v5770_v48 = vld [vmem:[#allocation14 + $0x84] ss:$16 sps:$4 sm:$0xff]  }
 0x2da   :  { %3136 = vmatpush2.bf16.msra.mxu0 %v5717_v49  ;;  %v5768_v49 = vld [vmem:[#allocation14 + $0x80] ss:$16 sps:$4 sm:$0xff]  }
 0x2db   :  { %3137 = vmatprep.subr.bf16.mxu0 %v5725_v51  ;;  %v5776_v51 = vld [vmem:[#allocation14 + $0x64] ss:$16 sps:$4 sm:$0xff]  }
 0x2de   :  { %3138 = vmatpush2.bf16.msra.mxu0 %v5723_v53  ;;  %v5774_v53 = vld [vmem:[#allocation14 + $0x60] ss:$16 sps:$4 sm:$0xff]  }
 0x2df   :  { %3139 = vmatprep.subr.bf16.mxu0 %v5731_v55  ;;  %v5782_v55 = vld [vmem:[#allocation14 + $0x44] ss:$16 sps:$4 sm:$0xff]  }
 0x2e2   :  { %3140 = vmatpush2.bf16.msra.mxu0 %v5729_v58  ;;  %v5780_v58 = vld [vmem:[#allocation14 + $0x40] ss:$16 sps:$4 sm:$0xff]  }
 0x2e3   :  { %3141 = vmatprep.subr.bf16.mxu0 %v5737_v63  ;;  %v5786_v63 = vld [vmem:[#allocation14 + $0x20] ss:$16 sps:$4 sm:$0xff]  }
 0x2e6   :  { %3142 = vmatpush2.bf16.msra.mxu0 %v5735_v62  ;;  %v5791_v62 = vld [vmem:[#allocation14 + $0x224] ss:$16 sps:$4 sm:$0xff]  }
 0x2e7   :  { %3143 = vmatprep.subr.bf16.mxu0 %v5743_v2  ;;  %v5794_v2 = vld [vmem:[#allocation14 + $0x4] ss:$16 sps:$4 sm:$0xff]  }
 0x2ea   :  { %3144 = vmatpush2.bf16.msra.mxu0 %v5741_v4  ;;  %v5792_v4 = vld [vmem:[#allocation14] ss:$16 sps:$4 sm:$0xff]  }
 0x2eb   :  { %3145 = vmatprep.subr.bf16.mxu0 %v5749_v32  ;;  %v5798_v32 = vld [vmem:[#allocation14 + $0x1e0] ss:$16 sps:$4 sm:$0xff]  }
 0x2ee   :  { %3146 = vmatpush2.bf16.msra.mxu0 %v5747_v7  ;;  %v5803_v7 = vld [vmem:[#allocation14 + $0x3e4] ss:$16 sps:$4 sm:$0xff]  }
 0x2ef   :  { %4035 = vmatprep.subr.bf16.mxu0 %v5755_v35  ;;  %v5806_v35 = vld [vmem:[#allocation14 + $0x1c4] ss:$16 sps:$4 sm:$0xff]  }
 0x32f   :  { %v2592_v9 = vpop.f32.mrf.mxu1 }
 0x331   :  { %v2594_v11 = vpop.f32.mrf.mxu1 }
 0x333   :  { %v2596_v15 = vpop.f32.mrf.mxu1 }
 0x335   :  { %v2598_v22 = vpop.f32.mrf.mxu1 }
 0x371   :  { %v2635_v14 = vpop.f32.mrf.mxu0 }
 0x372   :  { %v2636_v20 = vadd.f32 %v2635_v14, %v2592_v9  ;;  %v5804_v9 = vld [vmem:[#allocation14 + $0x1c0] ss:$16 sps:$4 sm:$0xff]  }
 0x373   :  { %v2637_v16 = vpop.f32.mrf.mxu0  ;;  %v5813_v14 = vld [vmem:[#allocation14 + $0x3a0] ss:$16 sps:$4 sm:$0xff]  }
 0x374   :  { %v2638_v25 = vadd.f32 %v2637_v16, %v2594_v11  ;;  %v5812_v11 = vld [vmem:[#allocation14 + $0x1a4] ss:$16 sps:$4 sm:$0xff]  }
 0x375   :  { %v2639_v19 = vpop.f32.mrf.mxu0  ;;  %v5821_v16 = vld [vmem:[#allocation14 + $0x384] ss:$16 sps:$4 sm:$0xff]  }
 0x376   :  { %v2640_v21 = vadd.f32 %v2639_v19, %v2596_v15  ;;  %v5818_v15 = vld [vmem:[#allocation14 + $0x184] ss:$16 sps:$4 sm:$0xff]  }
 0x377   :  { %v2641_v24 = vpop.f32.mrf.mxu0  ;;  %v5824_v19 = vld [vmem:[#allocation14 + $0x164] ss:$16 sps:$4 sm:$0xff]  }
 0x378   :  { %v2644_v26 = vpack.c.bf16 %v2640_v21, %v2636_v20  ;;  %v2642_v27 = vadd.f32 %v2641_v24, %v2598_v22  ;;  %v5827_v20 = vld [vmem:[#allocation14 + $0x364] ss:$16 sps:$4 sm:$0xff]   ;;  %v5822_v21 = vld [vmem:[#allocation14 + $0x160] ss:$16 sps:$4 sm:$0xff]  }
 0x379   :  { %v5825_v22 = vld [vmem:[#allocation14 + $0x360] ss:$16 sps:$4 sm:$0xff]   ;;  %v5830_v24 = vld [vmem:[#allocation14 + $0x144] ss:$16 sps:$4 sm:$0xff]  }
 0x37a   :  { %v2645_v29 = vpack.c.bf16 %v2642_v27, %v2638_v25  ;;  %v2684_v30 = vadd.bf16 %v2676_v23, %v2644_v26  ;;  %v5828_v23 = vld [vmem:[#allocation14 + $0x140] ss:$16 sps:$4 sm:$0xff]   ;;  %v5833_v26 = vld [vmem:[#allocation14 + $0x344] ss:$16 sps:$4 sm:$0xff]  }
 0x37b   :  { %v5831_v25 = vld [vmem:[#allocation14 + $0x340] ss:$16 sps:$4 sm:$0xff]   ;;  %v5836_v27 = vld [vmem:[#allocation14 + $0x124] ss:$16 sps:$4 sm:$0xff]  }
 0x37c   :  { %v2685_v31 = vadd.bf16 %v2683_v28, %v2645_v29  ;;  %v2686_v38 = vmax.bf16 %v6203_v0, %v2684_v30  ;;  %v5839_v28 = vld [vmem:[#allocation14 + $0x324] ss:$16 sps:$4 sm:$0xff]   ;;  %v5834_v29 = vld [vmem:[#allocation14 + $0x120] ss:$16 sps:$4 sm:$0xff]  }
 0x37d   :  { %v5837_v30 = vld [vmem:[#allocation14 + $0x320] ss:$16 sps:$4 sm:$0xff]  }
 0x37e   :  { %v2687_v33 = vmax.bf16 %v6203_v0, %v2685_v31  ;;  %v5842_v31 = vld [vmem:[#allocation14 + $0x104] ss:$16 sps:$4 sm:$0xff]  }
 0x380   :  { %3104 = vmatprep.mubr.bf16.mxu1 %v2687_v33  ;;  %3147 = vmatprep.mubr.bf16.mxu0 %v2687_v33  ;;  %v5845_v33 = vld [vmem:[#allocation14 + $0x304] ss:$16 sps:$4 sm:$0xff]  }
 0x381   :  { %3105 = vmatmul.mubr.bf16.vlgmr.msra.gmra.mxu1 %v2686_v38  ;;  %3148 = vmatmul.mubr.bf16.vlgmr.msra.gmra.mxu0 %v2686_v38  ;;  %v5848_v38 = vld [vmem:[#allocation14 + $0xec] ss:$16 sps:$4 sm:$0xff]  }
 0x382   :  { %3993 = vmatpush1.bf16.msra.mxu1 %v5750_v36  ;;  %4036 = vmatpush1.bf16.msra.mxu0 %v5753_v37  ;;  %v5840_v36 = vld [vmem:[#allocation14 + $0x100] ss:$16 sps:$4 sm:$0xff]  }
 0x383   :  { %3994 = vmatprep.subr.bf16.mxu1 %v5758_v39  ;;  %4037 = vmatprep.subr.bf16.mxu0 %v5761_v40  ;;  %v5843_v37 = vld [vmem:[#allocation14 + $0x300] ss:$16 sps:$4 sm:$0xff]   ;;  %v5851_v39 = vld [vmem:[#allocation14 + $0x2ec] ss:$16 sps:$4 sm:$0xff]  }
 0x384   :  { %v4969_v40 = vld.sshfl [vmem:[%s6457_s8] sm:$0x33 pattern:$0x75316420] }
 0x386   :  { %3995 = vmatpush1.bf16.msra.mxu1 %v5756_v41  ;;  %4038 = vmatpush1.bf16.msra.mxu0 %v5759_v42  ;;  %v3171_v41 = vcombine.high %v4969_v40, %v4969_v40  ;;  %v3178_v42 = vrot.slane %v4969_v40, %v6331_v59  ;;  %v5893_v40 = vld [vmem:[#allocation14 + $0x20c] ss:$16 sps:$4 sm:$0xff]  }
 0x387   :  { %3996 = vmatprep.subr.bf16.mxu1 %v5764_v43  ;;  %4039 = vmatprep.subr.bf16.mxu0 %v5767_v44 }
 0x388   :  { %v3185_v43 = vrot.slane %v3171_v41, %v6331_v59  ;;  %v3186_v44 = vcombine.high %v3178_v42, %v3178_v42  ;;  %v5888_v41 = vld [vmem:[#allocation14 + $0x8] ss:$16 sps:$4 sm:$0xff]  }
 0x38a   :  { %3997 = vmatpush1.bf16.msra.mxu1 %v5762_v45  ;;  %4040 = vmatpush1.bf16.msra.mxu0 %v5765_v46  ;;  %v3187_v45 = vcombine.high %v3185_v43, %v3185_v43 }
 0x38b   :  { %3998 = vmatprep.subr.bf16.mxu1 %v5770_v48  ;;  %4041 = vmatprep.subr.bf16.mxu0 %v5773_v47  ;;  %v3189_v47 = vpack.i.b16 %v3178_v42, %v3178_v42  ;;  %v5891_v42 = vld [vmem:[#allocation14 + $0x208] ss:$16 sps:$4 sm:$0xff]  }
 0x38e   :  { %3999 = vmatpush1.bf16.msra.mxu1 %v5768_v49  ;;  %4042 = vmatpush1.bf16.msra.mxu0 %v5771_v50  ;;  %v3203_v49 = vpack.i.b16 %v3186_v44, %v3186_v44  ;;  %v3196_v50 = vpack.i.b16 %v3185_v43, %v3185_v43  ;;  %v5896_v43 = vld [vmem:[#allocation14 + $0x1ec] ss:$16 sps:$4 sm:$0xff]  }
 0x38f   :  { %4000 = vmatprep.subr.bf16.mxu1 %v5776_v51  ;;  %4043 = vmatprep.subr.bf16.mxu0 %v5779_v52  ;;  %v3210_v51 = vpack.i.b16 %v3187_v45, %v3187_v45  ;;  %v5899_v44 = vld [vmem:[#allocation14 + $0x3ec] ss:$16 sps:$4 sm:$0xff]   ;;  %v5894_v45 = vld [vmem:[#allocation14 + $0x1e8] ss:$16 sps:$4 sm:$0xff]  }
 0x392   :  { %4001 = vmatpush1.bf16.msra.mxu1 %v5774_v53  ;;  %4044 = vmatpush1.bf16.msra.mxu0 %v5777_v54 }
 0x393   :  { %4002 = vmatprep.subr.bf16.mxu1 %v5782_v55  ;;  %4045 = vmatprep.subr.bf16.mxu0 %v5785_v56  ;;  %v3194_v55 = vrot.slane %v3189_v47, %v6337_v6  ;;  %v5905_v47 = vld [vmem:[#allocation14 + $0x3cc] ss:$16 sps:$4 sm:$0xff]  }
 0x396   :  { %4003 = vmatpush1.bf16.msra.mxu1 %v5780_v58  ;;  %4046 = vmatpush1.bf16.msra.mxu0 %v5783_v60  ;;  %v3208_v58 = vrot.slane %v3203_v49, %v6337_v6  ;;  %v5900_v49 = vld [vmem:[#allocation14 + $0x1c8] ss:$16 sps:$4 sm:$0xff]  }
 0x397   :  { %4004 = vmatprep.subr.bf16.mxu1 %v5788_v61  ;;  %4047 = vmatprep.subr.bf16.mxu0 %v5791_v62  ;;  %v3201_v62 = vrot.slane %v3196_v50, %v6337_v6  ;;  %v5903_v50 = vld [vmem:[#allocation14 + $0x3c8] ss:$16 sps:$4 sm:$0xff]  }
 0x39a   :  { %4005 = vmatpush1.bf16.msra.mxu1 %v5786_v63  ;;  %4048 = vmatpush1.bf16.msra.mxu0 %v5789_v1  ;;  %v3215_v63 = vrot.slane %v3210_v51, %v6337_v6  ;;  %v5908_v51 = vld [vmem:[#allocation14 + $0x1ac] ss:$16 sps:$4 sm:$0xff]  }
 0x39b   :  { %4006 = vmatprep.subr.bf16.mxu1 %v5794_v2  ;;  %4049 = vmatprep.subr.bf16.mxu0 %v5797_v3 }
 0x39e   :  { %4007 = vmatpush1.bf16.msra.mxu1 %v5792_v4  ;;  %4050 = vmatpush1.bf16.msra.mxu0 %v5795_v5 }
 0x39f   :  { %4008 = vmatprep.subr.bf16.mxu1 %v5800_v34  ;;  %4051 = vmatprep.subr.bf16.mxu0 %v5803_v7 }
 0x3a2   :  { %4009 = vmatpush2.bf16.msra.mxu1 %v5798_v32  ;;  %4052 = vmatpush2.bf16.msra.mxu0 %v5801_v8 }
 0x3a3   :  { %4010 = vmatprep.subr.bf16.mxu1 %v5806_v35  ;;  %4053 = vmatprep.subr.bf16.mxu0 %v5809_v57  ;;  %v5846_v57 = vld [vmem:[#allocation14 + $0xe8] ss:$16 sps:$4 sm:$0xff]  }
 0x3a6   :  { %4011 = vmatpush2.bf16.msra.mxu1 %v5804_v9  ;;  %4054 = vmatpush2.bf16.msra.mxu0 %v5807_v10  ;;  %v5849_v9 = vld [vmem:[#allocation14 + $0x2e8] ss:$16 sps:$4 sm:$0xff]  }
 0x3a7   :  { %4012 = vmatprep.subr.bf16.mxu1 %v5812_v11  ;;  %4055 = vmatprep.subr.bf16.mxu0 %v5815_v12  ;;  %v5854_v12 = vld [vmem:[#allocation14 + $0xcc] ss:$16 sps:$4 sm:$0xff]  }
 0x3aa   :  { %4013 = vmatpush2.bf16.msra.mxu1 %v5810_v13  ;;  %4056 = vmatpush2.bf16.msra.mxu0 %v5813_v14  ;;  %v5857_v13 = vld [vmem:[#allocation14 + $0x2cc] ss:$16 sps:$4 sm:$0xff]   ;;  %v5852_v14 = vld [vmem:[#allocation14 + $0xc8] ss:$16 sps:$4 sm:$0xff]  }
 0x3ab   :  { %4014 = vmatprep.subr.bf16.mxu1 %v5818_v15  ;;  %4057 = vmatprep.subr.bf16.mxu0 %v5821_v16  ;;  %v5855_v15 = vld [vmem:[#allocation14 + $0x2c8] ss:$16 sps:$4 sm:$0xff]   ;;  %v5860_v16 = vld [vmem:[#allocation14 + $0xac] ss:$16 sps:$4 sm:$0xff]  }
 0x3ae   :  { %4015 = vmatpush2.bf16.msra.mxu1 %v5816_v17  ;;  %4058 = vmatpush2.bf16.msra.mxu0 %v5819_v18  ;;  %v5863_v17 = vld [vmem:[#allocation14 + $0x2ac] ss:$16 sps:$4 sm:$0xff]   ;;  %v5858_v18 = vld [vmem:[#allocation14 + $0xa8] ss:$16 sps:$4 sm:$0xff]  }
 0x3af   :  { %4016 = vmatprep.subr.bf16.mxu1 %v5824_v19  ;;  %4059 = vmatprep.subr.bf16.mxu0 %v5827_v20  ;;  %v5861_v19 = vld [vmem:[#allocation14 + $0x2a8] ss:$16 sps:$4 sm:$0xff]   ;;  %v5866_v20 = vld [vmem:[#allocation14 + $0x8c] ss:$16 sps:$4 sm:$0xff]  }
 0x3b2   :  { %4017 = vmatpush2.bf16.msra.mxu1 %v5822_v21  ;;  %4060 = vmatpush2.bf16.msra.mxu0 %v5825_v22  ;;  %v5869_v21 = vld [vmem:[#allocation14 + $0x28c] ss:$16 sps:$4 sm:$0xff]   ;;  %v5864_v22 = vld [vmem:[#allocation14 + $0x88] ss:$16 sps:$4 sm:$0xff]  }
 0x3b3   :  { %4018 = vmatprep.subr.bf16.mxu1 %v5830_v24  ;;  %4061 = vmatprep.subr.bf16.mxu0 %v5833_v26  ;;  %v5872_v24 = vld [vmem:[#allocation14 + $0x6c] ss:$16 sps:$4 sm:$0xff]   ;;  %v5870_v26 = vld [vmem:[#allocation14 + $0x68] ss:$16 sps:$4 sm:$0xff]  }
 0x3b6   :  { %4019 = vmatpush2.bf16.msra.mxu1 %v5828_v23  ;;  %4062 = vmatpush2.bf16.msra.mxu0 %v5831_v25  ;;  %v5867_v23 = vld [vmem:[#allocation14 + $0x288] ss:$16 sps:$4 sm:$0xff]   ;;  %v5875_v25 = vld [vmem:[#allocation14 + $0x26c] ss:$16 sps:$4 sm:$0xff]  }
 0x3b7   :  { %4020 = vmatprep.subr.bf16.mxu1 %v5836_v27  ;;  %4063 = vmatprep.subr.bf16.mxu0 %v5839_v28  ;;  %v5873_v27 = vld [vmem:[#allocation14 + $0x268] ss:$16 sps:$4 sm:$0xff]   ;;  %v5878_v28 = vld [vmem:[#allocation14 + $0x4c] ss:$16 sps:$4 sm:$0xff]  }
 0x3ba   :  { %4021 = vmatpush2.bf16.msra.mxu1 %v5834_v29  ;;  %4064 = vmatpush2.bf16.msra.mxu0 %v5837_v30  ;;  %v5881_v29 = vld [vmem:[#allocation14 + $0x24c] ss:$16 sps:$4 sm:$0xff]   ;;  %v5876_v30 = vld [vmem:[#allocation14 + $0x48] ss:$16 sps:$4 sm:$0xff]  }
 0x3bb   :  { %4022 = vmatprep.subr.bf16.mxu1 %v5842_v31  ;;  %4065 = vmatprep.subr.bf16.mxu0 %v5845_v33  ;;  %v5879_v31 = vld [vmem:[#allocation14 + $0x248] ss:$16 sps:$4 sm:$0xff]   ;;  %v5884_v33 = vld [vmem:[#allocation14 + $0x2c] ss:$16 sps:$4 sm:$0xff]  }
 0x3be   :  { %4023 = vmatpush2.bf16.msra.mxu1 %v5840_v36  ;;  %4066 = vmatpush2.bf16.msra.mxu0 %v5843_v37  ;;  %v5887_v36 = vld [vmem:[#allocation14 + $0x22c] ss:$16 sps:$4 sm:$0xff]   ;;  %v5882_v37 = vld [vmem:[#allocation14 + $0x28] ss:$16 sps:$4 sm:$0xff]  }
 0x3bf   :  { %4078 = vmatprep.subr.bf16.mxu1 %v5848_v38  ;;  %4121 = vmatprep.subr.bf16.mxu0 %v5851_v39  ;;  %v5885_v38 = vld [vmem:[#allocation14 + $0x228] ss:$16 sps:$4 sm:$0xff]   ;;  %v5890_v39 = vld [vmem:[#allocation14 + $0xc] ss:$16 sps:$4 sm:$0xff]  }
 0x441   :  { %v3106_v46 = vpop.f32.mrf.mxu1  ;;  %v3149_v48 = vpop.f32.mrf.mxu0 }
 0x443   :  { %v3108_v52 = vpop.f32.mrf.mxu1  ;;  %v3151_v53 = vpop.f32.mrf.mxu0 }
 0x445   :  { %v3110_v54 = vpop.f32.mrf.mxu1  ;;  %v3153_v56 = vpop.f32.mrf.mxu0 }
 0x446   :  { %v3158_v60 = vpack.c.bf16 %v3110_v54, %v3106_v46  ;;  %v3160_v61 = vpack.c.bf16 %v3153_v56, %v3149_v48  ;;  %v5897_v46 = vld [vmem:[#allocation14 + $0x3e8] ss:$16 sps:$4 sm:$0xff]   ;;  %v5902_v48 = vld [vmem:[#allocation14 + $0x1cc] ss:$16 sps:$4 sm:$0xff]  }
 0x447   :  { %v3112_v1 = vpop.f32.mrf.mxu1  ;;  %v3155_v2 = vpop.f32.mrf.mxu0  ;;  %v5909_v54 = vld [vmem:[#allocation14 + $0x3a8] ss:$16 sps:$4 sm:$0xff]   ;;  %v5917_v56 = vld [vmem:[#allocation14 + $0x38c] ss:$16 sps:$4 sm:$0xff]  }
 0x448   :  { %v3159_v3 = vpack.c.bf16 %v3112_v1, %v3108_v52  ;;  %v3161_v4 = vpack.c.bf16 %v3155_v2, %v3151_v53  ;;  %v3216_v5 = vadd.bf16 %v3194_v55, %v3158_v60  ;;  %v3218_v34 = vadd.bf16 %v3208_v58, %v3160_v61  ;;  %v5911_v52 = vld [vmem:[#allocation14 + $0x3ac] ss:$16 sps:$4 sm:$0xff]   ;;  %v5906_v53 = vld [vmem:[#allocation14 + $0x1a8] ss:$16 sps:$4 sm:$0xff]  }
 0x449   :  { %v5914_v55 = vld [vmem:[#allocation14 + $0x18c] ss:$16 sps:$4 sm:$0xff]   ;;  %v5912_v58 = vld [vmem:[#allocation14 + $0x188] ss:$16 sps:$4 sm:$0xff]  }
 0x44a   :  { %v3217_v7 = vadd.bf16 %v3201_v62, %v3159_v3  ;;  %v3219_v32 = vadd.bf16 %v3215_v63, %v3161_v4  ;;  %v6418_v10 = vmax.bf16 %v6203_v0, %v3216_v5  ;;  %v6421_v11 = vmax.bf16 %v6203_v0, %v3218_v34  ;;  %v5915_v60 = vld [vmem:[#allocation14 + $0x388] ss:$16 sps:$4 sm:$0xff]   ;;  %v5920_v61 = vld [vmem:[#allocation14 + $0x16c] ss:$16 sps:$4 sm:$0xff]  }
 0x44b   :  { %v5923_v62 = vld [vmem:[#allocation14 + $0x36c] ss:$16 sps:$4 sm:$0xff]   ;;  %v5918_v63 = vld [vmem:[#allocation14 + $0x168] ss:$16 sps:$4 sm:$0xff]  }
 0x44c   :  { %v3221_v8 = vmax.bf16 %v6203_v0, %v3217_v7  ;;  %v3223_v35 = vmax.bf16 %v6203_v0, %v3219_v32  ;;  %v5921_v1 = vld [vmem:[#allocation14 + $0x368] ss:$16 sps:$4 sm:$0xff]   ;;  %v5926_v2 = vld [vmem:[#allocation14 + $0x14c] ss:$16 sps:$4 sm:$0xff]  }
 0x44d   :  { %v5929_v3 = vld [vmem:[#allocation14 + $0x34c] ss:$16 sps:$4 sm:$0xff]   ;;  %v5924_v4 = vld [vmem:[#allocation14 + $0x148] ss:$16 sps:$4 sm:$0xff]  }
 0x44e   :  { %4024 = vmatprep.mubr.bf16.mxu1 %v3221_v8  ;;  %4067 = vmatprep.mubr.bf16.mxu0 %v3223_v35  ;;  %v5927_v5 = vld [vmem:[#allocation14 + $0x348] ss:$16 sps:$4 sm:$0xff]   ;;  %v5932_v34 = vld [vmem:[#allocation14 + $0x12c] ss:$16 sps:$4 sm:$0xff]  }
 0x44f   :  { %4025 = vmatmul.mubr.bf16.vlgmr.msra.gmra.mxu1 %v6418_v10  ;;  %4068 = vmatmul.mubr.bf16.vlgmr.msra.gmra.mxu0 %v6421_v11  ;;  %v5935_v7 = vld [vmem:[#allocation14 + $0x32c] ss:$16 sps:$4 sm:$0xff]   ;;  %v5930_v32 = vld [vmem:[#allocation14 + $0x128] ss:$16 sps:$4 sm:$0xff]  }
 0x450   :  { %4079 = vmatpush1.bf16.msra.mxu1 %v5846_v57  ;;  %4122 = vmatpush1.bf16.msra.mxu0 %v5849_v9  ;;  %v5941_v57 = vld [vmem:[#allocation14 + $0x30c] ss:$16 sps:$4 sm:$0xff]   ;;  %v5936_v9 = vld [vmem:[#allocation14 + $0x108] ss:$16 sps:$4 sm:$0xff]  }
 0x451   :  { %4110 = vmatprep.mubr.bf16.mxu1 %v3221_v8  ;;  %4153 = vmatprep.mubr.bf16.mxu0 %v3223_v35  ;;  %v5933_v8 = vld [vmem:[#allocation14 + $0x328] ss:$16 sps:$4 sm:$0xff]   ;;  %v5938_v35 = vld [vmem:[#allocation14 + $0x10c] ss:$16 sps:$4 sm:$0xff]  }
 0x452   :  { %4080 = vmatprep.subr.bf16.mxu1 %v5854_v12  ;;  %4123 = vmatprep.subr.bf16.mxu0 %v5857_v13  ;;  %v5939_v12 = vld [vmem:[#allocation14 + $0x308] ss:$16 sps:$4 sm:$0xff]  }
 0x453   :  { %v5942_v13 = vld [vmem:[#allocation16 + $0x78] sm:$0xff]  }
 0x454   :  { %4081 = vmatpush1.bf16.msra.mxu1 %v5852_v14  ;;  %4124 = vmatpush1.bf16.msra.mxu0 %v5855_v15  ;;  %v5943_v14 = vld [vmem:[#allocation16 + $0x38] sm:$0xff]   ;;  %v5944_v15 = vld [vmem:[#allocation16 + $0x70] sm:$0xff]  }
 0x455   :  { %4082 = vmatprep.subr.bf16.mxu1 %v5860_v16  ;;  %4125 = vmatprep.subr.bf16.mxu0 %v5863_v17  ;;  %v5945_v16 = vld [vmem:[#allocation16 + $0x30] sm:$0xff]   ;;  %v5946_v17 = vld [vmem:[#allocation16 + $0x68] sm:$0xff]  }
 0x458   :  { %4083 = vmatpush1.bf16.msra.mxu1 %v5858_v18  ;;  %4126 = vmatpush1.bf16.msra.mxu0 %v5861_v19  ;;  %v5947_v18 = vld [vmem:[#allocation16 + $0x28] sm:$0xff]   ;;  %v5948_v19 = vld [vmem:[#allocation16 + $0x60] sm:$0xff]  }
 0x459   :  { %4084 = vmatprep.subr.bf16.mxu1 %v5866_v20  ;;  %4127 = vmatprep.subr.bf16.mxu0 %v5869_v21  ;;  %v5949_v20 = vld [vmem:[#allocation16 + $0x20] sm:$0xff]   ;;  %v5950_v21 = vld [vmem:[#allocation16 + $0x58] sm:$0xff]  }
 0x45c   :  { %4085 = vmatpush1.bf16.msra.mxu1 %v5864_v22  ;;  %4128 = vmatpush1.bf16.msra.mxu0 %v5867_v23  ;;  %v5951_v22 = vld [vmem:[#allocation16 + $0x18] sm:$0xff]   ;;  %v5952_v23 = vld [vmem:[#allocation16 + $0x50] sm:$0xff]  }
 0x45d   :  { %4086 = vmatprep.subr.bf16.mxu1 %v5872_v24  ;;  %4129 = vmatprep.subr.bf16.mxu0 %v5875_v25  ;;  %v5958_v24 = vld [vmem:[#allocation16 + $0xf8] sm:$0xff]   ;;  %v5960_v25 = vld [vmem:[#allocation16 + $0xf0] sm:$0xff]  }
 0x460   :  { %4087 = vmatpush1.bf16.msra.mxu1 %v5870_v26  ;;  %4130 = vmatpush1.bf16.msra.mxu0 %v5873_v27  ;;  %v5954_v26 = vld [vmem:[#allocation16 + $0x48] sm:$0xff]   ;;  %v5961_v27 = vld [vmem:[#allocation16 + $0xb0] sm:$0xff]  }
 0x461   :  { %4088 = vmatprep.subr.bf16.mxu1 %v5878_v28  ;;  %4131 = vmatprep.subr.bf16.mxu0 %v5881_v29  ;;  %v5962_v28 = vld [vmem:[#allocation16 + $0xe8] sm:$0xff]  }
 0x462   :  { %v5955_v29 = vld [vmem:[#allocation16 + $0x8] sm:$0xff]  }
 0x464   :  { %4089 = vmatpush1.bf16.msra.mxu1 %v5876_v30  ;;  %4132 = vmatpush1.bf16.msra.mxu0 %v5879_v31  ;;  %v5956_v30 = vld [vmem:[#allocation16 + $0x40] sm:$0xff]   ;;  %v5963_v31 = vld [vmem:[#allocation16 + $0xa8] sm:$0xff]  }
 0x465   :  { %4090 = vmatprep.subr.bf16.mxu1 %v5884_v33  ;;  %4133 = vmatprep.subr.bf16.mxu0 %v5887_v36  ;;  %v5964_v33 = vld [vmem:[#allocation16 + $0xe0] sm:$0xff]  }
 0x466   :  { %v5957_v36 = vld [vmem:[#allocation16] sm:$0xff]  }
 0x468   :  { %4091 = vmatpush1.bf16.msra.mxu1 %v5882_v37  ;;  %4134 = vmatpush1.bf16.msra.mxu0 %v5885_v38  ;;  %v5965_v37 = vld [vmem:[#allocation16 + $0xa0] sm:$0xff]   ;;  %v5966_v38 = vld [vmem:[#allocation16 + $0xd8] sm:$0xff]  }
 0x469   :  { %4092 = vmatprep.subr.bf16.mxu1 %v5890_v39  ;;  %4135 = vmatprep.subr.bf16.mxu0 %v5893_v40  ;;  %v5967_v39 = vld [vmem:[#allocation16 + $0x98] sm:$0xff]   ;;  %v5968_v40 = vld [vmem:[#allocation16 + $0xd0] sm:$0xff]  }
 0x46c   :  { %4093 = vmatpush1.bf16.msra.mxu1 %v5888_v41  ;;  %4136 = vmatpush1.bf16.msra.mxu0 %v5891_v42  ;;  %v5969_v41 = vld [vmem:[#allocation16 + $0x90] sm:$0xff]   ;;  %v5970_v42 = vld [vmem:[#allocation16 + $0xc8] sm:$0xff]  }
 0x46d   :  { %4094 = vmatprep.subr.bf16.mxu1 %v5896_v43  ;;  %4137 = vmatprep.subr.bf16.mxu0 %v5899_v44  ;;  %v5971_v43 = vld [vmem:[#allocation16 + $0x88] sm:$0xff]   ;;  %v5972_v44 = vld [vmem:[#allocation16 + $0xc0] sm:$0xff]  }
 0x470   :  { %4095 = vmatpush2.bf16.msra.mxu1 %v5894_v45  ;;  %4138 = vmatpush2.bf16.msra.mxu0 %v5897_v46  ;;  %v5973_v45 = vld [vmem:[#allocation16 + $0x80] sm:$0xff]   ;;  %v5098_v46 = vld.sshfl [vmem:[%s6459_s10] sm:$0x33 pattern:$0x75316420] }
 0x471   :  { %4096 = vmatprep.subr.bf16.mxu1 %v5902_v48  ;;  %4139 = vmatprep.subr.bf16.mxu0 %v5905_v47  ;;  %v4177_v48 = vcombine.high %v5098_v46, %v5098_v46  ;;  %v4184_v47 = vrot.slane %v5098_v46, %v6331_v59 }
 0x474   :  { %4097 = vmatpush2.bf16.msra.mxu1 %v5900_v49  ;;  %4140 = vmatpush2.bf16.msra.mxu0 %v5903_v50  ;;  %v4191_v49 = vrot.slane %v4177_v48, %v6331_v59 }
 0x475   :  { %4098 = vmatprep.subr.bf16.mxu1 %v5908_v51  ;;  %4141 = vmatprep.subr.bf16.mxu0 %v5911_v52 }
 0x478   :  { %4099 = vmatpush2.bf16.msra.mxu1 %v5906_v53  ;;  %4142 = vmatpush2.bf16.msra.mxu0 %v5909_v54  ;;  %v4195_v54 = vpack.i.b16 %v4184_v47, %v4184_v47 }
 0x479   :  { %4100 = vmatprep.subr.bf16.mxu1 %v5914_v55  ;;  %4143 = vmatprep.subr.bf16.mxu0 %v5917_v56  ;;  %v4202_v55 = vpack.i.b16 %v4191_v49, %v4191_v49 }
 0x47c   :  { %4101 = vmatpush2.bf16.msra.mxu1 %v5912_v58  ;;  %4144 = vmatpush2.bf16.msra.mxu0 %v5915_v60 }
 0x47d   :  { %4102 = vmatprep.subr.bf16.mxu1 %v5920_v61  ;;  %4145 = vmatprep.subr.bf16.mxu0 %v5923_v62  ;;  %v4200_v62 = vrot.slane %v4195_v54, %v6337_v6 }
 0x480   :  { %4103 = vmatpush2.bf16.msra.mxu1 %v5918_v63  ;;  %4146 = vmatpush2.bf16.msra.mxu0 %v5921_v1 }
 0x481   :  { %4104 = vmatprep.subr.bf16.mxu1 %v5926_v2  ;;  %4147 = vmatprep.subr.bf16.mxu0 %v5929_v3 }
 0x484   :  { %4105 = vmatpush2.bf16.msra.mxu1 %v5924_v4  ;;  %4148 = vmatpush2.bf16.msra.mxu0 %v5927_v5  ;;  %v4207_v5 = vrot.slane %v4202_v55, %v6337_v6 }
 0x485   :  { %4106 = vmatprep.subr.bf16.mxu1 %v5932_v34  ;;  %4149 = vmatprep.subr.bf16.mxu0 %v5935_v7 }
 0x488   :  { %4107 = vmatpush2.bf16.msra.mxu1 %v5930_v32  ;;  %4150 = vmatpush2.bf16.msra.mxu0 %v5933_v8 }
 0x489   :  { %4108 = vmatprep.subr.bf16.mxu1 %v5938_v35  ;;  %4151 = vmatprep.subr.bf16.mxu0 %v5941_v57  ;;  %v4192_v35 = vcombine.high %v4184_v47, %v4184_v47  ;;  %v4193_v57 = vcombine.high %v4191_v49, %v4191_v49 }
 0x48c   :  { %4109 = vmatpush2.bf16.msra.mxu1 %v5936_v9  ;;  %4152 = vmatpush2.bf16.msra.mxu0 %v5939_v12 }
 0x48d   :  { %5132 = vmatprep.subr.bf16.mxu1 %v5942_v13  ;;  %5154 = vmatprep.subr.bf16.mxu0 %v5958_v24 }
 0x48f   :  { %4111 = vmatmul.mubr.bf16.vlgmr.msra.gmra.mxu1 %v6418_v10  ;;  %4154 = vmatmul.mubr.bf16.vlgmr.msra.gmra.mxu0 %v6421_v11  ;;  %v5959_v10 = vld [vmem:[#allocation16 + $0xb8] sm:$0xff]   ;;  %v5953_v11 = vld [vmem:[#allocation16 + $0x10] sm:$0xff]  }
 0x490   :  { %5133 = vmatpush3.bf16.msra.mxu1 %v5943_v14  ;;  %5155 = vmatpush3.bf16.msra.mxu0 %v5959_v10 }
 0x491   :  { %5134 = vmatprep.subr.bf16.mxu1 %v5944_v15  ;;  %5156 = vmatprep.subr.bf16.mxu0 %v5960_v25  ;;  %v4209_v15 = vpack.i.b16 %v4192_v35, %v4192_v35 }
 0x494   :  { %5135 = vmatpush3.bf16.msra.mxu1 %v5945_v16  ;;  %5157 = vmatpush3.bf16.msra.mxu0 %v5961_v27  ;;  %v4216_v16 = vpack.i.b16 %v4193_v57, %v4193_v57 }
 0x495   :  { %5136 = vmatprep.subr.bf16.mxu1 %v5946_v17  ;;  %5158 = vmatprep.subr.bf16.mxu0 %v5962_v28 }
 0x498   :  { %5137 = vmatpush3.bf16.msra.mxu1 %v5947_v18  ;;  %5159 = vmatpush3.bf16.msra.mxu0 %v5963_v31 }
 0x499   :  { %5138 = vmatprep.subr.bf16.mxu1 %v5948_v19  ;;  %5160 = vmatprep.subr.bf16.mxu0 %v5964_v33 }
 0x49c   :  { %5139 = vmatpush3.bf16.msra.mxu1 %v5949_v20  ;;  %5161 = vmatpush3.bf16.msra.mxu0 %v5965_v37 }
 0x49d   :  { %5140 = vmatprep.subr.bf16.mxu1 %v5950_v21  ;;  %5162 = vmatprep.subr.bf16.mxu0 %v5966_v38  ;;  %v4214_v21 = vrot.slane %v4209_v15, %v6337_v6  ;;  %v5099_v38 = vld [vmem:[%s6461_s12] ss:$0 sm:$0xff] }
 0x4a0   :  { %5141 = vmatpush3.bf16.msra.mxu1 %v5951_v22  ;;  %5163 = vmatpush3.bf16.msra.mxu0 %v5967_v39 }
 0x4a1   :  { %5142 = vmatprep.subr.bf16.mxu1 %v5952_v23  ;;  %5164 = vmatprep.subr.bf16.mxu0 %v5968_v40 }
 0x4a4   :  { %5143 = vmatpush3.bf16.msra.mxu1 %v5953_v11  ;;  %5165 = vmatpush3.bf16.msra.mxu0 %v5969_v41  ;;  %v4221_v11 = vrot.slane %v4216_v16, %v6337_v6 }
 0x4a5   :  { %5144 = vmatprep.subr.bf16.mxu1 %v5954_v26  ;;  %5166 = vmatprep.subr.bf16.mxu0 %v5970_v42 }
 0x4a8   :  { %5145 = vmatpush3.bf16.msra.mxu1 %v5955_v29  ;;  %5167 = vmatpush3.bf16.msra.mxu0 %v5971_v43 }
 0x4a9   :  { %5146 = vmatprep.subr.bf16.mxu1 %v5956_v30  ;;  %5168 = vmatprep.subr.bf16.mxu0 %v5972_v44 }
 0x4ac   :  { %5147 = vmatpush3.bf16.msra.mxu1 %v5957_v36  ;;  %5169 = vmatpush3.bf16.msra.mxu0 %v5973_v45 }
 0x50f   :  { %v4026_v50 = vpop.f32.mrf.mxu1  ;;  %v4069_v51 = vpop.f32.mrf.mxu0 }
 0x510   :  { %v4070_v60 = vadd.f32 %v4069_v51, %v4026_v50 }
 0x511   :  { %v4028_v52 = vpop.f32.mrf.mxu1  ;;  %v4071_v53 = vpop.f32.mrf.mxu0 }
 0x512   :  { %v4072_v2 = vadd.f32 %v4071_v53, %v4028_v52 }
 0x513   :  { %v4030_v56 = vpop.f32.mrf.mxu1  ;;  %v4073_v58 = vpop.f32.mrf.mxu0 }
 0x514   :  { %v4074_v61 = vadd.f32 %v4073_v58, %v4030_v56 }
 0x515   :  { %v4032_v63 = vpop.f32.mrf.mxu1  ;;  %v4075_v1 = vpop.f32.mrf.mxu0 }
 0x516   :  { %v4164_v3 = vpack.c.bf16 %v4074_v61, %v4070_v60  ;;  %v4076_v4 = vadd.f32 %v4075_v1, %v4032_v63 }
 0x518   :  { %v4165_v59 = vpack.c.bf16 %v4076_v4, %v4072_v2  ;;  %v4222_v34 = vadd.bf16 %v4200_v62, %v4164_v3 }
 0x51a   :  { %v4223_v7 = vadd.bf16 %v4207_v5, %v4165_v59  ;;  %v4226_v8 = vmax.bf16 %v6203_v0, %v4222_v34 }
 0x51c   :  { %v4227_v32 = vmax.bf16 %v6203_v0, %v4223_v7 }
 0x51e   :  { %4525 = vmatprep.mubr.bf16.mxu1 %v4227_v32 }
 0x51f   :  { %4526 = vmatmul.mubr.bf16.vlgmr.msra.gmra.mxu1 %v4226_v8 }
 0x54f   :  { %v4112_v9 = vpop.f32.mrf.mxu1  ;;  %v4155_v12 = vpop.f32.mrf.mxu0 }
 0x550   :  { %v4156_v19 = vadd.f32 %v4155_v12, %v4112_v9 }
 0x551   :  { %v4114_v13 = vpop.f32.mrf.mxu1  ;;  %v4157_v14 = vpop.f32.mrf.mxu0 }
 0x552   :  { %v4158_v24 = vadd.f32 %v4157_v14, %v4114_v13 }
 0x553   :  { %v4116_v17 = vpop.f32.mrf.mxu1  ;;  %v4159_v18 = vpop.f32.mrf.mxu0 }
 0x554   :  { %v4160_v20 = vadd.f32 %v4159_v18, %v4116_v17 }
 0x555   :  { %v4118_v22 = vpop.f32.mrf.mxu1  ;;  %v4161_v23 = vpop.f32.mrf.mxu0 }
 0x556   :  { %v4166_v10 = vpack.c.bf16 %v4160_v20, %v4156_v19  ;;  %v4162_v25 = vadd.f32 %v4161_v23, %v4118_v22 }
 0x558   :  { %v4167_v26 = vpack.c.bf16 %v4162_v25, %v4158_v24  ;;  %v4224_v27 = vadd.bf16 %v4214_v21, %v4166_v10 }
 0x55a   :  { %v4225_v28 = vadd.bf16 %v4221_v11, %v4167_v26  ;;  %v4228_v30 = vmax.bf16 %v6203_v0, %v4224_v27 }
 0x55c   :  { %v4229_v29 = vmax.bf16 %v6203_v0, %v4225_v28 }
 0x55e   :  { %4566 = vmatprep.mubr.bf16.mxu0 %v4229_v29 }
 0x55f   :  { %4567 = vmatmul.mubr.bf16.vlgmr.msra.gmra.mxu0 %v4228_v30 }
 0x5df   :  { %v5148_v31 = vpop.f32.mrf.mxu1 }
 0x5e1   :  { %v5149_v33 = vpop.f32.mrf.mxu1 }
 0x5e2   :  { %v5150_v37 = vadd.f32 %v5149_v33, %v5148_v31 }
 0x5e3   :  { %v5151_v36 = vpop.f32.mrf.mxu1 }
 0x5e4   :  { %v4528_v41 = vadd.f32 %v5150_v37, %v5099_v38 }
 0x5e5   :  { %v5152_v39 = vpop.f32.mrf.mxu1 }
 0x5e6   :  { %v5153_v42 = vadd.f32 %v5152_v39, %v5151_v36 }
 0x5e8   :  { %v4531_v0 = vadd.f32 %v5153_v42, %v5099_v38 }
 0x61f   :  { %v5170_v40 = vpop.f32.mrf.mxu0 }
 0x621   :  { %v5171_v6 = vpop.f32.mrf.mxu0 }
 0x622   :  { %v5172_v43 = vadd.f32 %v5171_v6, %v5170_v40 }
 0x623   :  { %v5173_v44 = vpop.f32.mrf.mxu0 }
 0x624   :  { %v4569_v45 = vadd.f32 %v5172_v43, %v4528_v41 }
 0x625   :  { %v5174_v46 = vpop.f32.mrf.mxu0 }
 0x626   :  { %4575 = vst [vmem:[#allocation17] sm:$0xff] %v4569_v45  ;;  %v5175_v48 = vadd.f32 %v5174_v46, %v5173_v44 }
 0x628   :  { %v4572_v47 = vadd.f32 %v5175_v48, %v4531_v0 }
 0x62a   :  { %4576 = vst [vmem:[#allocation17 + $0x8] sm:$0xff] %v4572_v47 }
 0x62b   :  { %6165 = shalt.err (!%p6162_p7)
}
 0x62c   :  { %4588 = dma.vmem_to_hbm [thread:$0]  %s4583_s1, 256, %s6462_s13, [#allocation4], %s6199_s0, %s6199_s0, %s6200_s27  }
 0x62d   :  { %6184 = dma.done.wait [#allocation4], 256  }
 0x62e   :  { %6185 = vsyncadd [#allocation4], 4294967040 }
 0x62f   :  { %4592 = vsyncpa [#allocation3], 1 }
 0x630   :  { %4593 = vsyncpa [#allocation6], 1 }
 0x631   :  { %4594 = vsyncpa [#allocation9], 1 }
 0x632   :  { %4595 = vsyncpa [#allocation12], 1 }
 0x633   :  { %4596 = vsyncpa [#allocation15], 1 }
 0x634   :  { %4597 = vsyncpa [#allocation4], 1 }

// kernel: tpu_custom_call.1
= control target key start
LH: loop header
LB: loop body
LE: loop exit
PB: predicated region body
PF: predicated region fallthrough
CT: control target
= control target key end

     0   :  { %18 = vsyncpa [#allocation3], 0  ;;  %s6449_s0 = inlined_call_operand.hbm [shape: bf16[16,128], index: 0, kind: input, shape index: {}]   ;;  %s6450_s1 = inlined_call_operand.hbm [shape: bf16[128,768], index: 1, kind: input, shape index: {}]   ;;  %s6451_s2 = inlined_call_operand.hbm [shape: bf16[1,768], index: 2, kind: input, shape index: {}]   ;;  %s6452_s3 = inlined_call_operand.hbm [shape: bf16[768,512], index: 3, kind: input, shape index: {}]   ;;  %s6453_s4 = inlined_call_operand.vmem [shape: bf16[1,512], index: 4, kind: input, shape index: {}]   ;;  %s6454_s5 = inlined_call_operand.hbm [shape: bf16[512,256], index: 5, kind: input, shape index: {}]   ;;  %s6455_s6 = inlined_call_operand.hbm [shape: bf16[1,256], index: 6, kind: input, shape index: {}]   ;;  %s6456_s7 = inlined_call_operand.hbm [shape: bf16[256,512], index: 7, kind: input, shape index: {}]   ;;  %s6457_s8 = inlined_call_operand.vmem [shape: bf16[1,512], index: 8, kind: input, shape index: {}]   ;;  %s6458_s9 = inlined_call_operand.hbm [shape: bf16[512,512], index: 9, kind: input, shape index: {}]   ;;  %s6459_s10 = inlined_call_operand.vmem [shape: bf16[1,512], index: 10, kind: input, shape index: {}]   ;;  %s6460_s11 = inlined_call_operand.hbm [shape: bf16[512,128], index: 11, kind: input, shape index: {}]   ;;  %s6461_s12 = inlined_call_operand.vmem [shape: f32[1,128], index: 12, kind: input, shape index: {}]   ;;  %s6462_s13 = inlined_call_operand.hbm [shape: f32[16,128], index: 13, kind: output, shape index: {}]  }
   0x1   :  { %19 = vsyncpa [#allocation6], 0 }
   0x2   :  { %20 = vsyncpa [#allocation9], 0 }
   0x3   :  { %21 = vsyncpa [#allocation12], 0 }
   0x4   :  { %22 = vsyncpa [#allocation15], 0 }
   0x5   :  { %23 = vsyncpa [#allocation4], 0  ;;  %s6186_s25 = smov [#allocation5]  }
   0x6   :  { %s41_s26 = sshll.u32 %s6186_s25, 4  ;;  %s42_s26 = int_to_ptr.vmem [resolvable:$true] %s41_s26 }
   0x7   :  { %s5982_s27 = scalar_lea.vmem %s42_s26, 6144  ;;  %p5987_p1 = scmp.lt.s32.totalorder %s42_s26, %s42_s26 }
   0x8   :  { %p5983_p0 = scmp.ne.s32.totalorder %s42_s26, %s5982_s27  ;;  %p5988_p2 = scmp.lt.s32.totalorder %s5982_s27, %s5982_s27 }
   0xa   :  { %p5989_p3 = por %p5988_p2, %p5987_p1 }
   0xc   :  { %p5990_p4 = pnand %p5989_p3, %p5983_p0 }
   0xe   :  { %5993 = shalt.err (!%p5990_p4)
}
   0xf   :  { %s6187_s28 = smov 384   ;;  %s6188_s29 = smov 24  }
  0x10   :  { %47 = dma.hbm_to_vmem [thread:$0]  %s6450_s1, 6144, %s42_s26, [#allocation6], %s6187_s28, %s6187_s28, %s6188_s29  }
  0x11   :  { %s6189_s15 = smov [#allocation8]  }
  0x12   :  { %s63_s16 = sshll.u32 %s6189_s15, 4  ;;  %s64_s16 = int_to_ptr.vmem [resolvable:$true] %s63_s16 }
  0x13   :  { %s6002_s17 = scalar_lea.vmem %s64_s16, 24576  ;;  %p6007_p6 = scmp.lt.s32.totalorder %s64_s16, %s64_s16 }
  0x14   :  { %p6003_p5 = scmp.ne.s32.totalorder %s64_s16, %s6002_s17  ;;  %p6008_p7 = scmp.lt.s32.totalorder %s6002_s17, %s6002_s17 }
  0x16   :  { %p6009_p8 = por %p6008_p7, %p6007_p6 }
  0x18   :  { %p6010_p9 = pnand %p6009_p8, %p6003_p5 }
  0x1a   :  { %6013 = shalt.err (!%p6010_p9)
}
  0x1b   :  { %s6190_s18 = smov 256   ;;  %s6191_s19 = smov 16  }
  0x1c   :  { %69 = dma.hbm_to_vmem [thread:$0]  %s6452_s3, 24576, %s64_s16, [#allocation9], %s6190_s18, %s6190_s18, %s6191_s19  }
  0x1d   :  { %s6192_s1 = smov [#allocation11]   ;;  %s6193_s23 = smov [#allocation14]  }
  0x1e   :  { %s90_s22 = sshll.u32 %s6192_s1, 4  ;;  %s113_s24 = sshll.u32 %s6193_s23, 4  ;;  %s91_s22 = int_to_ptr.vmem [resolvable:$true] %s90_s22  ;;  %s114_s24 = int_to_ptr.vmem [resolvable:$true] %s113_s24 }
  0x1f   :  { %s6022_s25 = scalar_lea.vmem %s91_s22, 32  ;;  %p6027_p11 = scmp.lt.s32.totalorder %s91_s22, %s91_s22 }
  0x20   :  { %p6023_p10 = scmp.ne.s32.totalorder %s91_s22, %s6022_s25  ;;  %p6028_p12 = scmp.lt.s32.totalorder %s6022_s25, %s6022_s25 }
  0x22   :  { %p6029_p13 = por %p6028_p12, %p6027_p11 }
  0x24   :  { %p6030_p0 = pnand %p6029_p13, %p6023_p10 }
  0x26   :  { %6033 = shalt.err (!%p6030_p0)
}
  0x27   :  { %93 = dma.hbm_to_vmem [thread:$0]  %s6455_s6, 32, %s91_s22, [#allocation12]  }
  0x28   :  { %s6042_s28 = scalar_lea.vmem %s114_s24, 16384  ;;  %p6047_p2 = scmp.lt.s32.totalorder %s114_s24, %s114_s24 }
  0x29   :  { %p6043_p1 = scmp.ne.s32.totalorder %s114_s24, %s6042_s28  ;;  %p6048_p3 = scmp.lt.s32.totalorder %s6042_s28, %s6042_s28 }
  0x2b   :  { %p6049_p4 = por %p6048_p3, %p6047_p2 }
  0x2d   :  { %p6050_p5 = pnand %p6049_p4, %p6043_p1 }
  0x2f   :  { %6053 = shalt.err (!%p6050_p5)
}
  0x30   :  { %119 = dma.hbm_to_vmem [thread:$0]  %s6458_s9, 16384, %s114_s24, [#allocation15], %s6190_s18, %s6190_s18, %s6191_s19  }
  0x31   :  { %s6194_s30 = smov [#allocation2]  }
  0x32   :  { %s29_s14 = sshll.u32 %s6194_s30, 4  ;;  %s30_s14 = int_to_ptr.vmem [resolvable:$true] %s29_s14 }
  0x33   :  { %s6062_s15 = scalar_lea.vmem %s30_s14, 128  ;;  %p6067_p7 = scmp.lt.s32.totalorder %s30_s14, %s30_s14 }
  0x34   :  { %p6063_p6 = scmp.ne.s32.totalorder %s30_s14, %s6062_s15  ;;  %p6068_p8 = scmp.lt.s32.totalorder %s6062_s15, %s6062_s15 }
  0x36   :  { %p6069_p9 = por %p6068_p8, %p6067_p7 }
  0x38   :  { %p6070_p10 = pnand %p6069_p9, %p6063_p6 }
  0x3a   :  { %6073 = shalt.err (!%p6070_p10)
}
  0x3b   :  { %s6195_s6 = smov 64   ;;  %s6196_s16 = smov 4  }
  0x3c   :  { %35 = dma.hbm_to_vmem [thread:$0]  %s6449_s0, 128, %s30_s14, [#allocation3], %s6195_s6, %s6195_s6, %s6196_s16  }
  0x3d   :  { %s6197_s9 = smov [#allocation7]   ;;  %s6198_s1 = smov [#allocation10]  }
  0x3e   :  { %s54_s21 = sshll.u32 %s6197_s9, 4  ;;  %s77_s22 = sshll.u32 %s6198_s1, 4  ;;  %s55_s21 = int_to_ptr.vmem [resolvable:$true] %s54_s21  ;;  %s78_s22 = int_to_ptr.vmem [resolvable:$true] %s77_s22 }
  0x3f   :  { %s6082_s23 = scalar_lea.vmem %s55_s21, 96  ;;  %p6087_p12 = scmp.lt.s32.totalorder %s55_s21, %s55_s21 }
  0x40   :  { %p6083_p11 = scmp.ne.s32.totalorder %s55_s21, %s6082_s23  ;;  %p6088_p13 = scmp.lt.s32.totalorder %s6082_s23, %s6082_s23 }
  0x42   :  { %p6089_p0 = por %p6088_p13, %p6087_p12 }
  0x44   :  { %p6090_p1 = pnand %p6089_p0, %p6083_p11 }
  0x46   :  { %6093 = shalt.err (!%p6090_p1)
}
  0x47   :  { %57 = dma.hbm_to_vmem [thread:$0]  %s6451_s2, 96, %s55_s21, [#allocation6]  }
  0x48   :  { %s6102_s26 = scalar_lea.vmem %s78_s22, 8192  ;;  %p6107_p3 = scmp.lt.s32.totalorder %s78_s22, %s78_s22 }
  0x49   :  { %p6103_p2 = scmp.ne.s32.totalorder %s78_s22, %s6102_s26  ;;  %p6108_p4 = scmp.lt.s32.totalorder %s6102_s26, %s6102_s26 }
  0x4b   :  { %p6109_p5 = por %p6108_p4, %p6107_p3 }
  0x4d   :  { %p6110_p6 = pnand %p6109_p5, %p6103_p2 }
  0x4f   :  { %6113 = shalt.err (!%p6110_p6)
}
  0x50   :  { %s6199_s0 = smov 128   ;;  %s6200_s27 = smov 8  }
  0x51   :  { %83 = dma.hbm_to_vmem [thread:$0]  %s6454_s5, 8192, %s78_s22, [#allocation9], %s6199_s0, %s6199_s0, %s6200_s27  }
  0x52   :  { %s6201_s29 = smov [#allocation13]   ;;  %s6202_s2 = smov [#allocation16]  }
  0x53   :  { %s99_s30 = sshll.u32 %s6201_s29, 4  ;;  %s127_s14 = sshll.u32 %s6202_s2, 4  ;;  %s100_s30 = int_to_ptr.vmem [resolvable:$true] %s99_s30  ;;  %s128_s14 = int_to_ptr.vmem [resolvable:$true] %s127_s14 }
  0x54   :  { %s6122_s15 = scalar_lea.vmem %s100_s30, 8192  ;;  %p6127_p8 = scmp.lt.s32.totalorder %s100_s30, %s100_s30 }
  0x55   :  { %p6123_p7 = scmp.ne.s32.totalorder %s100_s30, %s6122_s15  ;;  %p6128_p9 = scmp.lt.s32.totalorder %s6122_s15, %s6122_s15 }
  0x57   :  { %p6129_p10 = por %p6128_p9, %p6127_p8 }
  0x59   :  { %p6130_p11 = pnand %p6129_p10, %p6123_p7 }
  0x5b   :  { %6133 = shalt.err (!%p6130_p11)
}
  0x5c   :  { %105 = dma.hbm_to_vmem [thread:$0]  %s6456_s7, 8192, %s100_s30, [#allocation12], %s6190_s18, %s6190_s18, %s6191_s19  }
  0x5d   :  { %s6142_s5 = scalar_lea.vmem %s128_s14, 4096  ;;  %p6147_p13 = scmp.lt.s32.totalorder %s128_s14, %s128_s14 }
  0x5e   :  { %p6143_p12 = scmp.ne.s32.totalorder %s128_s14, %s6142_s5  ;;  %p6148_p0 = scmp.lt.s32.totalorder %s6142_s5, %s6142_s5 }
  0x60   :  { %p6149_p1 = por %p6148_p0, %p6147_p13 }
  0x62   :  { %p6150_p2 = pnand %p6149_p1, %p6143_p12 }
  0x64   :  { %6153 = shalt.err (!%p6150_p2)
}
  0x65   :  { %133 = dma.hbm_to_vmem [thread:$0]  %s6460_s11, 4096, %s128_s14, [#allocation15], %s6195_s6, %s6195_s6, %s6196_s16  }
  0x66   :  { %6174 = dma.done.wait [#allocation3], 128  }
  0x67   :  { %6175 = vsyncadd [#allocation3], 4294967168 }
  0x68   :  { %6176 = dma.done.wait [#allocation6], 6240  }
  0x69   :  { %6177 = vsyncadd [#allocation6], 4294961056 }
  0x6a   :  { %6178 = dma.done.wait [#allocation9], 32768  }
  0x6b   :  { %6179 = vsyncadd [#allocation9], 4294934528 }
  0x6c   :  { %6180 = dma.done.wait [#allocation12], 8224  }
  0x6d   :  { %6181 = vsyncadd [#allocation12], 4294959072 }
  0x6e   :  { %6182 = dma.done.wait [#allocation15], 20480  }
  0x6f   :  { %6183 = vsyncadd [#allocation15], 4294946816  ;;  %v6203_v0 = vmov 0   ;;  %v5196_v1 = vld [vmem:[#allocation5 + $0x154] ss:$24 sps:$4 sm:$0xff]   ;;  %v6323_v34 = vld [vmem:[#allocation2] sm:$0xff]  }
  0x70   :  { %492 = vmatprep.mubr.bf16.mxu0 %v6203_v0  ;;  %535 = vmatprep.mubr.bf16.mxu1 %v6203_v0  ;;  %v5198_v2 = vld [vmem:[#allocation5 + $0x15c] ss:$24 sps:$4 sm:$0xff]   ;;  %v5200_v3 = vld [vmem:[#allocation5 + $0x150] ss:$24 sps:$4 sm:$0xff]   ;;  %v5204_v6 = vld [vmem:[#allocation5 + $0x12c] ss:$24 sps:$4 sm:$0xff]  }
  0x71   :  { %460 = vmatprep.subr.bf16.mxu0 %v5196_v1  ;;  %v5201_v4 = vld [vmem:[#allocation5 + $0x158] ss:$24 sps:$4 sm:$0xff]   ;;  %503 = vmatprep.subr.bf16.mxu1 %v5198_v2  ;;  %v5202_v5 = vld [vmem:[#allocation5 + $0x124] ss:$24 sps:$4 sm:$0xff]   ;;  %v5207_v8 = vld [vmem:[#allocation5 + $0x128] ss:$24 sps:$4 sm:$0xff]  }
  0x72   :  { %461 = vmatpush1.bf16.msra.mxu0 %v5200_v3  ;;  %504 = vmatpush1.bf16.msra.mxu1 %v5201_v4  ;;  %v5206_v7 = vld [vmem:[#allocation5 + $0x120] ss:$24 sps:$4 sm:$0xff]   ;;  %v5208_v9 = vld [vmem:[#allocation5 + $0xf4] ss:$24 sps:$4 sm:$0xff]   ;;  %v5212_v11 = vld [vmem:[#allocation5 + $0xf0] ss:$24 sps:$4 sm:$0xff]  }
  0x73   :  { %462 = vmatprep.subr.bf16.mxu0 %v5202_v5  ;;  %505 = vmatprep.subr.bf16.mxu1 %v5204_v6  ;;  %v5210_v10 = vld [vmem:[#allocation5 + $0xfc] ss:$24 sps:$4 sm:$0xff]   ;;  %v5213_v12 = vld [vmem:[#allocation5 + $0xf8] ss:$24 sps:$4 sm:$0xff]   ;;  %v5216_v14 = vld [vmem:[#allocation5 + $0xcc] ss:$24 sps:$4 sm:$0xff]  }
  0x74   :  { %v5214_v13 = vld [vmem:[#allocation5 + $0xc4] ss:$24 sps:$4 sm:$0xff]   ;;  %v5218_v15 = vld [vmem:[#allocation5 + $0xc0] ss:$24 sps:$4 sm:$0xff]   ;;  %v5220_v17 = vld [vmem:[#allocation5 + $0x94] ss:$24 sps:$4 sm:$0xff]  }
  0x75   :  { %v5219_v16 = vld [vmem:[#allocation5 + $0xc8] ss:$24 sps:$4 sm:$0xff]   ;;  %v5222_v18 = vld [vmem:[#allocation5 + $0x9c] ss:$24 sps:$4 sm:$0xff]   ;;  %v5225_v20 = vld [vmem:[#allocation5 + $0x98] ss:$24 sps:$4 sm:$0xff]  }
  0x76   :  { %463 = vmatpush1.bf16.msra.mxu0 %v5206_v7  ;;  %506 = vmatpush1.bf16.msra.mxu1 %v5207_v8  ;;  %v5224_v19 = vld [vmem:[#allocation5 + $0x90] ss:$24 sps:$4 sm:$0xff]   ;;  %v5226_v21 = vld [vmem:[#allocation5 + $0x64] ss:$24 sps:$4 sm:$0xff]   ;;  %v5230_v23 = vld [vmem:[#allocation5 + $0x60] ss:$24 sps:$4 sm:$0xff]  }
  0x77   :  { %464 = vmatprep.subr.bf16.mxu0 %v5208_v9  ;;  %507 = vmatprep.subr.bf16.mxu1 %v5210_v10  ;;  %v5228_v22 = vld [vmem:[#allocation5 + $0x6c] ss:$24 sps:$4 sm:$0xff]   ;;  %v5231_v24 = vld [vmem:[#allocation5 + $0x68] ss:$24 sps:$4 sm:$0xff]   ;;  %v5234_v26 = vld [vmem:[#allocation5 + $0x3c] ss:$24 sps:$4 sm:$0xff]  }
  0x78   :  { %v5232_v25 = vld [vmem:[#allocation5 + $0x34] ss:$24 sps:$4 sm:$0xff]   ;;  %v5236_v27 = vld [vmem:[#allocation5 + $0x30] ss:$24 sps:$4 sm:$0xff]   ;;  %v5238_v29 = vld [vmem:[#allocation5 + $0x4] ss:$24 sps:$4 sm:$0xff]  }
  0x79   :  { %v5237_v28 = vld [vmem:[#allocation5 + $0x38] ss:$24 sps:$4 sm:$0xff]   ;;  %v5240_v30 = vld [vmem:[#allocation5 + $0xc] ss:$24 sps:$4 sm:$0xff]   ;;  %v5243_v32 = vld [vmem:[#allocation5 + $0x8] ss:$24 sps:$4 sm:$0xff]  }
  0x7a   :  { %465 = vmatpush1.bf16.msra.mxu0 %v5212_v11  ;;  %508 = vmatpush1.bf16.msra.mxu1 %v5213_v12  ;;  %v5242_v31 = vld [vmem:[#allocation5] ss:$24 sps:$4 sm:$0xff]   ;;  %v5247_v33 = vld [vmem:[#allocation5 + $0x164] ss:$24 sps:$4 sm:$0xff]   ;;  %v5250_v36 = vld [vmem:[#allocation5 + $0x134] ss:$24 sps:$4 sm:$0xff]  }
  0x7b   :  { %466 = vmatprep.subr.bf16.mxu0 %v5214_v13  ;;  %509 = vmatprep.subr.bf16.mxu1 %v5216_v14  ;;  %v5245_v35 = vld [vmem:[#allocation5 + $0x160] ss:$24 sps:$4 sm:$0xff]   ;;  %v5248_v39 = vld [vmem:[#allocation5 + $0x130] ss:$24 sps:$4 sm:$0xff]   ;;  %v5253_v41 = vld [vmem:[#allocation5 + $0x104] ss:$24 sps:$4 sm:$0xff]  }
  0x7c   :  { %v5269_v37 = vld [vmem:[#allocation8 + $0xe0] ss:$16 sps:$4 sm:$0xff]   ;;  %v5271_v38 = vld [vmem:[#allocation8 + $0xe4] ss:$16 sps:$4 sm:$0xff]   ;;  %s6205_s16 = smov [#allocation17]  }
  0x7d   :  { %v5277_v40 = vld [vmem:[#allocation8 + $0xc4] ss:$16 sps:$4 sm:$0xff]   ;;  %v5275_v42 = vld [vmem:[#allocation8 + $0xc0] ss:$16 sps:$4 sm:$0xff]   ;;  %s4582_s1 = sshll.u32 %s6205_s16, 4  ;;  %s4583_s1 = int_to_ptr.vmem [resolvable:$true] %s4582_s1 }
  0x7e   :  { %467 = vmatpush1.bf16.msra.mxu0 %v5218_v15  ;;  %510 = vmatpush1.bf16.msra.mxu1 %v5219_v16  ;;  %v5283_v43 = vld [vmem:[#allocation8 + $0xa4] ss:$16 sps:$4 sm:$0xff]   ;;  %v5281_v46 = vld [vmem:[#allocation8 + $0xa0] ss:$16 sps:$4 sm:$0xff]   ;;  %s6154_s22 = scalar_lea.vmem %s4583_s1, 256  ;;  %p6159_p4 = scmp.lt.s32.totalorder %s4583_s1, %s4583_s1 }
  0x7f   :  { %468 = vmatprep.subr.bf16.mxu0 %v5220_v17  ;;  %511 = vmatprep.subr.bf16.mxu1 %v5222_v18  ;;  %v5251_v44 = vld [vmem:[#allocation5 + $0x100] ss:$24 sps:$4 sm:$0xff]   ;;  %v5256_v45 = vld [vmem:[#allocation5 + $0xd4] ss:$24 sps:$4 sm:$0xff]   ;;  %v5254_v48 = vld [vmem:[#allocation5 + $0xd0] ss:$24 sps:$4 sm:$0xff]   ;;  %p6155_p3 = scmp.ne.s32.totalorder %s4583_s1, %s6154_s22  ;;  %p6160_p5 = scmp.lt.s32.totalorder %s6154_s22, %s6154_s22 }
  0x80   :  { %v5289_v47 = vld [vmem:[#allocation8 + $0x84] ss:$16 sps:$4 sm:$0xff]   ;;  %v5287_v50 = vld [vmem:[#allocation8 + $0x80] ss:$16 sps:$4 sm:$0xff]  }
  0x81   :  { %v5259_v49 = vld [vmem:[#allocation5 + $0xa4] ss:$24 sps:$4 sm:$0xff]   ;;  %v5257_v52 = vld [vmem:[#allocation5 + $0xa0] ss:$24 sps:$4 sm:$0xff]   ;;  %v5262_v53 = vld [vmem:[#allocation5 + $0x74] ss:$24 sps:$4 sm:$0xff]   ;;  %p6161_p6 = por %p6160_p5, %p6159_p4 }
  0x82   :  { %469 = vmatpush1.bf16.msra.mxu0 %v5224_v19  ;;  %512 = vmatpush1.bf16.msra.mxu1 %v5225_v20  ;;  %v5295_v51 = vld [vmem:[#allocation8 + $0x64] ss:$16 sps:$4 sm:$0xff]   ;;  %v5293_v54 = vld [vmem:[#allocation8 + $0x60] ss:$16 sps:$4 sm:$0xff]  }
  0x83   :  { %470 = vmatprep.subr.bf16.mxu0 %v5226_v21  ;;  %513 = vmatprep.subr.bf16.mxu1 %v5228_v22  ;;  %v5301_v55 = vld [vmem:[#allocation8 + $0x44] ss:$16 sps:$4 sm:$0xff]   ;;  %v5299_v58 = vld [vmem:[#allocation8 + $0x40] ss:$16 sps:$4 sm:$0xff]   ;;  %p6162_p7 = pnand %p6161_p6, %p6155_p3 }
  0x84   :  { %v5260_v56 = vld [vmem:[#allocation5 + $0x70] ss:$24 sps:$4 sm:$0xff]   ;;  %v5265_v57 = vld [vmem:[#allocation5 + $0x44] ss:$24 sps:$4 sm:$0xff]   ;;  %v5263_v60 = vld [vmem:[#allocation5 + $0x40] ss:$24 sps:$4 sm:$0xff]  }
  0x85   :  { %v5307_v59 = vld [vmem:[#allocation8 + $0x24] ss:$16 sps:$4 sm:$0xff]   ;;  %v5305_v62 = vld [vmem:[#allocation8 + $0x20] ss:$16 sps:$4 sm:$0xff]  }
  0x86   :  { %471 = vmatpush1.bf16.msra.mxu0 %v5230_v23  ;;  %514 = vmatpush1.bf16.msra.mxu1 %v5231_v24  ;;  %v5268_v61 = vld [vmem:[#allocation5 + $0x14] ss:$24 sps:$4 sm:$0xff]   ;;  %v5266_v1 = vld [vmem:[#allocation5 + $0x10] ss:$24 sps:$4 sm:$0xff]  }
  0x87   :  { %472 = vmatprep.subr.bf16.mxu0 %v5232_v25  ;;  %515 = vmatprep.subr.bf16.mxu1 %v5234_v26  ;;  %v5313_v63 = vld [vmem:[#allocation8 + $0x4] ss:$16 sps:$4 sm:$0xff]   ;;  %v5311_v3 = vld [vmem:[#allocation8] ss:$16 sps:$4 sm:$0xff]  }
  0x88   :  { %v5274_v2 = vld [vmem:[#allocation8 + $0x2e4] ss:$16 sps:$4 sm:$0xff]   ;;  %v5272_v5 = vld [vmem:[#allocation8 + $0x2e0] ss:$16 sps:$4 sm:$0xff]  }
  0x89   :  { %v5319_v4 = vld [vmem:[#allocation8 + $0x1e4] ss:$16 sps:$4 sm:$0xff]   ;;  %v5278_v7 = vld [vmem:[#allocation8 + $0x2c0] ss:$16 sps:$4 sm:$0xff]  }
  0x8a   :  { %473 = vmatpush1.bf16.msra.mxu0 %v5236_v27  ;;  %516 = vmatpush1.bf16.msra.mxu1 %v5237_v28  ;;  %v5280_v6 = vld [vmem:[#allocation8 + $0x2c4] ss:$16 sps:$4 sm:$0xff]   ;;  %v5317_v8 = vld [vmem:[#allocation8 + $0x1e0] ss:$16 sps:$4 sm:$0xff]  }
  0x8b   :  { %474 = vmatprep.subr.bf16.mxu0 %v5238_v29  ;;  %517 = vmatprep.subr.bf16.mxu1 %v5240_v30  ;;  %v5286_v9 = vld [vmem:[#allocation8 + $0x2a4] ss:$16 sps:$4 sm:$0xff]   ;;  %v5323_v11 = vld [vmem:[#allocation8 + $0x1c0] ss:$16 sps:$4 sm:$0xff]  }
  0x8c   :  { %v5325_v10 = vld [vmem:[#allocation8 + $0x1c4] ss:$16 sps:$4 sm:$0xff]   ;;  %v5284_v13 = vld [vmem:[#allocation8 + $0x2a0] ss:$16 sps:$4 sm:$0xff]  }
  0x8d   :  { %v5331_v12 = vld [vmem:[#allocation8 + $0x1a4] ss:$16 sps:$4 sm:$0xff]   ;;  %v5329_v15 = vld [vmem:[#allocation8 + $0x1a0] ss:$16 sps:$4 sm:$0xff]  }
  0x8e   :  { %475 = vmatpush1.bf16.msra.mxu0 %v5242_v31  ;;  %518 = vmatpush1.bf16.msra.mxu1 %v5243_v32  ;;  %v5292_v14 = vld [vmem:[#allocation8 + $0x284] ss:$16 sps:$4 sm:$0xff]   ;;  %v5290_v17 = vld [vmem:[#allocation8 + $0x280] ss:$16 sps:$4 sm:$0xff]  }
  0x8f   :  { %546 = vmatprep.subr.bf16.mxu0 %v5247_v33  ;;  %1850 = vmatprep.subr.bf16.mxu1 %v5271_v38  ;;  %v5337_v16 = vld [vmem:[#allocation8 + $0x184] ss:$16 sps:$4 sm:$0xff]   ;;  %v5335_v19 = vld [vmem:[#allocation8 + $0x180] ss:$16 sps:$4 sm:$0xff]  }
  0x90   :  { %v5298_v18 = vld [vmem:[#allocation8 + $0x264] ss:$16 sps:$4 sm:$0xff]   ;;  %v5296_v21 = vld [vmem:[#allocation8 + $0x260] ss:$16 sps:$4 sm:$0xff]  }
  0x91   :  { %493 = vmatmul.mubr.bf16.vlgmr.msra.gmra.mxu0 %v6323_v34  ;;  %536 = vmatmul.mubr.bf16.vlgmr.msra.gmra.mxu1 %v6323_v34  ;;  %v5343_v20 = vld [vmem:[#allocation8 + $0x164] ss:$16 sps:$4 sm:$0xff]   ;;  %v5341_v23 = vld [vmem:[#allocation8 + $0x160] ss:$16 sps:$4 sm:$0xff]  }
  0x92   :  { %547 = vmatpush1.bf16.msra.mxu0 %v5245_v35  ;;  %578 = vmatprep.mubr.bf16.mxu0 %v6203_v0  ;;  %v5304_v22 = vld [vmem:[#allocation8 + $0x244] ss:$16 sps:$4 sm:$0xff]   ;;  %v5302_v24 = vld [vmem:[#allocation8 + $0x240] ss:$16 sps:$4 sm:$0xff]  }
  0x93   :  { %548 = vmatprep.subr.bf16.mxu0 %v5250_v36  ;;  %1851 = vmatpush1.bf16.msra.mxu1 %v5269_v37  ;;  %v5310_v25 = vld [vmem:[#allocation8 + $0x224] ss:$16 sps:$4 sm:$0xff]   ;;  %v5308_v26 = vld [vmem:[#allocation8 + $0x220] ss:$16 sps:$4 sm:$0xff]  }
  0x94   :  { %1852 = vmatprep.subr.bf16.mxu1 %v5277_v40  ;;  %v5316_v27 = vld [vmem:[#allocation8 + $0x204] ss:$16 sps:$4 sm:$0xff]   ;;  %v5314_v28 = vld [vmem:[#allocation8 + $0x200] ss:$16 sps:$4 sm:$0xff]  }
  0x95   :  { %v5322_v29 = vld [vmem:[#allocation8 + $0x3e4] ss:$16 sps:$4 sm:$0xff]   ;;  %v5320_v30 = vld [vmem:[#allocation8 + $0x3e0] ss:$16 sps:$4 sm:$0xff]  }
  0x96   :  { %549 = vmatpush1.bf16.msra.mxu0 %v5248_v39  ;;  %v5328_v31 = vld [vmem:[#allocation8 + $0x3c4] ss:$16 sps:$4 sm:$0xff]   ;;  %v5326_v32 = vld [vmem:[#allocation8 + $0x3c0] ss:$16 sps:$4 sm:$0xff]  }
  0x97   :  { %550 = vmatprep.subr.bf16.mxu0 %v5253_v41  ;;  %1853 = vmatpush1.bf16.msra.mxu1 %v5275_v42  ;;  %v5349_v33 = vld [vmem:[#allocation8 + $0x144] ss:$16 sps:$4 sm:$0xff]   ;;  %v5347_v35 = vld [vmem:[#allocation8 + $0x140] ss:$16 sps:$4 sm:$0xff]  }
  0x98   :  { %1854 = vmatprep.subr.bf16.mxu1 %v5283_v43  ;;  %v5332_v36 = vld [vmem:[#allocation8 + $0x3a0] ss:$16 sps:$4 sm:$0xff]   ;;  %v5355_v37 = vld [vmem:[#allocation8 + $0x124] ss:$16 sps:$4 sm:$0xff]  }
  0x99   :  { %v5340_v38 = vld [vmem:[#allocation8 + $0x384] ss:$16 sps:$4 sm:$0xff]   ;;  %v5353_v39 = vld [vmem:[#allocation8 + $0x120] ss:$16 sps:$4 sm:$0xff]  }
  0x9a   :  { %551 = vmatpush1.bf16.msra.mxu0 %v5251_v44  ;;  %v5338_v40 = vld [vmem:[#allocation8 + $0x380] ss:$16 sps:$4 sm:$0xff]   ;;  %v5361_v41 = vld [vmem:[#allocation8 + $0x104] ss:$16 sps:$4 sm:$0xff]  }
  0x9b   :  { %552 = vmatprep.subr.bf16.mxu0 %v5256_v45  ;;  %1855 = vmatpush1.bf16.msra.mxu1 %v5281_v46  ;;  %v5346_v42 = vld [vmem:[#allocation8 + $0x364] ss:$16 sps:$4 sm:$0xff]   ;;  %v5359_v43 = vld [vmem:[#allocation8 + $0x100] ss:$16 sps:$4 sm:$0xff]  }
  0x9c   :  { %1856 = vmatprep.subr.bf16.mxu1 %v5289_v47  ;;  %v5367_v44 = vld [vmem:[#allocation8 + $0x4e4] ss:$16 sps:$4 sm:$0xff]   ;;  %v5344_v45 = vld [vmem:[#allocation8 + $0x360] ss:$16 sps:$4 sm:$0xff]  }
  0x9d   :  { %v5352_v46 = vld [vmem:[#allocation8 + $0x344] ss:$16 sps:$4 sm:$0xff]   ;;  %v5350_v47 = vld [vmem:[#allocation8 + $0x340] ss:$16 sps:$4 sm:$0xff]  }
  0x9e   :  { %553 = vmatpush1.bf16.msra.mxu0 %v5254_v48  ;;  %v5358_v48 = vld [vmem:[#allocation8 + $0x324] ss:$16 sps:$4 sm:$0xff]  }
  0x9f   :  { %554 = vmatprep.subr.bf16.mxu0 %v5259_v49  ;;  %1857 = vmatpush1.bf16.msra.mxu1 %v5287_v50  ;;  %v5356_v49 = vld [vmem:[#allocation8 + $0x320] ss:$16 sps:$4 sm:$0xff]   ;;  %v5364_v50 = vld [vmem:[#allocation8 + $0x304] ss:$16 sps:$4 sm:$0xff]  }
  0xa0   :  { %1858 = vmatprep.subr.bf16.mxu1 %v5295_v51  ;;  %v5362_v51 = vld [vmem:[#allocation8 + $0x300] ss:$16 sps:$4 sm:$0xff]  }
  0xa2   :  { %555 = vmatpush1.bf16.msra.mxu0 %v5257_v52  ;;  %v5370_v52 = vld [vmem:[#allocation8 + $0xec] ss:$16 sps:$4 sm:$0xff]  }
  0xa3   :  { %556 = vmatprep.subr.bf16.mxu0 %v5262_v53  ;;  %1859 = vmatpush1.bf16.msra.mxu1 %v5293_v54  ;;  %v6204_v53 = vmov 1966171168  }
  0xa4   :  { %1860 = vmatprep.subr.bf16.mxu1 %v5301_v55  ;;  %v599_v54 = vunpack.c.l.s4 %v6204_v53  ;;  %v601_v55 = vlaneseq  ;;  %v5397_v53 = vld [vmem:[#allocation8 + $0x444] ss:$16 sps:$4 sm:$0xff]  }
  0xa6   :  { %557 = vmatpush1.bf16.msra.mxu0 %v5260_v56  ;;  %v600_v56 = vunpack.c.0.s8 %v599_v54  ;;  %v5400_v54 = vld [vmem:[#allocation8 + $0x4c] ss:$16 sps:$4 sm:$0xff]  }
  0xa7   :  { %558 = vmatprep.subr.bf16.mxu0 %v5265_v57  ;;  %1861 = vmatpush1.bf16.msra.mxu1 %v5299_v58  ;;  %v602_v57 = vshrl.u32 %v601_v55, 7  ;;  %v6329_v58 = vld [vmem:[#allocation7] sm:$0x3f]  ;;  %v5395_v55 = vld [vmem:[#allocation8 + $0x440] ss:$16 sps:$4 sm:$0xff]  }
  0xa8   :  { %1862 = vmatprep.subr.bf16.mxu1 %v5307_v59 }
  0xa9   :  { %v6331_v59 = vsub.s32 %v600_v56, %v602_v57  ;;  %v5398_v56 = vld [vmem:[#allocation8 + $0x48] ss:$16 sps:$4 sm:$0xff]  }
  0xaa   :  { %559 = vmatpush1.bf16.msra.mxu0 %v5263_v60 }
  0xab   :  { %560 = vmatprep.subr.bf16.mxu0 %v5268_v61  ;;  %1863 = vmatpush1.bf16.msra.mxu1 %v5305_v62  ;;  %v604_v60 = vrot.slane %v6329_v58, %v6331_v59 }
  0xac   :  { %1864 = vmatprep.subr.bf16.mxu1 %v5313_v63 }
  0xad   :  { %v612_v61 = vcombine.high %v604_v60, %v604_v60  ;;  %v620_v62 = vrot.slane %v604_v60, %v6331_v59  ;;  %v5406_v60 = vld [vmem:[#allocation8 + $0x2c] ss:$16 sps:$4 sm:$0xff]  }
  0xae   :  { %561 = vmatpush1.bf16.msra.mxu0 %v5266_v1 }
  0xaf   :  { %1893 = vmatprep.subr.bf16.mxu0 %v5274_v2  ;;  %1865 = vmatpush1.bf16.msra.mxu1 %v5311_v3  ;;  %v634_v63 = vrot.slane %v612_v61, %v6331_v59  ;;  %v642_v1 = vcombine.high %v620_v62, %v620_v62 }
  0xb0   :  { %1866 = vmatprep.subr.bf16.mxu1 %v5319_v4 }
  0xb1   :  { %579 = vmatmul.mubr.bf16.vlgmr.msra.gmra.mxu0 %v6323_v34  ;;  %v5334_v34 = vld [vmem:[#allocation8 + $0x3a4] ss:$16 sps:$4 sm:$0xff]   ;;  %v643_v2 = vcombine.high %v634_v63, %v634_v63 }
  0xb2   :  { %1894 = vmatpush1.bf16.msra.mxu0 %v5272_v5  ;;  %v645_v5 = vpack.i.b16 %v620_v62, %v620_v62  ;;  %v5401_v62 = vld [vmem:[#allocation8 + $0x420] ss:$16 sps:$4 sm:$0xff]  }
  0xb3   :  { %1895 = vmatprep.subr.bf16.mxu0 %v5280_v6  ;;  %1867 = vmatpush2.bf16.msra.mxu1 %v5317_v8  ;;  %v6337_v6 = vsub.s32 0, %v602_v57  ;;  %v652_v8 = vpack.i.b16 %v634_v63, %v634_v63  ;;  %v5404_v63 = vld [vmem:[#allocation8 + $0x28] ss:$16 sps:$4 sm:$0xff]  }
  0xb4   :  { %1868 = vmatprep.subr.bf16.mxu1 %v5325_v10 }
  0xb6   :  { %1896 = vmatpush1.bf16.msra.mxu0 %v5278_v7  ;;  %v659_v7 = vpack.i.b16 %v642_v1, %v642_v1 }
  0xb7   :  { %1897 = vmatprep.subr.bf16.mxu0 %v5286_v9  ;;  %1869 = vmatpush2.bf16.msra.mxu1 %v5323_v11  ;;  %v666_v9 = vpack.i.b16 %v643_v2, %v643_v2  ;;  %v5409_v2 = vld [vmem:[#allocation8 + $0x404] ss:$16 sps:$4 sm:$0xff]  }
  0xb8   :  { %1870 = vmatprep.subr.bf16.mxu1 %v5331_v12 }
  0xba   :  { %1898 = vmatpush1.bf16.msra.mxu0 %v5284_v13  ;;  %v650_v13 = vrot.slane %v645_v5, %v6337_v6 }
  0xbb   :  { %1899 = vmatprep.subr.bf16.mxu0 %v5292_v14  ;;  %1871 = vmatpush2.bf16.msra.mxu1 %v5329_v15  ;;  %v664_v15 = vrot.slane %v659_v7, %v6337_v6  ;;  %v5407_v7 = vld [vmem:[#allocation8 + $0x400] ss:$16 sps:$4 sm:$0xff]  }
  0xbc   :  { %1872 = vmatprep.subr.bf16.mxu1 %v5337_v16 }
  0xbe   :  { %1900 = vmatpush1.bf16.msra.mxu0 %v5290_v17 }
  0xbf   :  { %1901 = vmatprep.subr.bf16.mxu0 %v5298_v18  ;;  %1873 = vmatpush2.bf16.msra.mxu1 %v5335_v19  ;;  %v657_v18 = vrot.slane %v652_v8, %v6337_v6  ;;  %v671_v19 = vrot.slane %v666_v9, %v6337_v6  ;;  %v5410_v8 = vld [vmem:[#allocation8 + $0x8] ss:$16 sps:$4 sm:$0xff]  }
  0xc0   :  { %1874 = vmatprep.subr.bf16.mxu1 %v5343_v20 }
  0xc2   :  { %1902 = vmatpush1.bf16.msra.mxu0 %v5296_v21 }
  0xc3   :  { %1903 = vmatprep.subr.bf16.mxu0 %v5304_v22  ;;  %1875 = vmatpush2.bf16.msra.mxu1 %v5341_v23 }
  0xc4   :  { %1876 = vmatprep.subr.bf16.mxu1 %v5349_v33  ;;  %v5376_v33 = vld [vmem:[#allocation8 + $0xcc] ss:$16 sps:$4 sm:$0xff]  }
  0xc6   :  { %1904 = vmatpush1.bf16.msra.mxu0 %v5302_v24 }
  0xc7   :  { %1905 = vmatprep.subr.bf16.mxu0 %v5310_v25  ;;  %1877 = vmatpush2.bf16.msra.mxu1 %v5347_v35 }
  0xc8   :  { %1878 = vmatprep.subr.bf16.mxu1 %v5355_v37  ;;  %v5374_v37 = vld [vmem:[#allocation8 + $0xc8] ss:$16 sps:$4 sm:$0xff]  }
  0xca   :  { %1906 = vmatpush1.bf16.msra.mxu0 %v5308_v26 }
  0xcb   :  { %1907 = vmatprep.subr.bf16.mxu0 %v5316_v27  ;;  %1879 = vmatpush2.bf16.msra.mxu1 %v5353_v39  ;;  %v5382_v39 = vld [vmem:[#allocation8 + $0xac] ss:$16 sps:$4 sm:$0xff]  }
  0xcc   :  { %1880 = vmatprep.subr.bf16.mxu1 %v5361_v41  ;;  %v5380_v41 = vld [vmem:[#allocation8 + $0xa8] ss:$16 sps:$4 sm:$0xff]  }
  0xce   :  { %1908 = vmatpush1.bf16.msra.mxu0 %v5314_v28  ;;  %v5365_v28 = vld [vmem:[#allocation8 + $0x4e0] ss:$16 sps:$4 sm:$0xff]  }
  0xcf   :  { %1909 = vmatprep.subr.bf16.mxu0 %v5322_v29  ;;  %1881 = vmatpush2.bf16.msra.mxu1 %v5359_v43  ;;  %v5368_v29 = vld [vmem:[#allocation8 + $0xe8] ss:$16 sps:$4 sm:$0xff]   ;;  %v5385_v43 = vld [vmem:[#allocation8 + $0x484] ss:$16 sps:$4 sm:$0xff]  }
  0xd0   :  { %1936 = vmatprep.subr.bf16.mxu1 %v5367_v44  ;;  %v5388_v44 = vld [vmem:[#allocation8 + $0x8c] ss:$16 sps:$4 sm:$0xff]  }
  0xd2   :  { %1910 = vmatpush2.bf16.msra.mxu0 %v5320_v30  ;;  %v5373_v30 = vld [vmem:[#allocation8 + $0x4c4] ss:$16 sps:$4 sm:$0xff]  }
  0xd3   :  { %1911 = vmatprep.subr.bf16.mxu0 %v5328_v31 }
  0xd6   :  { %1912 = vmatpush2.bf16.msra.mxu0 %v5326_v32 }
  0xd7   :  { %1913 = vmatprep.subr.bf16.mxu0 %v5334_v34 }
  0xda   :  { %1914 = vmatpush2.bf16.msra.mxu0 %v5332_v36  ;;  %v5371_v36 = vld [vmem:[#allocation8 + $0x4c0] ss:$16 sps:$4 sm:$0xff]  }
  0xdb   :  { %1915 = vmatprep.subr.bf16.mxu0 %v5340_v38  ;;  %v5379_v38 = vld [vmem:[#allocation8 + $0x4a4] ss:$16 sps:$4 sm:$0xff]  }
  0xde   :  { %1916 = vmatpush2.bf16.msra.mxu0 %v5338_v40  ;;  %v5377_v40 = vld [vmem:[#allocation8 + $0x4a0] ss:$16 sps:$4 sm:$0xff]  }
  0xdf   :  { %1917 = vmatprep.subr.bf16.mxu0 %v5346_v42  ;;  %v597_v42 = vcombine.high %v6329_v58, %v6329_v58  ;;  %v5403_v58 = vld [vmem:[#allocation8 + $0x424] ss:$16 sps:$4 sm:$0xff]  }
  0xe2   :  { %1918 = vmatpush2.bf16.msra.mxu0 %v5344_v45  ;;  %v5383_v45 = vld [vmem:[#allocation8 + $0x480] ss:$16 sps:$4 sm:$0xff]  }
  0xe3   :  { %1919 = vmatprep.subr.bf16.mxu0 %v5352_v46  ;;  %v5386_v46 = vld [vmem:[#allocation8 + $0x88] ss:$16 sps:$4 sm:$0xff]  }
  0xe6   :  { %1920 = vmatpush2.bf16.msra.mxu0 %v5350_v47  ;;  %v6359_v47 = vrot.slane %v597_v42, %v6331_v59 }
  0xe7   :  { %1921 = vmatprep.subr.bf16.mxu0 %v5358_v48  ;;  %v5391_v48 = vld [vmem:[#allocation8 + $0x464] ss:$16 sps:$4 sm:$0xff]  }
  0xea   :  { %1922 = vmatpush2.bf16.msra.mxu0 %v5356_v49  ;;  %v5394_v49 = vld [vmem:[#allocation8 + $0x6c] ss:$16 sps:$4 sm:$0xff]  }
  0xeb   :  { %1923 = vmatprep.subr.bf16.mxu0 %v5364_v50  ;;  %v5389_v50 = vld [vmem:[#allocation8 + $0x460] ss:$16 sps:$4 sm:$0xff]  }
  0xee   :  { %1924 = vmatpush2.bf16.msra.mxu0 %v5362_v51  ;;  %v5392_v51 = vld [vmem:[#allocation8 + $0x68] ss:$16 sps:$4 sm:$0xff]  }
  0xef   :  { %1979 = vmatprep.subr.bf16.mxu0 %v5370_v52  ;;  %v613_v52 = vcombine.high %v6359_v47, %v6359_v47 }
  0xf1   :  { %v641_v57 = vrot.slane %v613_v52, %v6331_v59  ;;  %v5459_v52 = vld [vmem:[#allocation8 + $0x108] ss:$16 sps:$4 sm:$0xff]  }
  0xf3   :  { %v680_v1 = vpack.i.b16 %v641_v57, %v641_v57 }
  0xf5   :  { %v685_v9 = vrot.slane %v680_v1, %v6337_v6  ;;  %v5476_v1 = vld [vmem:[#allocation8 + $0x2ac] ss:$16 sps:$4 sm:$0xff]  }
 0x151   :  { %v494_v3 = vpop.f32.mrf.mxu0  ;;  %v537_v4 = vpop.f32.mrf.mxu1 }
 0x153   :  { %v496_v10 = vpop.f32.mrf.mxu0  ;;  %v539_v11 = vpop.f32.mrf.mxu1 }
 0x155   :  { %v498_v12 = vpop.f32.mrf.mxu0  ;;  %v541_v14 = vpop.f32.mrf.mxu1 }
 0x156   :  { %v589_v16 = vpack.c.bf16 %v498_v12, %v494_v3  ;;  %v591_v17 = vpack.c.bf16 %v541_v14, %v537_v4  ;;  %v5412_v3 = vld [vmem:[#allocation8 + $0xc] ss:$16 sps:$4 sm:$0xff]  }
 0x157   :  { %v500_v20 = vpop.f32.mrf.mxu0  ;;  %v543_v21 = vpop.f32.mrf.mxu1 }
 0x158   :  { %v590_v22 = vpack.c.bf16 %v500_v20, %v496_v10  ;;  %v592_v23 = vpack.c.bf16 %v543_v21, %v539_v11  ;;  %v686_v24 = vadd.bf16 %v650_v13, %v589_v16  ;;  %v688_v25 = vadd.bf16 %v664_v15, %v591_v17  ;;  %v5415_v10 = vld [vmem:[#allocation8 + $0x5e4] ss:$16 sps:$4 sm:$0xff]   ;;  %v5418_v11 = vld [vmem:[#allocation8 + $0x1ec] ss:$16 sps:$4 sm:$0xff]   ;;  %v5413_v15 = vld [vmem:[#allocation8 + $0x5e0] ss:$16 sps:$4 sm:$0xff]  }
 0x159   :  { %v5416_v16 = vld [vmem:[#allocation8 + $0x1e8] ss:$16 sps:$4 sm:$0xff]   ;;  %v5419_v20 = vld [vmem:[#allocation8 + $0x5c0] ss:$16 sps:$4 sm:$0xff]  }
 0x15a   :  { %v687_v26 = vadd.bf16 %v657_v18, %v590_v22  ;;  %v689_v27 = vadd.bf16 %v671_v19, %v592_v23  ;;  %v6348_v34 = vmax.bf16 %v6203_v0, %v686_v24  ;;  %v6351_v35 = vmax.bf16 %v6203_v0, %v688_v25  ;;  %v5421_v18 = vld [vmem:[#allocation8 + $0x5c4] ss:$16 sps:$4 sm:$0xff]   ;;  %v5424_v19 = vld [vmem:[#allocation8 + $0x1cc] ss:$16 sps:$4 sm:$0xff]   ;;  %v5422_v21 = vld [vmem:[#allocation8 + $0x1c8] ss:$16 sps:$4 sm:$0xff]  }
 0x15b   :  { %v5427_v22 = vld [vmem:[#allocation8 + $0x5a4] ss:$16 sps:$4 sm:$0xff]   ;;  %v5430_v23 = vld [vmem:[#allocation8 + $0x1ac] ss:$16 sps:$4 sm:$0xff]   ;;  %v5425_v24 = vld [vmem:[#allocation8 + $0x5a0] ss:$16 sps:$4 sm:$0xff]  }
 0x15c   :  { %v693_v31 = vmax.bf16 %v6203_v0, %v687_v26  ;;  %v6345_v32 = vmax.bf16 %v6203_v0, %v689_v27  ;;  %v5428_v25 = vld [vmem:[#allocation8 + $0x1a8] ss:$16 sps:$4 sm:$0xff]   ;;  %v5433_v26 = vld [vmem:[#allocation8 + $0x584] ss:$16 sps:$4 sm:$0xff]   ;;  %v5436_v27 = vld [vmem:[#allocation8 + $0x18c] ss:$16 sps:$4 sm:$0xff]  }
 0x15e   :  { %1882 = vmatprep.mubr.bf16.mxu1 %v693_v31  ;;  %1925 = vmatprep.mubr.bf16.mxu0 %v6345_v32 }
 0x15f   :  { %1883 = vmatmul.mubr.bf16.vlgmr.msra.gmra.mxu1 %v6348_v34  ;;  %1926 = vmatmul.mubr.bf16.vlgmr.msra.gmra.mxu0 %v6351_v35 }
 0x160   :  { %1937 = vmatpush1.bf16.msra.mxu1 %v5365_v28  ;;  %1980 = vmatpush1.bf16.msra.mxu0 %v5368_v29  ;;  %v5431_v28 = vld [vmem:[#allocation8 + $0x580] ss:$16 sps:$4 sm:$0xff]   ;;  %v5434_v29 = vld [vmem:[#allocation8 + $0x188] ss:$16 sps:$4 sm:$0xff]  }
 0x161   :  { %2011 = vmatprep.mubr.bf16.mxu0 %v693_v31  ;;  %1938 = vmatprep.subr.bf16.mxu1 %v5373_v30  ;;  %v5439_v30 = vld [vmem:[#allocation8 + $0x564] ss:$16 sps:$4 sm:$0xff]   ;;  %v5442_v31 = vld [vmem:[#allocation8 + $0x16c] ss:$16 sps:$4 sm:$0xff]  }
 0x162   :  { %1981 = vmatprep.subr.bf16.mxu0 %v5376_v33  ;;  %v5437_v33 = vld [vmem:[#allocation8 + $0x560] ss:$16 sps:$4 sm:$0xff]  }
 0x164   :  { %1939 = vmatpush1.bf16.msra.mxu1 %v5371_v36  ;;  %1982 = vmatpush1.bf16.msra.mxu0 %v5374_v37  ;;  %v5440_v36 = vld [vmem:[#allocation8 + $0x168] ss:$16 sps:$4 sm:$0xff]   ;;  %v627_v37 = vrot.slane %v6359_v47, %v6331_v59 }
 0x165   :  { %1940 = vmatprep.subr.bf16.mxu1 %v5379_v38  ;;  %1983 = vmatprep.subr.bf16.mxu0 %v5382_v39  ;;  %v5446_v38 = vld [vmem:[#allocation8 + $0x544] ss:$16 sps:$4 sm:$0xff]   ;;  %v5449_v39 = vld [vmem:[#allocation8 + $0x14c] ss:$16 sps:$4 sm:$0xff]  }
 0x166   :  { %v673_v42 = vpack.i.b16 %v627_v37, %v627_v37  ;;  %v5522_v37 = vld [vmem:[#allocation8 + $0x3a8] ss:$16 sps:$4 sm:$0xff]  }
 0x168   :  { %1941 = vmatpush1.bf16.msra.mxu1 %v5377_v40  ;;  %1984 = vmatpush1.bf16.msra.mxu0 %v5380_v41  ;;  %v5444_v40 = vld [vmem:[#allocation8 + $0x540] ss:$16 sps:$4 sm:$0xff]   ;;  %v5447_v41 = vld [vmem:[#allocation8 + $0x148] ss:$16 sps:$4 sm:$0xff]   ;;  %v678_v47 = vrot.slane %v673_v42, %v6337_v6 }
 0x169   :  { %1942 = vmatprep.subr.bf16.mxu1 %v5385_v43  ;;  %1985 = vmatprep.subr.bf16.mxu0 %v5388_v44  ;;  %v5452_v43 = vld [vmem:[#allocation8 + $0x524] ss:$16 sps:$4 sm:$0xff]   ;;  %v5455_v44 = vld [vmem:[#allocation8 + $0x12c] ss:$16 sps:$4 sm:$0xff]   ;;  %v5531_v42 = vld [vmem:[#allocation8 + $0x588] ss:$16 sps:$4 sm:$0xff]  }
 0x16c   :  { %1943 = vmatpush1.bf16.msra.mxu1 %v5383_v45  ;;  %1986 = vmatpush1.bf16.msra.mxu0 %v5386_v46  ;;  %v5450_v45 = vld [vmem:[#allocation8 + $0x520] ss:$16 sps:$4 sm:$0xff]   ;;  %v5453_v46 = vld [vmem:[#allocation8 + $0x128] ss:$16 sps:$4 sm:$0xff]  }
 0x16d   :  { %1944 = vmatprep.subr.bf16.mxu1 %v5391_v48  ;;  %1987 = vmatprep.subr.bf16.mxu0 %v5394_v49  ;;  %v5458_v49 = vld [vmem:[#allocation8 + $0x504] ss:$16 sps:$4 sm:$0xff]  }
 0x170   :  { %1945 = vmatpush1.bf16.msra.mxu1 %v5389_v50  ;;  %1988 = vmatpush1.bf16.msra.mxu0 %v5392_v51  ;;  %v5461_v50 = vld [vmem:[#allocation8 + $0x10c] ss:$16 sps:$4 sm:$0xff]   ;;  %v5456_v51 = vld [vmem:[#allocation8 + $0x500] ss:$16 sps:$4 sm:$0xff]  }
 0x171   :  { %1946 = vmatprep.subr.bf16.mxu1 %v5397_v53  ;;  %1989 = vmatprep.subr.bf16.mxu0 %v5400_v54  ;;  %v6364_v61 = vpop.f32.mrf.mxu0  ;;  %v5464_v54 = vld [vmem:[#allocation8 + $0x2ec] ss:$16 sps:$4 sm:$0xff]  }
 0x173   :  { %v582_v4 = vpop.f32.mrf.mxu0 }
 0x174   :  { %1947 = vmatpush1.bf16.msra.mxu1 %v5395_v55  ;;  %1990 = vmatpush1.bf16.msra.mxu0 %v5398_v56  ;;  %v5467_v55 = vld [vmem:[#allocation8 + $0x4ec] ss:$16 sps:$4 sm:$0xff]   ;;  %v5462_v56 = vld [vmem:[#allocation8 + $0x2e8] ss:$16 sps:$4 sm:$0xff]  }
 0x175   :  { %1948 = vmatprep.subr.bf16.mxu1 %v5403_v58  ;;  %1991 = vmatprep.subr.bf16.mxu0 %v5406_v60  ;;  %v6366_v5 = vpop.f32.mrf.mxu0  ;;  %v5465_v58 = vld [vmem:[#allocation8 + $0x4e8] ss:$16 sps:$4 sm:$0xff]   ;;  %v5470_v60 = vld [vmem:[#allocation8 + $0x2cc] ss:$16 sps:$4 sm:$0xff]  }
 0x176   :  { %v593_v48 = vpack.c.bf16 %v6366_v5, %v6364_v61  ;;  %v5473_v61 = vld [vmem:[#allocation8 + $0x4cc] ss:$16 sps:$4 sm:$0xff]  }
 0x177   :  { %v586_v12 = vpop.f32.mrf.mxu0  ;;  %v5482_v5 = vld [vmem:[#allocation8 + $0x28c] ss:$16 sps:$4 sm:$0xff]  }
 0x178   :  { %1949 = vmatpush1.bf16.msra.mxu1 %v5401_v62  ;;  %1992 = vmatpush1.bf16.msra.mxu0 %v5404_v63  ;;  %v594_v13 = vpack.c.bf16 %v586_v12, %v582_v4  ;;  %v690_v53 = vadd.bf16 %v678_v47, %v593_v48  ;;  %v5468_v62 = vld [vmem:[#allocation8 + $0x2c8] ss:$16 sps:$4 sm:$0xff]   ;;  %v5494_v12 = vld [vmem:[#allocation8 + $0x24c] ss:$16 sps:$4 sm:$0xff]  }
 0x179   :  { %1950 = vmatprep.subr.bf16.mxu1 %v5409_v2  ;;  %1993 = vmatprep.subr.bf16.mxu0 %v5412_v3  ;;  %v5471_v63 = vld [vmem:[#allocation8 + $0x4c8] ss:$16 sps:$4 sm:$0xff]   ;;  %v5479_v2 = vld [vmem:[#allocation8 + $0x4ac] ss:$16 sps:$4 sm:$0xff]  }
 0x17a   :  { %v691_v14 = vadd.bf16 %v685_v9, %v594_v13  ;;  %v6379_v57 = vmax.bf16 %v6203_v0, %v690_v53  ;;  %v5474_v3 = vld [vmem:[#allocation8 + $0x2a8] ss:$16 sps:$4 sm:$0xff]   ;;  %v5491_v9 = vld [vmem:[#allocation8 + $0x46c] ss:$16 sps:$4 sm:$0xff]  }
 0x17b   :  { %v5477_v4 = vld [vmem:[#allocation8 + $0x4a8] ss:$16 sps:$4 sm:$0xff]   ;;  %v5497_v13 = vld [vmem:[#allocation8 + $0x44c] ss:$16 sps:$4 sm:$0xff]  }
 0x17c   :  { %1951 = vmatpush1.bf16.msra.mxu1 %v5407_v7  ;;  %1994 = vmatpush1.bf16.msra.mxu0 %v5410_v8  ;;  %v6370_v17 = vmax.bf16 %v6203_v0, %v691_v14  ;;  %v5480_v7 = vld [vmem:[#allocation8 + $0x288] ss:$16 sps:$4 sm:$0xff]   ;;  %v5488_v8 = vld [vmem:[#allocation8 + $0x26c] ss:$16 sps:$4 sm:$0xff]  }
 0x17d   :  { %1952 = vmatprep.subr.bf16.mxu1 %v5415_v10  ;;  %1995 = vmatprep.subr.bf16.mxu0 %v5418_v11  ;;  %v5486_v10 = vld [vmem:[#allocation8 + $0x268] ss:$16 sps:$4 sm:$0xff]   ;;  %v5542_v48 = vld [vmem:[#allocation8 + $0x34c] ss:$16 sps:$4 sm:$0xff]  }
 0x17e   :  { %1968 = vmatprep.mubr.bf16.mxu1 %v6370_v17  ;;  %v5489_v11 = vld [vmem:[#allocation8 + $0x468] ss:$16 sps:$4 sm:$0xff]   ;;  %v5545_v47 = vld [vmem:[#allocation8 + $0x54c] ss:$16 sps:$4 sm:$0xff]  }
 0x17f   :  { %v5492_v14 = vld [vmem:[#allocation8 + $0x248] ss:$16 sps:$4 sm:$0xff]  }
 0x180   :  { %1953 = vmatpush2.bf16.msra.mxu1 %v5413_v15  ;;  %1996 = vmatpush2.bf16.msra.mxu0 %v5416_v16  ;;  %v5495_v15 = vld [vmem:[#allocation8 + $0x448] ss:$16 sps:$4 sm:$0xff]   ;;  %v5500_v16 = vld [vmem:[#allocation8 + $0x22c] ss:$16 sps:$4 sm:$0xff]  }
 0x181   :  { %1954 = vmatprep.subr.bf16.mxu1 %v5421_v18  ;;  %1997 = vmatprep.subr.bf16.mxu0 %v5424_v19  ;;  %v5498_v18 = vld [vmem:[#allocation8 + $0x228] ss:$16 sps:$4 sm:$0xff]  }
 0x182   :  { %v5501_v19 = vld [vmem:[#allocation8 + $0x428] ss:$16 sps:$4 sm:$0xff]  }
 0x183   :  { %v5546_v53 = vld [vmem:[#allocation8 + $0x328] ss:$16 sps:$4 sm:$0xff]  }
 0x184   :  { %1955 = vmatpush2.bf16.msra.mxu1 %v5419_v20  ;;  %1998 = vmatpush2.bf16.msra.mxu0 %v5422_v21  ;;  %v5506_v20 = vld [vmem:[#allocation8 + $0x20c] ss:$16 sps:$4 sm:$0xff]  }
 0x185   :  { %1956 = vmatprep.subr.bf16.mxu1 %v5427_v22  ;;  %1999 = vmatprep.subr.bf16.mxu0 %v5430_v23  ;;  %v5509_v21 = vld [vmem:[#allocation8 + $0x40c] ss:$16 sps:$4 sm:$0xff]   ;;  %v5504_v22 = vld [vmem:[#allocation8 + $0x208] ss:$16 sps:$4 sm:$0xff]  }
 0x186   :  { %v5507_v23 = vld [vmem:[#allocation8 + $0x408] ss:$16 sps:$4 sm:$0xff]  }
 0x188   :  { %1957 = vmatpush2.bf16.msra.mxu1 %v5425_v24  ;;  %2000 = vmatpush2.bf16.msra.mxu0 %v5428_v25  ;;  %v5512_v24 = vld [vmem:[#allocation8 + $0x3ec] ss:$16 sps:$4 sm:$0xff]  }
 0x189   :  { %1958 = vmatprep.subr.bf16.mxu1 %v5433_v26  ;;  %2001 = vmatprep.subr.bf16.mxu0 %v5436_v27  ;;  %v5515_v25 = vld [vmem:[#allocation8 + $0x5ec] ss:$16 sps:$4 sm:$0xff]   ;;  %v5510_v26 = vld [vmem:[#allocation8 + $0x3e8] ss:$16 sps:$4 sm:$0xff]  }
 0x18a   :  { %v5513_v27 = vld [vmem:[#allocation8 + $0x5e8] ss:$16 sps:$4 sm:$0xff]  }
 0x18c   :  { %1959 = vmatpush2.bf16.msra.mxu1 %v5431_v28  ;;  %2002 = vmatpush2.bf16.msra.mxu0 %v5434_v29  ;;  %v5518_v28 = vld [vmem:[#allocation8 + $0x3cc] ss:$16 sps:$4 sm:$0xff]  }
 0x18d   :  { %1960 = vmatprep.subr.bf16.mxu1 %v5439_v30  ;;  %2003 = vmatprep.subr.bf16.mxu0 %v5442_v31  ;;  %v5521_v29 = vld [vmem:[#allocation8 + $0x5cc] ss:$16 sps:$4 sm:$0xff]   ;;  %v5516_v30 = vld [vmem:[#allocation8 + $0x3c8] ss:$16 sps:$4 sm:$0xff]  }
 0x18e   :  { %v5519_v31 = vld [vmem:[#allocation8 + $0x5c8] ss:$16 sps:$4 sm:$0xff]  }
 0x190   :  { %1961 = vmatpush2.bf16.msra.mxu1 %v5437_v33  ;;  %2004 = vmatpush2.bf16.msra.mxu0 %v5440_v36  ;;  %v5524_v33 = vld [vmem:[#allocation8 + $0x3ac] ss:$16 sps:$4 sm:$0xff]  }
 0x191   :  { %1962 = vmatprep.subr.bf16.mxu1 %v5446_v38  ;;  %2005 = vmatprep.subr.bf16.mxu0 %v5449_v39  ;;  %v5527_v36 = vld [vmem:[#allocation8 + $0x5ac] ss:$16 sps:$4 sm:$0xff]   ;;  %v5525_v38 = vld [vmem:[#allocation8 + $0x5a8] ss:$16 sps:$4 sm:$0xff]  }
 0x192   :  { %v5530_v39 = vld [vmem:[#allocation8 + $0x38c] ss:$16 sps:$4 sm:$0xff]  }
 0x194   :  { %1963 = vmatpush2.bf16.msra.mxu1 %v5444_v40  ;;  %2006 = vmatpush2.bf16.msra.mxu0 %v5447_v41  ;;  %v5533_v40 = vld [vmem:[#allocation8 + $0x58c] ss:$16 sps:$4 sm:$0xff]   ;;  %v5528_v41 = vld [vmem:[#allocation8 + $0x388] ss:$16 sps:$4 sm:$0xff]  }
 0x195   :  { %1964 = vmatprep.subr.bf16.mxu1 %v5452_v43  ;;  %2007 = vmatprep.subr.bf16.mxu0 %v5455_v44  ;;  %v5536_v43 = vld [vmem:[#allocation8 + $0x36c] ss:$16 sps:$4 sm:$0xff]  }
 0x196   :  { %v5539_v44 = vld [vmem:[#allocation8 + $0x56c] ss:$16 sps:$4 sm:$0xff]  }
 0x198   :  { %1965 = vmatpush2.bf16.msra.mxu1 %v5450_v45  ;;  %2008 = vmatpush2.bf16.msra.mxu0 %v5453_v46  ;;  %v5534_v45 = vld [vmem:[#allocation8 + $0x368] ss:$16 sps:$4 sm:$0xff]  }
 0x199   :  { %1966 = vmatprep.subr.bf16.mxu1 %v5458_v49  ;;  %2009 = vmatprep.subr.bf16.mxu0 %v5461_v50  ;;  %v5537_v46 = vld [vmem:[#allocation8 + $0x568] ss:$16 sps:$4 sm:$0xff]  }
 0x19a   :  { %v5540_v49 = vld [vmem:[#allocation8 + $0x348] ss:$16 sps:$4 sm:$0xff]  }
 0x19b   :  { %v5543_v50 = vld [vmem:[#allocation8 + $0x548] ss:$16 sps:$4 sm:$0xff]  }
 0x19c   :  { %1967 = vmatpush2.bf16.msra.mxu1 %v5456_v51  ;;  %2010 = vmatpush2.bf16.msra.mxu0 %v5459_v52  ;;  %v5548_v51 = vld [vmem:[#allocation8 + $0x32c] ss:$16 sps:$4 sm:$0xff]  }
 0x19d   :  { %2022 = vmatprep.subr.bf16.mxu1 %v5464_v54  ;;  %2065 = vmatprep.subr.bf16.mxu0 %v5467_v55  ;;  %v5551_v52 = vld [vmem:[#allocation8 + $0x52c] ss:$16 sps:$4 sm:$0xff]   ;;  %v5549_v54 = vld [vmem:[#allocation8 + $0x528] ss:$16 sps:$4 sm:$0xff]  }
 0x19e   :  { %v5554_v55 = vld [vmem:[#allocation8 + $0x30c] ss:$16 sps:$4 sm:$0xff]  }
 0x19f   :  { %1969 = vmatmul.mubr.bf16.vlgmr.msra.gmra.mxu1 %v6379_v57  ;;  %2012 = vmatmul.mubr.bf16.vlgmr.msra.gmra.mxu0 %v6348_v34  ;;  %v5485_v34 = vld [vmem:[#allocation8 + $0x48c] ss:$16 sps:$4 sm:$0xff]  }
 0x1a0   :  { %2023 = vmatpush1.bf16.msra.mxu1 %v5462_v56  ;;  %2054 = vmatprep.mubr.bf16.mxu1 %v6345_v32  ;;  %v5483_v32 = vld [vmem:[#allocation8 + $0x488] ss:$16 sps:$4 sm:$0xff]   ;;  %v5557_v56 = vld [vmem:[#allocation8 + $0x50c] ss:$16 sps:$4 sm:$0xff]  }
 0x1a1   :  { %2066 = vmatpush1.bf16.msra.mxu0 %v5465_v58  ;;  %2097 = vmatprep.mubr.bf16.mxu0 %v6370_v17  ;;  %v5503_v17 = vld [vmem:[#allocation8 + $0x42c] ss:$16 sps:$4 sm:$0xff]   ;;  %v5552_v58 = vld [vmem:[#allocation8 + $0x308] ss:$16 sps:$4 sm:$0xff]  }
 0x1a2   :  { %2024 = vmatprep.subr.bf16.mxu1 %v5470_v60  ;;  %2067 = vmatprep.subr.bf16.mxu0 %v5473_v61  ;;  %v5555_v60 = vld [vmem:[#allocation8 + $0x508] ss:$16 sps:$4 sm:$0xff]   ;;  %v5560_v61 = vld [vmem:[#allocation10 + $0x74] ss:$8 sps:$4 sm:$0xff]  }
 0x1a4   :  { %2025 = vmatpush1.bf16.msra.mxu1 %v5468_v62  ;;  %v5558_v62 = vld [vmem:[#allocation10 + $0x70] ss:$8 sps:$4 sm:$0xff]  }
 0x1a5   :  { %2068 = vmatpush1.bf16.msra.mxu0 %v5471_v63  ;;  %2026 = vmatprep.subr.bf16.mxu1 %v5476_v1  ;;  %v5563_v63 = vld [vmem:[#allocation10 + $0x64] ss:$8 sps:$4 sm:$0xff]   ;;  %v5561_v1 = vld [vmem:[#allocation10 + $0x60] ss:$8 sps:$4 sm:$0xff]  }
 0x1a6   :  { %2069 = vmatprep.subr.bf16.mxu0 %v5479_v2  ;;  %v5566_v2 = vld [vmem:[#allocation10 + $0x54] ss:$8 sps:$4 sm:$0xff]  }
 0x1a8   :  { %2027 = vmatpush1.bf16.msra.mxu1 %v5474_v3  ;;  %v5564_v3 = vld [vmem:[#allocation10 + $0x50] ss:$8 sps:$4 sm:$0xff]  }
 0x1a9   :  { %2070 = vmatpush1.bf16.msra.mxu0 %v5477_v4  ;;  %2028 = vmatprep.subr.bf16.mxu1 %v5482_v5  ;;  %v5569_v4 = vld [vmem:[#allocation10 + $0x44] ss:$8 sps:$4 sm:$0xff]   ;;  %v5567_v5 = vld [vmem:[#allocation10 + $0x40] ss:$8 sps:$4 sm:$0xff]  }
 0x1aa   :  { %2071 = vmatprep.subr.bf16.mxu0 %v5485_v34  ;;  %v5572_v34 = vld [vmem:[#allocation10 + $0x34] ss:$8 sps:$4 sm:$0xff]  }
 0x1ac   :  { %2029 = vmatpush1.bf16.msra.mxu1 %v5480_v7  ;;  %v5570_v7 = vld [vmem:[#allocation10 + $0x30] ss:$8 sps:$4 sm:$0xff]  }
 0x1ad   :  { %2072 = vmatpush1.bf16.msra.mxu0 %v5483_v32  ;;  %2030 = vmatprep.subr.bf16.mxu1 %v5488_v8  ;;  %v5575_v32 = vld [vmem:[#allocation10 + $0x24] ss:$8 sps:$4 sm:$0xff]   ;;  %v5606_v8 = vld [vmem:[#allocation10 + $0x170] ss:$8 sps:$4 sm:$0xff]  }
 0x1ae   :  { %2073 = vmatprep.subr.bf16.mxu0 %v5491_v9  ;;  %v5611_v9 = vld [vmem:[#allocation10 + $0x164] ss:$8 sps:$4 sm:$0xff]  }
 0x1b0   :  { %2031 = vmatpush1.bf16.msra.mxu1 %v5486_v10  ;;  %v5578_v10 = vld [vmem:[#allocation10 + $0x14] ss:$8 sps:$4 sm:$0xff]  }
 0x1b1   :  { %2074 = vmatpush1.bf16.msra.mxu0 %v5489_v11  ;;  %2032 = vmatprep.subr.bf16.mxu1 %v5494_v12  ;;  %v5609_v11 = vld [vmem:[#allocation10 + $0x160] ss:$8 sps:$4 sm:$0xff]   ;;  %v5614_v12 = vld [vmem:[#allocation10 + $0x154] ss:$8 sps:$4 sm:$0xff]  }
 0x1b2   :  { %2075 = vmatprep.subr.bf16.mxu0 %v5497_v13  ;;  %v5576_v13 = vld [vmem:[#allocation10 + $0x10] ss:$8 sps:$4 sm:$0xff]  }
 0x1b4   :  { %2033 = vmatpush1.bf16.msra.mxu1 %v5492_v14  ;;  %v5581_v14 = vld [vmem:[#allocation10 + $0x4] ss:$8 sps:$4 sm:$0xff]  }
 0x1b5   :  { %2076 = vmatpush1.bf16.msra.mxu0 %v5495_v15  ;;  %2034 = vmatprep.subr.bf16.mxu1 %v5500_v16  ;;  %v5612_v15 = vld [vmem:[#allocation10 + $0x150] ss:$8 sps:$4 sm:$0xff]   ;;  %v5617_v16 = vld [vmem:[#allocation10 + $0x144] ss:$8 sps:$4 sm:$0xff]  }
 0x1b6   :  { %2077 = vmatprep.subr.bf16.mxu0 %v5503_v17  ;;  %v5579_v17 = vld [vmem:[#allocation10] ss:$8 sps:$4 sm:$0xff]  }
 0x1b8   :  { %2035 = vmatpush1.bf16.msra.mxu1 %v5498_v18  ;;  %v5584_v18 = vld [vmem:[#allocation10 + $0xf4] ss:$8 sps:$4 sm:$0xff]  }
 0x1b9   :  { %2078 = vmatpush1.bf16.msra.mxu0 %v5501_v19  ;;  %2036 = vmatprep.subr.bf16.mxu1 %v5506_v20  ;;  %v5615_v19 = vld [vmem:[#allocation10 + $0x140] ss:$8 sps:$4 sm:$0xff]   ;;  %v5620_v20 = vld [vmem:[#allocation10 + $0x134] ss:$8 sps:$4 sm:$0xff]  }
 0x1ba   :  { %2079 = vmatprep.subr.bf16.mxu0 %v5509_v21  ;;  %v5582_v21 = vld [vmem:[#allocation10 + $0xf0] ss:$8 sps:$4 sm:$0xff]  }
 0x1bc   :  { %2037 = vmatpush1.bf16.msra.mxu1 %v5504_v22  ;;  %v5587_v22 = vld [vmem:[#allocation10 + $0xe4] ss:$8 sps:$4 sm:$0xff]  }
 0x1bd   :  { %2080 = vmatpush1.bf16.msra.mxu0 %v5507_v23  ;;  %2038 = vmatprep.subr.bf16.mxu1 %v5512_v24  ;;  %v5618_v23 = vld [vmem:[#allocation10 + $0x130] ss:$8 sps:$4 sm:$0xff]   ;;  %v5623_v24 = vld [vmem:[#allocation10 + $0x124] ss:$8 sps:$4 sm:$0xff]  }
 0x1be   :  { %2081 = vmatprep.subr.bf16.mxu0 %v5515_v25  ;;  %v5585_v25 = vld [vmem:[#allocation10 + $0xe0] ss:$8 sps:$4 sm:$0xff]  }
 0x1c0   :  { %2039 = vmatpush2.bf16.msra.mxu1 %v5510_v26  ;;  %v5590_v26 = vld [vmem:[#allocation10 + $0xd4] ss:$8 sps:$4 sm:$0xff]  }
 0x1c1   :  { %2082 = vmatpush2.bf16.msra.mxu0 %v5513_v27  ;;  %2040 = vmatprep.subr.bf16.mxu1 %v5518_v28  ;;  %v5621_v27 = vld [vmem:[#allocation10 + $0x120] ss:$8 sps:$4 sm:$0xff]   ;;  %v5626_v28 = vld [vmem:[#allocation10 + $0x114] ss:$8 sps:$4 sm:$0xff]  }
 0x1c2   :  { %2083 = vmatprep.subr.bf16.mxu0 %v5521_v29  ;;  %v5588_v29 = vld [vmem:[#allocation10 + $0xd0] ss:$8 sps:$4 sm:$0xff]  }
 0x1c4   :  { %2041 = vmatpush2.bf16.msra.mxu1 %v5516_v30  ;;  %v5593_v30 = vld [vmem:[#allocation10 + $0xc4] ss:$8 sps:$4 sm:$0xff]  }
 0x1c5   :  { %2084 = vmatpush2.bf16.msra.mxu0 %v5519_v31  ;;  %2042 = vmatprep.subr.bf16.mxu1 %v5524_v33  ;;  %v5624_v31 = vld [vmem:[#allocation10 + $0x110] ss:$8 sps:$4 sm:$0xff]   ;;  %v5629_v33 = vld [vmem:[#allocation10 + $0x104] ss:$8 sps:$4 sm:$0xff]  }
 0x1c6   :  { %2085 = vmatprep.subr.bf16.mxu0 %v5527_v36  ;;  %v5591_v36 = vld [vmem:[#allocation10 + $0xc0] ss:$8 sps:$4 sm:$0xff]  }
 0x1c8   :  { %2043 = vmatpush2.bf16.msra.mxu1 %v5522_v37  ;;  %v5596_v37 = vld [vmem:[#allocation10 + $0xb4] ss:$8 sps:$4 sm:$0xff]  }
 0x1c9   :  { %2086 = vmatpush2.bf16.msra.mxu0 %v5525_v38  ;;  %2044 = vmatprep.subr.bf16.mxu1 %v5530_v39  ;;  %v5627_v38 = vld [vmem:[#allocation10 + $0x100] ss:$8 sps:$4 sm:$0xff]   ;;  %v5632_v39 = vld [vmem:[#allocation10 + $0x1f4] ss:$8 sps:$4 sm:$0xff]  }
 0x1ca   :  { %2087 = vmatprep.subr.bf16.mxu0 %v5533_v40  ;;  %v5594_v40 = vld [vmem:[#allocation10 + $0xb0] ss:$8 sps:$4 sm:$0xff]  }
 0x1cc   :  { %2045 = vmatpush2.bf16.msra.mxu1 %v5528_v41  ;;  %v5599_v41 = vld [vmem:[#allocation10 + $0xa4] ss:$8 sps:$4 sm:$0xff]  }
 0x1cd   :  { %2088 = vmatpush2.bf16.msra.mxu0 %v5531_v42  ;;  %2046 = vmatprep.subr.bf16.mxu1 %v5536_v43  ;;  %v5630_v42 = vld [vmem:[#allocation10 + $0x1f0] ss:$8 sps:$4 sm:$0xff]   ;;  %v5635_v43 = vld [vmem:[#allocation10 + $0x1e4] ss:$8 sps:$4 sm:$0xff]  }
 0x1ce   :  { %2089 = vmatprep.subr.bf16.mxu0 %v5539_v44  ;;  %v5597_v44 = vld [vmem:[#allocation10 + $0xa0] ss:$8 sps:$4 sm:$0xff]  }
 0x1d0   :  { %2047 = vmatpush2.bf16.msra.mxu1 %v5534_v45  ;;  %v5602_v45 = vld [vmem:[#allocation10 + $0x94] ss:$8 sps:$4 sm:$0xff]  }
 0x1d1   :  { %2090 = vmatpush2.bf16.msra.mxu0 %v5537_v46  ;;  %2048 = vmatprep.subr.bf16.mxu1 %v5542_v48  ;;  %v5633_v46 = vld [vmem:[#allocation10 + $0x1e0] ss:$8 sps:$4 sm:$0xff]   ;;  %v5638_v48 = vld [vmem:[#allocation10 + $0x1d4] ss:$8 sps:$4 sm:$0xff]  }
 0x1d2   :  { %2091 = vmatprep.subr.bf16.mxu0 %v5545_v47  ;;  %v5600_v47 = vld [vmem:[#allocation10 + $0x90] ss:$8 sps:$4 sm:$0xff]  }
 0x1d4   :  { %2049 = vmatpush2.bf16.msra.mxu1 %v5540_v49  ;;  %v5605_v49 = vld [vmem:[#allocation10 + $0x84] ss:$8 sps:$4 sm:$0xff]  }
 0x1d5   :  { %2092 = vmatpush2.bf16.msra.mxu0 %v5543_v50  ;;  %2050 = vmatprep.subr.bf16.mxu1 %v5548_v51  ;;  %v5636_v50 = vld [vmem:[#allocation10 + $0x1d0] ss:$8 sps:$4 sm:$0xff]   ;;  %v5641_v51 = vld [vmem:[#allocation10 + $0x1c4] ss:$8 sps:$4 sm:$0xff]  }
 0x1d6   :  { %2093 = vmatprep.subr.bf16.mxu0 %v5551_v52  ;;  %v5603_v52 = vld [vmem:[#allocation10 + $0x80] ss:$8 sps:$4 sm:$0xff]  }
 0x1d8   :  { %2051 = vmatpush2.bf16.msra.mxu1 %v5546_v53  ;;  %v5639_v53 = vld [vmem:[#allocation10 + $0x1c0] ss:$8 sps:$4 sm:$0xff]  }
 0x1d9   :  { %2094 = vmatpush2.bf16.msra.mxu0 %v5549_v54  ;;  %2052 = vmatprep.subr.bf16.mxu1 %v5554_v55  ;;  %v5644_v54 = vld [vmem:[#allocation10 + $0x1b4] ss:$8 sps:$4 sm:$0xff]   ;;  %v5642_v55 = vld [vmem:[#allocation10 + $0x1b0] ss:$8 sps:$4 sm:$0xff]  }
 0x1da   :  { %2095 = vmatprep.subr.bf16.mxu0 %v5557_v56  ;;  %v5647_v56 = vld [vmem:[#allocation10 + $0x1a4] ss:$8 sps:$4 sm:$0xff]  }
 0x1dc   :  { %2053 = vmatpush2.bf16.msra.mxu1 %v5552_v58  ;;  %v5645_v58 = vld [vmem:[#allocation10 + $0x1a0] ss:$8 sps:$4 sm:$0xff]  }
 0x1dd   :  { %2096 = vmatpush2.bf16.msra.mxu0 %v5555_v60  ;;  %2558 = vmatprep.subr.bf16.mxu1 %v5560_v61  ;;  %v5650_v60 = vld [vmem:[#allocation10 + $0x194] ss:$8 sps:$4 sm:$0xff]   ;;  %v5648_v61 = vld [vmem:[#allocation10 + $0x190] ss:$8 sps:$4 sm:$0xff]  }
 0x1df   :  { %2055 = vmatmul.mubr.bf16.vlgmr.msra.gmra.mxu1 %v6351_v35  ;;  %v5608_v35 = vld [vmem:[#allocation10 + $0x174] ss:$8 sps:$4 sm:$0xff]  }
 0x1e0   :  { %2098 = vmatmul.mubr.bf16.vlgmr.msra.gmra.mxu0 %v6379_v57  ;;  %2559 = vmatpush1.bf16.msra.mxu1 %v5558_v62  ;;  %v5573_v57 = vld [vmem:[#allocation10 + $0x20] ss:$8 sps:$4 sm:$0xff]  }
 0x1e1   :  { %2560 = vmatprep.subr.bf16.mxu1 %v5563_v63  ;;  %2601 = vmatprep.subr.bf16.mxu0 %v5608_v35  ;;  %v5651_v62 = vld [vmem:[#allocation10 + $0x180] ss:$8 sps:$4 sm:$0xff]   ;;  %v5653_v63 = vld [vmem:[#allocation10 + $0x184] ss:$8 sps:$4 sm:$0xff]  }
 0x1e2   :  { %2602 = vmatpush1.bf16.msra.mxu0 %v5606_v8 }
 0x1e3   :  { %2603 = vmatprep.subr.bf16.mxu0 %v5611_v9 }
 0x1e4   :  { %2561 = vmatpush1.bf16.msra.mxu1 %v5561_v1 }
 0x1e5   :  { %2562 = vmatprep.subr.bf16.mxu1 %v5566_v2 }
 0x1e6   :  { %2604 = vmatpush1.bf16.msra.mxu0 %v5609_v11 }
 0x1e7   :  { %2605 = vmatprep.subr.bf16.mxu0 %v5614_v12 }
 0x1e8   :  { %2563 = vmatpush1.bf16.msra.mxu1 %v5564_v3 }
 0x1e9   :  { %2564 = vmatprep.subr.bf16.mxu1 %v5569_v4  ;;  %v4839_v4 = vld.sshfl [vmem:[%s6453_s4] sm:$0x33 pattern:$0x75316420] }
 0x1ea   :  { %2606 = vmatpush1.bf16.msra.mxu0 %v5612_v15  ;;  %v2128_v35 = vrot.slane %v4839_v4, %v6331_v59 }
 0x1eb   :  { %2607 = vmatprep.subr.bf16.mxu0 %v5617_v16 }
 0x1ec   :  { %2565 = vmatpush1.bf16.msra.mxu1 %v5567_v5  ;;  %v2139_v12 = vpack.i.b16 %v2128_v35, %v2128_v35 }
 0x1ed   :  { %2566 = vmatprep.subr.bf16.mxu1 %v5572_v34 }
 0x1ee   :  { %2608 = vmatpush1.bf16.msra.mxu0 %v5615_v19 }
 0x1ef   :  { %2609 = vmatprep.subr.bf16.mxu0 %v5620_v20 }
 0x1f0   :  { %2567 = vmatpush1.bf16.msra.mxu1 %v5570_v7  ;;  %v2121_v7 = vcombine.high %v4839_v4, %v4839_v4 }
 0x1f1   :  { %2568 = vmatprep.subr.bf16.mxu1 %v5575_v32 }
 0x1f2   :  { %2610 = vmatpush1.bf16.msra.mxu0 %v5618_v23 }
 0x1f3   :  { %2611 = vmatprep.subr.bf16.mxu0 %v5623_v24 }
 0x1f4   :  { %2569 = vmatpush1.bf16.msra.mxu1 %v5573_v57  ;;  %v2135_v57 = vrot.slane %v2121_v7, %v6331_v59  ;;  %v5656_v7 = vld [vmem:[#allocation13 + $0xe4] ss:$16 sps:$4 sm:$0xff]  }
 0x1f5   :  { %2570 = vmatprep.subr.bf16.mxu1 %v5578_v10 }
 0x1f6   :  { %2612 = vmatpush1.bf16.msra.mxu0 %v5621_v27  ;;  %v2146_v15 = vpack.i.b16 %v2135_v57, %v2135_v57 }
 0x1f7   :  { %2613 = vmatprep.subr.bf16.mxu0 %v5626_v28 }
 0x1f8   :  { %2571 = vmatpush1.bf16.msra.mxu1 %v5576_v13 }
 0x1f9   :  { %2572 = vmatprep.subr.bf16.mxu1 %v5581_v14 }
 0x1fa   :  { %2614 = vmatpush1.bf16.msra.mxu0 %v5624_v31 }
 0x1fb   :  { %2615 = vmatprep.subr.bf16.mxu0 %v5629_v33 }
 0x1fc   :  { %2573 = vmatpush1.bf16.msra.mxu1 %v5579_v17 }
 0x1fd   :  { %2574 = vmatprep.subr.bf16.mxu1 %v5584_v18 }
 0x1fe   :  { %2616 = vmatpush1.bf16.msra.mxu0 %v5627_v38 }
 0x1ff   :  { %2617 = vmatprep.subr.bf16.mxu0 %v5632_v39 }
 0x200   :  { %2575 = vmatpush2.bf16.msra.mxu1 %v5582_v21  ;;  %v2144_v21 = vrot.slane %v2139_v12, %v6337_v6  ;;  %v5671_v12 = vld [vmem:[#allocation13 + $0xac] ss:$16 sps:$4 sm:$0xff]  }
 0x201   :  { %2576 = vmatprep.subr.bf16.mxu1 %v5587_v22 }
 0x202   :  { %2618 = vmatpush2.bf16.msra.mxu0 %v5630_v42  ;;  %v2137_v42 = vcombine.high %v2135_v57, %v2135_v57  ;;  %v5665_v57 = vld [vmem:[#allocation13 + $0xcc] ss:$16 sps:$4 sm:$0xff]  }
 0x203   :  { %2619 = vmatprep.subr.bf16.mxu0 %v5635_v43 }
 0x204   :  { %2577 = vmatpush2.bf16.msra.mxu1 %v5585_v25 }
 0x205   :  { %2578 = vmatprep.subr.bf16.mxu1 %v5590_v26  ;;  %v2151_v26 = vrot.slane %v2146_v15, %v6337_v6  ;;  %v5674_v15 = vld [vmem:[#allocation13 + $0x84] ss:$16 sps:$4 sm:$0xff]  }
 0x206   :  { %2620 = vmatpush2.bf16.msra.mxu0 %v5633_v46 }
 0x207   :  { %2621 = vmatprep.subr.bf16.mxu0 %v5638_v48 }
 0x208   :  { %2579 = vmatpush2.bf16.msra.mxu1 %v5588_v29 }
 0x209   :  { %2580 = vmatprep.subr.bf16.mxu1 %v5593_v30 }
 0x20a   :  { %2622 = vmatpush2.bf16.msra.mxu0 %v5636_v50 }
 0x20b   :  { %2623 = vmatprep.subr.bf16.mxu0 %v5641_v51  ;;  %v2160_v51 = vpack.i.b16 %v2137_v42, %v2137_v42  ;;  %v5710_v42 = vld [vmem:[#allocation13 + $0x1c4] ss:$16 sps:$4 sm:$0xff]  }
 0x20c   :  { %2581 = vmatpush2.bf16.msra.mxu1 %v5591_v36 }
 0x20d   :  { %2582 = vmatprep.subr.bf16.mxu1 %v5596_v37 }
 0x20e   :  { %2624 = vmatpush2.bf16.msra.mxu0 %v5639_v53 }
 0x20f   :  { %2625 = vmatprep.subr.bf16.mxu0 %v5644_v54 }
 0x210   :  { %2583 = vmatpush2.bf16.msra.mxu1 %v5594_v40  ;;  %v2136_v40 = vcombine.high %v2128_v35, %v2128_v35  ;;  %v5662_v35 = vld [vmem:[#allocation13 + $0xc4] ss:$16 sps:$4 sm:$0xff]  }
 0x211   :  { %2584 = vmatprep.subr.bf16.mxu1 %v5599_v41 }
 0x212   :  { %2626 = vmatpush2.bf16.msra.mxu0 %v5642_v55  ;;  %v2153_v48 = vpack.i.b16 %v2136_v40, %v2136_v40  ;;  %v5702_v40 = vld [vmem:[#allocation13 + $0x1e0] ss:$16 sps:$4 sm:$0xff]  }
 0x213   :  { %2627 = vmatprep.subr.bf16.mxu0 %v5647_v56 }
 0x214   :  { %2585 = vmatpush2.bf16.msra.mxu1 %v5597_v44  ;;  %v2158_v56 = vrot.slane %v2153_v48, %v6337_v6  ;;  %v5719_v48 = vld [vmem:[#allocation13 + $0x1ac] ss:$16 sps:$4 sm:$0xff]  }
 0x215   :  { %2586 = vmatprep.subr.bf16.mxu1 %v5602_v45 }
 0x216   :  { %2628 = vmatpush2.bf16.msra.mxu0 %v5645_v58 }
 0x217   :  { %2629 = vmatprep.subr.bf16.mxu0 %v5650_v60 }
 0x218   :  { %2587 = vmatpush2.bf16.msra.mxu1 %v5600_v47 }
 0x219   :  { %2588 = vmatprep.subr.bf16.mxu1 %v5605_v49 }
 0x21a   :  { %2630 = vmatpush2.bf16.msra.mxu0 %v5648_v61 }
 0x21b   :  { %2631 = vmatprep.subr.bf16.mxu0 %v5653_v63  ;;  %v2165_v63 = vrot.slane %v2160_v51, %v6337_v6  ;;  %v5725_v51 = vld [vmem:[#allocation13 + $0x18c] ss:$16 sps:$4 sm:$0xff]  }
 0x21c   :  { %2589 = vmatpush2.bf16.msra.mxu1 %v5603_v52 }
 0x21d   :  { %3072 = vmatprep.subr.bf16.mxu1 %v5656_v7  ;;  %v5747_v7 = vld [vmem:[#allocation13 + $0x108] ss:$16 sps:$4 sm:$0xff]  }
 0x21e   :  { %2632 = vmatpush2.bf16.msra.mxu0 %v5651_v62 }
 0x21f   :  { %v1884_v1 = vpop.f32.mrf.mxu1  ;;  %v1927_v2 = vpop.f32.mrf.mxu0 }
 0x220   :  { %v1928_v13 = vadd.f32 %v1927_v2, %v1884_v1 }
 0x221   :  { %v1886_v3 = vpop.f32.mrf.mxu1  ;;  %v1929_v5 = vpop.f32.mrf.mxu0 }
 0x222   :  { %v1930_v17 = vadd.f32 %v1929_v5, %v1886_v3 }
 0x223   :  { %v1888_v34 = vpop.f32.mrf.mxu1  ;;  %v1931_v32 = vpop.f32.mrf.mxu0 }
 0x224   :  { %v1932_v14 = vadd.f32 %v1931_v32, %v1888_v34  ;;  %v5654_v34 = vld [vmem:[#allocation13 + $0xe0] ss:$16 sps:$4 sm:$0xff]   ;;  %v5657_v32 = vld [vmem:[#allocation13 + $0xe8] ss:$16 sps:$4 sm:$0xff]  }
 0x225   :  { %v1890_v8 = vpop.f32.mrf.mxu1  ;;  %v1933_v10 = vpop.f32.mrf.mxu0 }
 0x226   :  { %v1934_v18 = vadd.f32 %v1933_v10, %v1890_v8  ;;  %v5659_v8 = vld [vmem:[#allocation13 + $0xec] ss:$16 sps:$4 sm:$0xff]   ;;  %v5663_v10 = vld [vmem:[#allocation13 + $0xc8] ss:$16 sps:$4 sm:$0xff]  }
 0x227   :  { %3115 = vmatprep.subr.bf16.mxu0 %v5659_v8  ;;  %v5752_v8 = vld [vmem:[#allocation14 + $0xe4] ss:$16 sps:$4 sm:$0xff]  }
 0x25f   :  { %v1970_v9 = vpop.f32.mrf.mxu1  ;;  %v2013_v33 = vpop.f32.mrf.mxu0 }
 0x260   :  { %v1971_v19 = vadd.f32 %v1970_v9, %v1928_v13  ;;  %v5660_v9 = vld [vmem:[#allocation13 + $0xc0] ss:$16 sps:$4 sm:$0xff]  }
 0x261   :  { %v1972_v11 = vpop.f32.mrf.mxu1  ;;  %v2015_v36 = vpop.f32.mrf.mxu0  ;;  %v5666_v13 = vld [vmem:[#allocation13 + $0xa0] ss:$16 sps:$4 sm:$0xff]  }
 0x262   :  { %v1973_v23 = vadd.f32 %v1972_v11, %v1930_v17  ;;  %v5668_v11 = vld [vmem:[#allocation13 + $0xa4] ss:$16 sps:$4 sm:$0xff]   ;;  %v5672_v17 = vld [vmem:[#allocation13 + $0x80] ss:$16 sps:$4 sm:$0xff]  }
 0x263   :  { %v1974_v16 = vpop.f32.mrf.mxu1  ;;  %v2017_v37 = vpop.f32.mrf.mxu0 }
 0x264   :  { %v1975_v20 = vadd.f32 %v1974_v16, %v1932_v14  ;;  %v5669_v14 = vld [vmem:[#allocation13 + $0xa8] ss:$16 sps:$4 sm:$0xff]   ;;  %v5677_v16 = vld [vmem:[#allocation13 + $0x8c] ss:$16 sps:$4 sm:$0xff]  }
 0x265   :  { %v1976_v22 = vpop.f32.mrf.mxu1  ;;  %v2019_v38 = vpop.f32.mrf.mxu0 }
 0x266   :  { %v2108_v24 = vpack.c.bf16 %v1975_v20, %v1971_v19  ;;  %v1977_v25 = vadd.f32 %v1976_v22, %v1934_v18  ;;  %v5675_v18 = vld [vmem:[#allocation13 + $0x88] ss:$16 sps:$4 sm:$0xff]   ;;  %v5680_v19 = vld [vmem:[#allocation13 + $0x64] ss:$16 sps:$4 sm:$0xff]   ;;  %v5683_v20 = vld [vmem:[#allocation13 + $0x6c] ss:$16 sps:$4 sm:$0xff]  }
 0x267   :  { %v5681_v22 = vld [vmem:[#allocation13 + $0x68] ss:$16 sps:$4 sm:$0xff]  }
 0x268   :  { %v2109_v27 = vpack.c.bf16 %v1977_v25, %v1973_v23  ;;  %v2166_v28 = vadd.bf16 %v2144_v21, %v2108_v24  ;;  %v5678_v21 = vld [vmem:[#allocation13 + $0x60] ss:$16 sps:$4 sm:$0xff]   ;;  %v5686_v23 = vld [vmem:[#allocation13 + $0x44] ss:$16 sps:$4 sm:$0xff]   ;;  %v5689_v24 = vld [vmem:[#allocation13 + $0x4c] ss:$16 sps:$4 sm:$0xff]  }
 0x269   :  { %v5684_v25 = vld [vmem:[#allocation13 + $0x40] ss:$16 sps:$4 sm:$0xff]  }
 0x26a   :  { %v2167_v29 = vadd.bf16 %v2151_v26, %v2109_v27  ;;  %v2170_v31 = vmax.bf16 %v6203_v0, %v2166_v28  ;;  %v5687_v26 = vld [vmem:[#allocation13 + $0x48] ss:$16 sps:$4 sm:$0xff]   ;;  %v5692_v27 = vld [vmem:[#allocation13 + $0x24] ss:$16 sps:$4 sm:$0xff]   ;;  %v5695_v28 = vld [vmem:[#allocation13 + $0x2c] ss:$16 sps:$4 sm:$0xff]  }
 0x26c   :  { %v2171_v30 = vmax.bf16 %v6203_v0, %v2167_v29  ;;  %v5690_v29 = vld [vmem:[#allocation13 + $0x20] ss:$16 sps:$4 sm:$0xff]  }
 0x26e   :  { %2590 = vmatprep.mubr.bf16.mxu1 %v2171_v30  ;;  %v5693_v30 = vld [vmem:[#allocation13 + $0x28] ss:$16 sps:$4 sm:$0xff]  }
 0x26f   :  { %2591 = vmatmul.mubr.bf16.vlgmr.msra.gmra.mxu1 %v2170_v31  ;;  %v5698_v31 = vld [vmem:[#allocation13 + $0x4] ss:$16 sps:$4 sm:$0xff]  }
 0x270   :  { %3073 = vmatpush1.bf16.msra.mxu1 %v5654_v34  ;;  %v5746_v34 = vld [vmem:[#allocation13 + $0x104] ss:$16 sps:$4 sm:$0xff]  }
 0x271   :  { %3074 = vmatprep.subr.bf16.mxu1 %v5662_v35  ;;  %v5755_v35 = vld [vmem:[#allocation14 + $0x2e4] ss:$16 sps:$4 sm:$0xff]  }
 0x274   :  { %3075 = vmatpush1.bf16.msra.mxu1 %v5660_v9 }
 0x275   :  { %3076 = vmatprep.subr.bf16.mxu1 %v5668_v11 }
 0x278   :  { %3077 = vmatpush1.bf16.msra.mxu1 %v5666_v13 }
 0x279   :  { %3078 = vmatprep.subr.bf16.mxu1 %v5674_v15 }
 0x27c   :  { %3079 = vmatpush1.bf16.msra.mxu1 %v5672_v17 }
 0x27d   :  { %3080 = vmatprep.subr.bf16.mxu1 %v5680_v19 }
 0x280   :  { %3081 = vmatpush1.bf16.msra.mxu1 %v5678_v21 }
 0x281   :  { %3082 = vmatprep.subr.bf16.mxu1 %v5686_v23 }
 0x284   :  { %3083 = vmatpush1.bf16.msra.mxu1 %v5684_v25 }
 0x285   :  { %3084 = vmatprep.subr.bf16.mxu1 %v5692_v27 }
 0x288   :  { %3085 = vmatpush1.bf16.msra.mxu1 %v5690_v29 }
 0x289   :  { %3086 = vmatprep.subr.bf16.mxu1 %v5698_v31 }
 0x29f   :  { %v2056_v39 = vpop.f32.mrf.mxu1 }
 0x2a0   :  { %v2099_v41 = vpop.f32.mrf.mxu0  ;;  %v2057_v44 = vadd.f32 %v2056_v39, %v2013_v33  ;;  %v5701_v33 = vld [vmem:[#allocation13 + $0xc] ss:$16 sps:$4 sm:$0xff]  }
 0x2a1   :  { %v2058_v43 = vpop.f32.mrf.mxu1  ;;  %v5707_v39 = vld [vmem:[#allocation13 + $0x1ec] ss:$16 sps:$4 sm:$0xff]  }
 0x2a2   :  { %v2101_v45 = vpop.f32.mrf.mxu0  ;;  %v2059_v47 = vadd.f32 %v2058_v43, %v2015_v36  ;;  %v2100_v53 = vadd.f32 %v2099_v41, %v2057_v44  ;;  %v5696_v36 = vld [vmem:[#allocation13] ss:$16 sps:$4 sm:$0xff]   ;;  %v5705_v41 = vld [vmem:[#allocation13 + $0x1e8] ss:$16 sps:$4 sm:$0xff]   ;;  %v5713_v43 = vld [vmem:[#allocation13 + $0x1cc] ss:$16 sps:$4 sm:$0xff]  }
 0x2a3   :  { %v2060_v46 = vpop.f32.mrf.mxu1  ;;  %3087 = vmatpush1.bf16.msra.mxu1 %v5696_v36  ;;  %v5708_v44 = vld [vmem:[#allocation13 + $0x1c0] ss:$16 sps:$4 sm:$0xff]  }
 0x2a4   :  { %v2061_v49 = vadd.f32 %v2060_v46, %v2017_v37  ;;  %v2103_v50 = vpop.f32.mrf.mxu0  ;;  %v2102_v60 = vadd.f32 %v2101_v45, %v2059_v47  ;;  %v5699_v37 = vld [vmem:[#allocation13 + $0x8] ss:$16 sps:$4 sm:$0xff]   ;;  %v5716_v46 = vld [vmem:[#allocation13 + $0x1a4] ss:$16 sps:$4 sm:$0xff]   ;;  %v5714_v47 = vld [vmem:[#allocation13 + $0x1a0] ss:$16 sps:$4 sm:$0xff]  }
 0x2a5   :  { %v2062_v52 = vpop.f32.mrf.mxu1  ;;  %v5711_v45 = vld [vmem:[#allocation13 + $0x1c8] ss:$16 sps:$4 sm:$0xff]   ;;  %v5750_v36 = vld [vmem:[#allocation14 + $0xe0] ss:$16 sps:$4 sm:$0xff]  }
 0x2a6   :  { %v2104_v54 = vadd.f32 %v2103_v50, %v2061_v49  ;;  %v2063_v55 = vadd.f32 %v2062_v52, %v2019_v38  ;;  %v2105_v58 = vpop.f32.mrf.mxu0  ;;  %v5704_v38 = vld [vmem:[#allocation13 + $0x1e4] ss:$16 sps:$4 sm:$0xff]   ;;  %v5717_v49 = vld [vmem:[#allocation13 + $0x1a8] ss:$16 sps:$4 sm:$0xff]   ;;  %v5720_v52 = vld [vmem:[#allocation13 + $0x180] ss:$16 sps:$4 sm:$0xff]  }
 0x2a7   :  { %3088 = vmatprep.subr.bf16.mxu1 %v5704_v38  ;;  %v5722_v50 = vld [vmem:[#allocation13 + $0x184] ss:$16 sps:$4 sm:$0xff]  }
 0x2a8   :  { %v2110_v61 = vpack.c.bf16 %v2104_v54, %v2100_v53  ;;  %v2106_v62 = vadd.f32 %v2105_v58, %v2063_v55  ;;  %3089 = vmatpush2.bf16.msra.mxu1 %v5702_v40  ;;  %v5723_v53 = vld [vmem:[#allocation13 + $0x188] ss:$16 sps:$4 sm:$0xff]   ;;  %v5728_v54 = vld [vmem:[#allocation13 + $0x164] ss:$16 sps:$4 sm:$0xff]   ;;  %v5731_v55 = vld [vmem:[#allocation13 + $0x16c] ss:$16 sps:$4 sm:$0xff]  }
 0x2a9   :  { %3090 = vmatprep.subr.bf16.mxu1 %v5710_v42  ;;  %v5729_v58 = vld [vmem:[#allocation13 + $0x168] ss:$16 sps:$4 sm:$0xff]   ;;  %v5761_v40 = vld [vmem:[#allocation14 + $0x2c4] ss:$16 sps:$4 sm:$0xff]   ;;  %v5759_v42 = vld [vmem:[#allocation14 + $0x2c0] ss:$16 sps:$4 sm:$0xff]  }
 0x2aa   :  { %v2111_v1 = vpack.c.bf16 %v2106_v62, %v2102_v60  ;;  %v2168_v2 = vadd.bf16 %v2158_v56, %v2110_v61  ;;  %v5726_v56 = vld [vmem:[#allocation13 + $0x160] ss:$16 sps:$4 sm:$0xff]   ;;  %v5734_v60 = vld [vmem:[#allocation13 + $0x144] ss:$16 sps:$4 sm:$0xff]   ;;  %v5735_v62 = vld [vmem:[#allocation13 + $0x148] ss:$16 sps:$4 sm:$0xff]  }
 0x2ab   :  { %v5732_v61 = vld [vmem:[#allocation13 + $0x140] ss:$16 sps:$4 sm:$0xff]  }
 0x2ac   :  { %v2169_v3 = vadd.bf16 %v2165_v63, %v2111_v1  ;;  %v2172_v5 = vmax.bf16 %v6203_v0, %v2168_v2  ;;  %3091 = vmatpush2.bf16.msra.mxu1 %v5708_v44  ;;  %v5737_v63 = vld [vmem:[#allocation13 + $0x14c] ss:$16 sps:$4 sm:$0xff]   ;;  %v5740_v1 = vld [vmem:[#allocation13 + $0x124] ss:$16 sps:$4 sm:$0xff]  }
 0x2ad   :  { %3092 = vmatprep.subr.bf16.mxu1 %v5716_v46  ;;  %v5743_v2 = vld [vmem:[#allocation13 + $0x12c] ss:$16 sps:$4 sm:$0xff]   ;;  %v5767_v44 = vld [vmem:[#allocation14 + $0x2a4] ss:$16 sps:$4 sm:$0xff]   ;;  %v5765_v46 = vld [vmem:[#allocation14 + $0x2a0] ss:$16 sps:$4 sm:$0xff]  }
 0x2ae   :  { %v2173_v4 = vmax.bf16 %v6203_v0, %v2169_v3  ;;  %v5738_v3 = vld [vmem:[#allocation13 + $0x120] ss:$16 sps:$4 sm:$0xff]  }
 0x2b0   :  { %2633 = vmatprep.mubr.bf16.mxu0 %v2173_v4  ;;  %3093 = vmatpush2.bf16.msra.mxu1 %v5714_v47  ;;  %v5741_v4 = vld [vmem:[#allocation13 + $0x128] ss:$16 sps:$4 sm:$0xff]   ;;  %v5773_v47 = vld [vmem:[#allocation14 + $0x284] ss:$16 sps:$4 sm:$0xff]  }
 0x2b1   :  { %2634 = vmatmul.mubr.bf16.vlgmr.msra.gmra.mxu0 %v2172_v5  ;;  %3094 = vmatprep.subr.bf16.mxu1 %v5722_v50  ;;  %v5744_v5 = vld [vmem:[#allocation13 + $0x100] ss:$16 sps:$4 sm:$0xff]  }
 0x2b2   :  { %3116 = vmatpush1.bf16.msra.mxu0 %v5657_v32  ;;  %v5749_v32 = vld [vmem:[#allocation13 + $0x10c] ss:$16 sps:$4 sm:$0xff]   ;;  %v5771_v50 = vld [vmem:[#allocation14 + $0x280] ss:$16 sps:$4 sm:$0xff]  }
 0x2b3   :  { %3117 = vmatprep.subr.bf16.mxu0 %v5665_v57  ;;  %v4904_v57 = vld.sshfl [vmem:[#allocation11] sm:$0x11 pattern:$0x75316420] }
 0x2b4   :  { %3095 = vmatpush2.bf16.msra.mxu1 %v5720_v52  ;;  %v5779_v52 = vld [vmem:[#allocation14 + $0x264] ss:$16 sps:$4 sm:$0xff]  }
 0x2b5   :  { %3096 = vmatprep.subr.bf16.mxu1 %v5728_v54  ;;  %v5777_v54 = vld [vmem:[#allocation14 + $0x260] ss:$16 sps:$4 sm:$0xff]  }
 0x2b6   :  { %3118 = vmatpush1.bf16.msra.mxu0 %v5663_v10  ;;  %v2655_v10 = vcombine.high %v4904_v57, %v4904_v57 }
 0x2b7   :  { %3119 = vmatprep.subr.bf16.mxu0 %v5671_v12  ;;  %v2662_v12 = vrot.slane %v4904_v57, %v6331_v59  ;;  %v5809_v57 = vld [vmem:[#allocation14 + $0x3c4] ss:$16 sps:$4 sm:$0xff]  }
 0x2b8   :  { %3097 = vmatpush2.bf16.msra.mxu1 %v5726_v56  ;;  %v2669_v13 = vrot.slane %v2655_v10, %v6331_v59  ;;  %v5785_v56 = vld [vmem:[#allocation14 + $0x244] ss:$16 sps:$4 sm:$0xff]   ;;  %v5807_v10 = vld [vmem:[#allocation14 + $0x3c0] ss:$16 sps:$4 sm:$0xff]  }
 0x2b9   :  { %3098 = vmatprep.subr.bf16.mxu1 %v5734_v60  ;;  %v2671_v17 = vpack.i.b16 %v2662_v12, %v2662_v12  ;;  %v5783_v60 = vld [vmem:[#allocation14 + $0x240] ss:$16 sps:$4 sm:$0xff]   ;;  %v5815_v12 = vld [vmem:[#allocation14 + $0x3a4] ss:$16 sps:$4 sm:$0xff]  }
 0x2ba   :  { %3120 = vmatpush1.bf16.msra.mxu0 %v5669_v14 }
 0x2bb   :  { %3121 = vmatprep.subr.bf16.mxu0 %v5677_v16  ;;  %v2676_v23 = vrot.slane %v2671_v17, %v6337_v6  ;;  %v5816_v17 = vld [vmem:[#allocation14 + $0x180] ss:$16 sps:$4 sm:$0xff]  }
 0x2bc   :  { %3099 = vmatpush2.bf16.msra.mxu1 %v5732_v61  ;;  %v5788_v61 = vld [vmem:[#allocation14 + $0x24] ss:$16 sps:$4 sm:$0xff]  }
 0x2bd   :  { %3100 = vmatprep.subr.bf16.mxu1 %v5740_v1  ;;  %v5789_v1 = vld [vmem:[#allocation14 + $0x220] ss:$16 sps:$4 sm:$0xff]  }
 0x2be   :  { %3122 = vmatpush1.bf16.msra.mxu0 %v5675_v18  ;;  %v2678_v18 = vpack.i.b16 %v2669_v13, %v2669_v13  ;;  %v5810_v13 = vld [vmem:[#allocation14 + $0x1a0] ss:$16 sps:$4 sm:$0xff]  }
 0x2bf   :  { %3123 = vmatprep.subr.bf16.mxu0 %v5683_v20 }
 0x2c0   :  { %3101 = vmatpush2.bf16.msra.mxu1 %v5738_v3  ;;  %v5797_v3 = vld [vmem:[#allocation14 + $0x204] ss:$16 sps:$4 sm:$0xff]  }
 0x2c1   :  { %3102 = vmatprep.subr.bf16.mxu1 %v5746_v34  ;;  %v5800_v34 = vld [vmem:[#allocation14 + $0x1e4] ss:$16 sps:$4 sm:$0xff]  }
 0x2c2   :  { %3124 = vmatpush1.bf16.msra.mxu0 %v5681_v22 }
 0x2c3   :  { %3125 = vmatprep.subr.bf16.mxu0 %v5689_v24 }
 0x2c4   :  { %3103 = vmatpush2.bf16.msra.mxu1 %v5744_v5  ;;  %v5795_v5 = vld [vmem:[#allocation14 + $0x200] ss:$16 sps:$4 sm:$0xff]  }
 0x2c5   :  { %3992 = vmatprep.subr.bf16.mxu1 %v5752_v8  ;;  %v5801_v8 = vld [vmem:[#allocation14 + $0x3e0] ss:$16 sps:$4 sm:$0xff]  }
 0x2c6   :  { %3126 = vmatpush1.bf16.msra.mxu0 %v5687_v26 }
 0x2c7   :  { %3127 = vmatprep.subr.bf16.mxu0 %v5695_v28  ;;  %v2683_v28 = vrot.slane %v2678_v18, %v6337_v6  ;;  %v5819_v18 = vld [vmem:[#allocation14 + $0x380] ss:$16 sps:$4 sm:$0xff]  }
 0x2ca   :  { %3128 = vmatpush1.bf16.msra.mxu0 %v5693_v30 }
 0x2cb   :  { %3129 = vmatprep.subr.bf16.mxu0 %v5701_v33 }
 0x2ce   :  { %3130 = vmatpush1.bf16.msra.mxu0 %v5699_v37  ;;  %v5753_v37 = vld [vmem:[#allocation14 + $0x2e0] ss:$16 sps:$4 sm:$0xff]  }
 0x2cf   :  { %3131 = vmatprep.subr.bf16.mxu0 %v5707_v39  ;;  %v5758_v39 = vld [vmem:[#allocation14 + $0xc4] ss:$16 sps:$4 sm:$0xff]  }
 0x2d2   :  { %3132 = vmatpush2.bf16.msra.mxu0 %v5705_v41  ;;  %v5756_v41 = vld [vmem:[#allocation14 + $0xc0] ss:$16 sps:$4 sm:$0xff]  }
 0x2d3   :  { %3133 = vmatprep.subr.bf16.mxu0 %v5713_v43  ;;  %v5764_v43 = vld [vmem:[#allocation14 + $0xa4] ss:$16 sps:$4 sm:$0xff]  }
 0x2d6   :  { %3134 = vmatpush2.bf16.msra.mxu0 %v5711_v45  ;;  %v5762_v45 = vld [vmem:[#allocation14 + $0xa0] ss:$16 sps:$4 sm:$0xff]  }
 0x2d7   :  { %3135 = vmatprep.subr.bf16.mxu0 %v5719_v48  ;;  %v5770_v48 = vld [vmem:[#allocation14 + $0x84] ss:$16 sps:$4 sm:$0xff]  }
 0x2da   :  { %3136 = vmatpush2.bf16.msra.mxu0 %v5717_v49  ;;  %v5768_v49 = vld [vmem:[#allocation14 + $0x80] ss:$16 sps:$4 sm:$0xff]  }
 0x2db   :  { %3137 = vmatprep.subr.bf16.mxu0 %v5725_v51  ;;  %v5776_v51 = vld [vmem:[#allocation14 + $0x64] ss:$16 sps:$4 sm:$0xff]  }
 0x2de   :  { %3138 = vmatpush2.bf16.msra.mxu0 %v5723_v53  ;;  %v5774_v53 = vld [vmem:[#allocation14 + $0x60] ss:$16 sps:$4 sm:$0xff]  }
 0x2df   :  { %3139 = vmatprep.subr.bf16.mxu0 %v5731_v55  ;;  %v5782_v55 = vld [vmem:[#allocation14 + $0x44] ss:$16 sps:$4 sm:$0xff]  }
 0x2e2   :  { %3140 = vmatpush2.bf16.msra.mxu0 %v5729_v58  ;;  %v5780_v58 = vld [vmem:[#allocation14 + $0x40] ss:$16 sps:$4 sm:$0xff]  }
 0x2e3   :  { %3141 = vmatprep.subr.bf16.mxu0 %v5737_v63  ;;  %v5786_v63 = vld [vmem:[#allocation14 + $0x20] ss:$16 sps:$4 sm:$0xff]  }
 0x2e6   :  { %3142 = vmatpush2.bf16.msra.mxu0 %v5735_v62  ;;  %v5791_v62 = vld [vmem:[#allocation14 + $0x224] ss:$16 sps:$4 sm:$0xff]  }
 0x2e7   :  { %3143 = vmatprep.subr.bf16.mxu0 %v5743_v2  ;;  %v5794_v2 = vld [vmem:[#allocation14 + $0x4] ss:$16 sps:$4 sm:$0xff]  }
 0x2ea   :  { %3144 = vmatpush2.bf16.msra.mxu0 %v5741_v4  ;;  %v5792_v4 = vld [vmem:[#allocation14] ss:$16 sps:$4 sm:$0xff]  }
 0x2eb   :  { %3145 = vmatprep.subr.bf16.mxu0 %v5749_v32  ;;  %v5798_v32 = vld [vmem:[#allocation14 + $0x1e0] ss:$16 sps:$4 sm:$0xff]  }
 0x2ee   :  { %3146 = vmatpush2.bf16.msra.mxu0 %v5747_v7  ;;  %v5803_v7 = vld [vmem:[#allocation14 + $0x3e4] ss:$16 sps:$4 sm:$0xff]  }
 0x2ef   :  { %4035 = vmatprep.subr.bf16.mxu0 %v5755_v35  ;;  %v5806_v35 = vld [vmem:[#allocation14 + $0x1c4] ss:$16 sps:$4 sm:$0xff]  }
 0x32f   :  { %v2592_v9 = vpop.f32.mrf.mxu1 }
 0x331   :  { %v2594_v11 = vpop.f32.mrf.mxu1 }
 0x333   :  { %v2596_v15 = vpop.f32.mrf.mxu1 }
 0x335   :  { %v2598_v22 = vpop.f32.mrf.mxu1 }
 0x371   :  { %v2635_v14 = vpop.f32.mrf.mxu0 }
 0x372   :  { %v2636_v20 = vadd.f32 %v2635_v14, %v2592_v9  ;;  %v5804_v9 = vld [vmem:[#allocation14 + $0x1c0] ss:$16 sps:$4 sm:$0xff]  }
 0x373   :  { %v2637_v16 = vpop.f32.mrf.mxu0  ;;  %v5813_v14 = vld [vmem:[#allocation14 + $0x3a0] ss:$16 sps:$4 sm:$0xff]  }
 0x374   :  { %v2638_v25 = vadd.f32 %v2637_v16, %v2594_v11  ;;  %v5812_v11 = vld [vmem:[#allocation14 + $0x1a4] ss:$16 sps:$4 sm:$0xff]  }
 0x375   :  { %v2639_v19 = vpop.f32.mrf.mxu0  ;;  %v5821_v16 = vld [vmem:[#allocation14 + $0x384] ss:$16 sps:$4 sm:$0xff]  }
 0x376   :  { %v2640_v21 = vadd.f32 %v2639_v19, %v2596_v15  ;;  %v5818_v15 = vld [vmem:[#allocation14 + $0x184] ss:$16 sps:$4 sm:$0xff]  }
 0x377   :  { %v2641_v24 = vpop.f32.mrf.mxu0  ;;  %v5824_v19 = vld [vmem:[#allocation14 + $0x164] ss:$16 sps:$4 sm:$0xff]  }
 0x378   :  { %v2644_v26 = vpack.c.bf16 %v2640_v21, %v2636_v20  ;;  %v2642_v27 = vadd.f32 %v2641_v24, %v2598_v22  ;;  %v5827_v20 = vld [vmem:[#allocation14 + $0x364] ss:$16 sps:$4 sm:$0xff]   ;;  %v5822_v21 = vld [vmem:[#allocation14 + $0x160] ss:$16 sps:$4 sm:$0xff]  }
 0x379   :  { %v5825_v22 = vld [vmem:[#allocation14 + $0x360] ss:$16 sps:$4 sm:$0xff]   ;;  %v5830_v24 = vld [vmem:[#allocation14 + $0x144] ss:$16 sps:$4 sm:$0xff]  }
 0x37a   :  { %v2645_v29 = vpack.c.bf16 %v2642_v27, %v2638_v25  ;;  %v2684_v30 = vadd.bf16 %v2676_v23, %v2644_v26  ;;  %v5828_v23 = vld [vmem:[#allocation14 + $0x140] ss:$16 sps:$4 sm:$0xff]   ;;  %v5833_v26 = vld [vmem:[#allocation14 + $0x344] ss:$16 sps:$4 sm:$0xff]  }
 0x37b   :  { %v5831_v25 = vld [vmem:[#allocation14 + $0x340] ss:$16 sps:$4 sm:$0xff]   ;;  %v5836_v27 = vld [vmem:[#allocation14 + $0x124] ss:$16 sps:$4 sm:$0xff]  }
 0x37c   :  { %v2685_v31 = vadd.bf16 %v2683_v28, %v2645_v29  ;;  %v2686_v38 = vmax.bf16 %v6203_v0, %v2684_v30  ;;  %v5839_v28 = vld [vmem:[#allocation14 + $0x324] ss:$16 sps:$4 sm:$0xff]   ;;  %v5834_v29 = vld [vmem:[#allocation14 + $0x120] ss:$16 sps:$4 sm:$0xff]  }
 0x37d   :  { %v5837_v30 = vld [vmem:[#allocation14 + $0x320] ss:$16 sps:$4 sm:$0xff]  }
 0x37e   :  { %v2687_v33 = vmax.bf16 %v6203_v0, %v2685_v31  ;;  %v5842_v31 = vld [vmem:[#allocation14 + $0x104] ss:$16 sps:$4 sm:$0xff]  }
 0x380   :  { %3104 = vmatprep.mubr.bf16.mxu1 %v2687_v33  ;;  %3147 = vmatprep.mubr.bf16.mxu0 %v2687_v33  ;;  %v5845_v33 = vld [vmem:[#allocation14 + $0x304] ss:$16 sps:$4 sm:$0xff]  }
 0x381   :  { %3105 = vmatmul.mubr.bf16.vlgmr.msra.gmra.mxu1 %v2686_v38  ;;  %3148 = vmatmul.mubr.bf16.vlgmr.msra.gmra.mxu0 %v2686_v38  ;;  %v5848_v38 = vld [vmem:[#allocation14 + $0xec] ss:$16 sps:$4 sm:$0xff]  }
 0x382   :  { %3993 = vmatpush1.bf16.msra.mxu1 %v5750_v36  ;;  %4036 = vmatpush1.bf16.msra.mxu0 %v5753_v37  ;;  %v5840_v36 = vld [vmem:[#allocation14 + $0x100] ss:$16 sps:$4 sm:$0xff]  }
 0x383   :  { %3994 = vmatprep.subr.bf16.mxu1 %v5758_v39  ;;  %4037 = vmatprep.subr.bf16.mxu0 %v5761_v40  ;;  %v5843_v37 = vld [vmem:[#allocation14 + $0x300] ss:$16 sps:$4 sm:$0xff]   ;;  %v5851_v39 = vld [vmem:[#allocation14 + $0x2ec] ss:$16 sps:$4 sm:$0xff]  }
 0x384   :  { %v4969_v40 = vld.sshfl [vmem:[%s6457_s8] sm:$0x33 pattern:$0x75316420] }
 0x386   :  { %3995 = vmatpush1.bf16.msra.mxu1 %v5756_v41  ;;  %4038 = vmatpush1.bf16.msra.mxu0 %v5759_v42  ;;  %v3171_v41 = vcombine.high %v4969_v40, %v4969_v40  ;;  %v3178_v42 = vrot.slane %v4969_v40, %v6331_v59  ;;  %v5893_v40 = vld [vmem:[#allocation14 + $0x20c] ss:$16 sps:$4 sm:$0xff]  }
 0x387   :  { %3996 = vmatprep.subr.bf16.mxu1 %v5764_v43  ;;  %4039 = vmatprep.subr.bf16.mxu0 %v5767_v44 }
 0x388   :  { %v3185_v43 = vrot.slane %v3171_v41, %v6331_v59  ;;  %v3186_v44 = vcombine.high %v3178_v42, %v3178_v42  ;;  %v5888_v41 = vld [vmem:[#allocation14 + $0x8] ss:$16 sps:$4 sm:$0xff]  }
 0x38a   :  { %3997 = vmatpush1.bf16.msra.mxu1 %v5762_v45  ;;  %4040 = vmatpush1.bf16.msra.mxu0 %v5765_v46  ;;  %v3187_v45 = vcombine.high %v3185_v43, %v3185_v43 }
 0x38b   :  { %3998 = vmatprep.subr.bf16.mxu1 %v5770_v48  ;;  %4041 = vmatprep.subr.bf16.mxu0 %v5773_v47  ;;  %v3189_v47 = vpack.i.b16 %v3178_v42, %v3178_v42  ;;  %v5891_v42 = vld [vmem:[#allocation14 + $0x208] ss:$16 sps:$4 sm:$0xff]  }
 0x38e   :  { %3999 = vmatpush1.bf16.msra.mxu1 %v5768_v49  ;;  %4042 = vmatpush1.bf16.msra.mxu0 %v5771_v50  ;;  %v3203_v49 = vpack.i.b16 %v3186_v44, %v3186_v44  ;;  %v3196_v50 = vpack.i.b16 %v3185_v43, %v3185_v43  ;;  %v5896_v43 = vld [vmem:[#allocation14 + $0x1ec] ss:$16 sps:$4 sm:$0xff]  }
 0x38f   :  { %4000 = vmatprep.subr.bf16.mxu1 %v5776_v51  ;;  %4043 = vmatprep.subr.bf16.mxu0 %v5779_v52  ;;  %v3210_v51 = vpack.i.b16 %v3187_v45, %v3187_v45  ;;  %v5899_v44 = vld [vmem:[#allocation14 + $0x3ec] ss:$16 sps:$4 sm:$0xff]   ;;  %v5894_v45 = vld [vmem:[#allocation14 + $0x1e8] ss:$16 sps:$4 sm:$0xff]  }
 0x392   :  { %4001 = vmatpush1.bf16.msra.mxu1 %v5774_v53  ;;  %4044 = vmatpush1.bf16.msra.mxu0 %v5777_v54 }
 0x393   :  { %4002 = vmatprep.subr.bf16.mxu1 %v5782_v55  ;;  %4045 = vmatprep.subr.bf16.mxu0 %v5785_v56  ;;  %v3194_v55 = vrot.slane %v3189_v47, %v6337_v6  ;;  %v5905_v47 = vld [vmem:[#allocation14 + $0x3cc] ss:$16 sps:$4 sm:$0xff]  }
 0x396   :  { %4003 = vmatpush1.bf16.msra.mxu1 %v5780_v58  ;;  %4046 = vmatpush1.bf16.msra.mxu0 %v5783_v60  ;;  %v3208_v58 = vrot.slane %v3203_v49, %v6337_v6  ;;  %v5900_v49 = vld [vmem:[#allocation14 + $0x1c8] ss:$16 sps:$4 sm:$0xff]  }
 0x397   :  { %4004 = vmatprep.subr.bf16.mxu1 %v5788_v61  ;;  %4047 = vmatprep.subr.bf16.mxu0 %v5791_v62  ;;  %v3201_v62 = vrot.slane %v3196_v50, %v6337_v6  ;;  %v5903_v50 = vld [vmem:[#allocation14 + $0x3c8] ss:$16 sps:$4 sm:$0xff]  }
 0x39a   :  { %4005 = vmatpush1.bf16.msra.mxu1 %v5786_v63  ;;  %4048 = vmatpush1.bf16.msra.mxu0 %v5789_v1  ;;  %v3215_v63 = vrot.slane %v3210_v51, %v6337_v6  ;;  %v5908_v51 = vld [vmem:[#allocation14 + $0x1ac] ss:$16 sps:$4 sm:$0xff]  }
 0x39b   :  { %4006 = vmatprep.subr.bf16.mxu1 %v5794_v2  ;;  %4049 = vmatprep.subr.bf16.mxu0 %v5797_v3 }
 0x39e   :  { %4007 = vmatpush1.bf16.msra.mxu1 %v5792_v4  ;;  %4050 = vmatpush1.bf16.msra.mxu0 %v5795_v5 }
 0x39f   :  { %4008 = vmatprep.subr.bf16.mxu1 %v5800_v34  ;;  %4051 = vmatprep.subr.bf16.mxu0 %v5803_v7 }
 0x3a2   :  { %4009 = vmatpush2.bf16.msra.mxu1 %v5798_v32  ;;  %4052 = vmatpush2.bf16.msra.mxu0 %v5801_v8 }
 0x3a3   :  { %4010 = vmatprep.subr.bf16.mxu1 %v5806_v35  ;;  %4053 = vmatprep.subr.bf16.mxu0 %v5809_v57  ;;  %v5846_v57 = vld [vmem:[#allocation14 + $0xe8] ss:$16 sps:$4 sm:$0xff]  }
 0x3a6   :  { %4011 = vmatpush2.bf16.msra.mxu1 %v5804_v9  ;;  %4054 = vmatpush2.bf16.msra.mxu0 %v5807_v10  ;;  %v5849_v9 = vld [vmem:[#allocation14 + $0x2e8] ss:$16 sps:$4 sm:$0xff]  }
 0x3a7   :  { %4012 = vmatprep.subr.bf16.mxu1 %v5812_v11  ;;  %4055 = vmatprep.subr.bf16.mxu0 %v5815_v12  ;;  %v5854_v12 = vld [vmem:[#allocation14 + $0xcc] ss:$16 sps:$4 sm:$0xff]  }
 0x3aa   :  { %4013 = vmatpush2.bf16.msra.mxu1 %v5810_v13  ;;  %4056 = vmatpush2.bf16.msra.mxu0 %v5813_v14  ;;  %v5857_v13 = vld [vmem:[#allocation14 + $0x2cc] ss:$16 sps:$4 sm:$0xff]   ;;  %v5852_v14 = vld [vmem:[#allocation14 + $0xc8] ss:$16 sps:$4 sm:$0xff]  }
 0x3ab   :  { %4014 = vmatprep.subr.bf16.mxu1 %v5818_v15  ;;  %4057 = vmatprep.subr.bf16.mxu0 %v5821_v16  ;;  %v5855_v15 = vld [vmem:[#allocation14 + $0x2c8] ss:$16 sps:$4 sm:$0xff]   ;;  %v5860_v16 = vld [vmem:[#allocation14 + $0xac] ss:$16 sps:$4 sm:$0xff]  }
 0x3ae   :  { %4015 = vmatpush2.bf16.msra.mxu1 %v5816_v17  ;;  %4058 = vmatpush2.bf16.msra.mxu0 %v5819_v18  ;;  %v5863_v17 = vld [vmem:[#allocation14 + $0x2ac] ss:$16 sps:$4 sm:$0xff]   ;;  %v5858_v18 = vld [vmem:[#allocation14 + $0xa8] ss:$16 sps:$4 sm:$0xff]  }
 0x3af   :  { %4016 = vmatprep.subr.bf16.mxu1 %v5824_v19  ;;  %4059 = vmatprep.subr.bf16.mxu0 %v5827_v20  ;;  %v5861_v19 = vld [vmem:[#allocation14 + $0x2a8] ss:$16 sps:$4 sm:$0xff]   ;;  %v5866_v20 = vld [vmem:[#allocation14 + $0x8c] ss:$16 sps:$4 sm:$0xff]  }
 0x3b2   :  { %4017 = vmatpush2.bf16.msra.mxu1 %v5822_v21  ;;  %4060 = vmatpush2.bf16.msra.mxu0 %v5825_v22  ;;  %v5869_v21 = vld [vmem:[#allocation14 + $0x28c] ss:$16 sps:$4 sm:$0xff]   ;;  %v5864_v22 = vld [vmem:[#allocation14 + $0x88] ss:$16 sps:$4 sm:$0xff]  }
 0x3b3   :  { %4018 = vmatprep.subr.bf16.mxu1 %v5830_v24  ;;  %4061 = vmatprep.subr.bf16.mxu0 %v5833_v26  ;;  %v5872_v24 = vld [vmem:[#allocation14 + $0x6c] ss:$16 sps:$4 sm:$0xff]   ;;  %v5870_v26 = vld [vmem:[#allocation14 + $0x68] ss:$16 sps:$4 sm:$0xff]  }
 0x3b6   :  { %4019 = vmatpush2.bf16.msra.mxu1 %v5828_v23  ;;  %4062 = vmatpush2.bf16.msra.mxu0 %v5831_v25  ;;  %v5867_v23 = vld [vmem:[#allocation14 + $0x288] ss:$16 sps:$4 sm:$0xff]   ;;  %v5875_v25 = vld [vmem:[#allocation14 + $0x26c] ss:$16 sps:$4 sm:$0xff]  }
 0x3b7   :  { %4020 = vmatprep.subr.bf16.mxu1 %v5836_v27  ;;  %4063 = vmatprep.subr.bf16.mxu0 %v5839_v28  ;;  %v5873_v27 = vld [vmem:[#allocation14 + $0x268] ss:$16 sps:$4 sm:$0xff]   ;;  %v5878_v28 = vld [vmem:[#allocation14 + $0x4c] ss:$16 sps:$4 sm:$0xff]  }
 0x3ba   :  { %4021 = vmatpush2.bf16.msra.mxu1 %v5834_v29  ;;  %4064 = vmatpush2.bf16.msra.mxu0 %v5837_v30  ;;  %v5881_v29 = vld [vmem:[#allocation14 + $0x24c] ss:$16 sps:$4 sm:$0xff]   ;;  %v5876_v30 = vld [vmem:[#allocation14 + $0x48] ss:$16 sps:$4 sm:$0xff]  }
 0x3bb   :  { %4022 = vmatprep.subr.bf16.mxu1 %v5842_v31  ;;  %4065 = vmatprep.subr.bf16.mxu0 %v5845_v33  ;;  %v5879_v31 = vld [vmem:[#allocation14 + $0x248] ss:$16 sps:$4 sm:$0xff]   ;;  %v5884_v33 = vld [vmem:[#allocation14 + $0x2c] ss:$16 sps:$4 sm:$0xff]  }
 0x3be   :  { %4023 = vmatpush2.bf16.msra.mxu1 %v5840_v36  ;;  %4066 = vmatpush2.bf16.msra.mxu0 %v5843_v37  ;;  %v5887_v36 = vld [vmem:[#allocation14 + $0x22c] ss:$16 sps:$4 sm:$0xff]   ;;  %v5882_v37 = vld [vmem:[#allocation14 + $0x28] ss:$16 sps:$4 sm:$0xff]  }
 0x3bf   :  { %4078 = vmatprep.subr.bf16.mxu1 %v5848_v38  ;;  %4121 = vmatprep.subr.bf16.mxu0 %v5851_v39  ;;  %v5885_v38 = vld [vmem:[#allocation14 + $0x228] ss:$16 sps:$4 sm:$0xff]   ;;  %v5890_v39 = vld [vmem:[#allocation14 + $0xc] ss:$16 sps:$4 sm:$0xff]  }
 0x441   :  { %v3106_v46 = vpop.f32.mrf.mxu1  ;;  %v3149_v48 = vpop.f32.mrf.mxu0 }
 0x443   :  { %v3108_v52 = vpop.f32.mrf.mxu1  ;;  %v3151_v53 = vpop.f32.mrf.mxu0 }
 0x445   :  { %v3110_v54 = vpop.f32.mrf.mxu1  ;;  %v3153_v56 = vpop.f32.mrf.mxu0 }
 0x446   :  { %v3158_v60 = vpack.c.bf16 %v3110_v54, %v3106_v46  ;;  %v3160_v61 = vpack.c.bf16 %v3153_v56, %v3149_v48  ;;  %v5897_v46 = vld [vmem:[#allocation14 + $0x3e8] ss:$16 sps:$4 sm:$0xff]   ;;  %v5902_v48 = vld [vmem:[#allocation14 + $0x1cc] ss:$16 sps:$4 sm:$0xff]  }
 0x447   :  { %v3112_v1 = vpop.f32.mrf.mxu1  ;;  %v3155_v2 = vpop.f32.mrf.mxu0  ;;  %v5909_v54 = vld [vmem:[#allocation14 + $0x3a8] ss:$16 sps:$4 sm:$0xff]   ;;  %v5917_v56 = vld [vmem:[#allocation14 + $0x38c] ss:$16 sps:$4 sm:$0xff]  }
 0x448   :  { %v3159_v3 = vpack.c.bf16 %v3112_v1, %v3108_v52  ;;  %v3161_v4 = vpack.c.bf16 %v3155_v2, %v3151_v53  ;;  %v3216_v5 = vadd.bf16 %v3194_v55, %v3158_v60  ;;  %v3218_v34 = vadd.bf16 %v3208_v58, %v3160_v61  ;;  %v5911_v52 = vld [vmem:[#allocation14 + $0x3ac] ss:$16 sps:$4 sm:$0xff]   ;;  %v5906_v53 = vld [vmem:[#allocation14 + $0x1a8] ss:$16 sps:$4 sm:$0xff]  }
 0x449   :  { %v5914_v55 = vld [vmem:[#allocation14 + $0x18c] ss:$16 sps:$4 sm:$0xff]   ;;  %v5912_v58 = vld [vmem:[#allocation14 + $0x188] ss:$16 sps:$4 sm:$0xff]  }
 0x44a   :  { %v3217_v7 = vadd.bf16 %v3201_v62, %v3159_v3  ;;  %v3219_v32 = vadd.bf16 %v3215_v63, %v3161_v4  ;;  %v6418_v10 = vmax.bf16 %v6203_v0, %v3216_v5  ;;  %v6421_v11 = vmax.bf16 %v6203_v0, %v3218_v34  ;;  %v5915_v60 = vld [vmem:[#allocation14 + $0x388] ss:$16 sps:$4 sm:$0xff]   ;;  %v5920_v61 = vld [vmem:[#allocation14 + $0x16c] ss:$16 sps:$4 sm:$0xff]  }
 0x44b   :  { %v5923_v62 = vld [vmem:[#allocation14 + $0x36c] ss:$16 sps:$4 sm:$0xff]   ;;  %v5918_v63 = vld [vmem:[#allocation14 + $0x168] ss:$16 sps:$4 sm:$0xff]  }
 0x44c   :  { %v3221_v8 = vmax.bf16 %v6203_v0, %v3217_v7  ;;  %v3223_v35 = vmax.bf16 %v6203_v0, %v3219_v32  ;;  %v5921_v1 = vld [vmem:[#allocation14 + $0x368] ss:$16 sps:$4 sm:$0xff]   ;;  %v5926_v2 = vld [vmem:[#allocation14 + $0x14c] ss:$16 sps:$4 sm:$0xff]  }
 0x44d   :  { %v5929_v3 = vld [vmem:[#allocation14 + $0x34c] ss:$16 sps:$4 sm:$0xff]   ;;  %v5924_v4 = vld [vmem:[#allocation14 + $0x148] ss:$16 sps:$4 sm:$0xff]  }
 0x44e   :  { %4024 = vmatprep.mubr.bf16.mxu1 %v3221_v8  ;;  %4067 = vmatprep.mubr.bf16.mxu0 %v3223_v35  ;;  %v5927_v5 = vld [vmem:[#allocation14 + $0x348] ss:$16 sps:$4 sm:$0xff]   ;;  %v5932_v34 = vld [vmem:[#allocation14 + $0x12c] ss:$16 sps:$4 sm:$0xff]  }
 0x44f   :  { %4025 = vmatmul.mubr.bf16.vlgmr.msra.gmra.mxu1 %v6418_v10  ;;  %4068 = vmatmul.mubr.bf16.vlgmr.msra.gmra.mxu0 %v6421_v11  ;;  %v5935_v7 = vld [vmem:[#allocation14 + $0x32c] ss:$16 sps:$4 sm:$0xff]   ;;  %v5930_v32 = vld [vmem:[#allocation14 + $0x128] ss:$16 sps:$4 sm:$0xff]  }
 0x450   :  { %4079 = vmatpush1.bf16.msra.mxu1 %v5846_v57  ;;  %4122 = vmatpush1.bf16.msra.mxu0 %v5849_v9  ;;  %v5941_v57 = vld [vmem:[#allocation14 + $0x30c] ss:$16 sps:$4 sm:$0xff]   ;;  %v5936_v9 = vld [vmem:[#allocation14 + $0x108] ss:$16 sps:$4 sm:$0xff]  }
 0x451   :  { %4110 = vmatprep.mubr.bf16.mxu1 %v3221_v8  ;;  %4153 = vmatprep.mubr.bf16.mxu0 %v3223_v35  ;;  %v5933_v8 = vld [vmem:[#allocation14 + $0x328] ss:$16 sps:$4 sm:$0xff]   ;;  %v5938_v35 = vld [vmem:[#allocation14 + $0x10c] ss:$16 sps:$4 sm:$0xff]  }
 0x452   :  { %4080 = vmatprep.subr.bf16.mxu1 %v5854_v12  ;;  %4123 = vmatprep.subr.bf16.mxu0 %v5857_v13  ;;  %v5939_v12 = vld [vmem:[#allocation14 + $0x308] ss:$16 sps:$4 sm:$0xff]  }
 0x453   :  { %v5942_v13 = vld [vmem:[#allocation16 + $0x78] sm:$0xff]  }
 0x454   :  { %4081 = vmatpush1.bf16.msra.mxu1 %v5852_v14  ;;  %4124 = vmatpush1.bf16.msra.mxu0 %v5855_v15  ;;  %v5943_v14 = vld [vmem:[#allocation16 + $0x38] sm:$0xff]   ;;  %v5944_v15 = vld [vmem:[#allocation16 + $0x70] sm:$0xff]  }
 0x455   :  { %4082 = vmatprep.subr.bf16.mxu1 %v5860_v16  ;;  %4125 = vmatprep.subr.bf16.mxu0 %v5863_v17  ;;  %v5945_v16 = vld [vmem:[#allocation16 + $0x30] sm:$0xff]   ;;  %v5946_v17 = vld [vmem:[#allocation16 + $0x68] sm:$0xff]  }
 0x458   :  { %4083 = vmatpush1.bf16.msra.mxu1 %v5858_v18  ;;  %4126 = vmatpush1.bf16.msra.mxu0 %v5861_v19  ;;  %v5947_v18 = vld [vmem:[#allocation16 + $0x28] sm:$0xff]   ;;  %v5948_v19 = vld [vmem:[#allocation16 + $0x60] sm:$0xff]  }
 0x459   :  { %4084 = vmatprep.subr.bf16.mxu1 %v5866_v20  ;;  %4127 = vmatprep.subr.bf16.mxu0 %v5869_v21  ;;  %v5949_v20 = vld [vmem:[#allocation16 + $0x20] sm:$0xff]   ;;  %v5950_v21 = vld [vmem:[#allocation16 + $0x58] sm:$0xff]  }
 0x45c   :  { %4085 = vmatpush1.bf16.msra.mxu1 %v5864_v22  ;;  %4128 = vmatpush1.bf16.msra.mxu0 %v5867_v23  ;;  %v5951_v22 = vld [vmem:[#allocation16 + $0x18] sm:$0xff]   ;;  %v5952_v23 = vld [vmem:[#allocation16 + $0x50] sm:$0xff]  }
 0x45d   :  { %4086 = vmatprep.subr.bf16.mxu1 %v5872_v24  ;;  %4129 = vmatprep.subr.bf16.mxu0 %v5875_v25  ;;  %v5958_v24 = vld [vmem:[#allocation16 + $0xf8] sm:$0xff]   ;;  %v5960_v25 = vld [vmem:[#allocation16 + $0xf0] sm:$0xff]  }
 0x460   :  { %4087 = vmatpush1.bf16.msra.mxu1 %v5870_v26  ;;  %4130 = vmatpush1.bf16.msra.mxu0 %v5873_v27  ;;  %v5954_v26 = vld [vmem:[#allocation16 + $0x48] sm:$0xff]   ;;  %v5961_v27 = vld [vmem:[#allocation16 + $0xb0] sm:$0xff]  }
 0x461   :  { %4088 = vmatprep.subr.bf16.mxu1 %v5878_v28  ;;  %4131 = vmatprep.subr.bf16.mxu0 %v5881_v29  ;;  %v5962_v28 = vld [vmem:[#allocation16 + $0xe8] sm:$0xff]  }
 0x462   :  { %v5955_v29 = vld [vmem:[#allocation16 + $0x8] sm:$0xff]  }
 0x464   :  { %4089 = vmatpush1.bf16.msra.mxu1 %v5876_v30  ;;  %4132 = vmatpush1.bf16.msra.mxu0 %v5879_v31  ;;  %v5956_v30 = vld [vmem:[#allocation16 + $0x40] sm:$0xff]   ;;  %v5963_v31 = vld [vmem:[#allocation16 + $0xa8] sm:$0xff]  }
 0x465   :  { %4090 = vmatprep.subr.bf16.mxu1 %v5884_v33  ;;  %4133 = vmatprep.subr.bf16.mxu0 %v5887_v36  ;;  %v5964_v33 = vld [vmem:[#allocation16 + $0xe0] sm:$0xff]  }
 0x466   :  { %v5957_v36 = vld [vmem:[#allocation16] sm:$0xff]  }
 0x468   :  { %4091 = vmatpush1.bf16.msra.mxu1 %v5882_v37  ;;  %4134 = vmatpush1.bf16.msra.mxu0 %v5885_v38  ;;  %v5965_v37 = vld [vmem:[#allocation16 + $0xa0] sm:$0xff]   ;;  %v5966_v38 = vld [vmem:[#allocation16 + $0xd8] sm:$0xff]  }
 0x469   :  { %4092 = vmatprep.subr.bf16.mxu1 %v5890_v39  ;;  %4135 = vmatprep.subr.bf16.mxu0 %v5893_v40  ;;  %v5967_v39 = vld [vmem:[#allocation16 + $0x98] sm:$0xff]   ;;  %v5968_v40 = vld [vmem:[#allocation16 + $0xd0] sm:$0xff]  }
 0x46c   :  { %4093 = vmatpush1.bf16.msra.mxu1 %v5888_v41  ;;  %4136 = vmatpush1.bf16.msra.mxu0 %v5891_v42  ;;  %v5969_v41 = vld [vmem:[#allocation16 + $0x90] sm:$0xff]   ;;  %v5970_v42 = vld [vmem:[#allocation16 + $0xc8] sm:$0xff]  }
 0x46d   :  { %4094 = vmatprep.subr.bf16.mxu1 %v5896_v43  ;;  %4137 = vmatprep.subr.bf16.mxu0 %v5899_v44  ;;  %v5971_v43 = vld [vmem:[#allocation16 + $0x88] sm:$0xff]   ;;  %v5972_v44 = vld [vmem:[#allocation16 + $0xc0] sm:$0xff]  }
 0x470   :  { %4095 = vmatpush2.bf16.msra.mxu1 %v5894_v45  ;;  %4138 = vmatpush2.bf16.msra.mxu0 %v5897_v46  ;;  %v5973_v45 = vld [vmem:[#allocation16 + $0x80] sm:$0xff]   ;;  %v5098_v46 = vld.sshfl [vmem:[%s6459_s10] sm:$0x33 pattern:$0x75316420] }
 0x471   :  { %4096 = vmatprep.subr.bf16.mxu1 %v5902_v48  ;;  %4139 = vmatprep.subr.bf16.mxu0 %v5905_v47  ;;  %v4177_v48 = vcombine.high %v5098_v46, %v5098_v46  ;;  %v4184_v47 = vrot.slane %v5098_v46, %v6331_v59 }
 0x474   :  { %4097 = vmatpush2.bf16.msra.mxu1 %v5900_v49  ;;  %4140 = vmatpush2.bf16.msra.mxu0 %v5903_v50  ;;  %v4191_v49 = vrot.slane %v4177_v48, %v6331_v59 }
 0x475   :  { %4098 = vmatprep.subr.bf16.mxu1 %v5908_v51  ;;  %4141 = vmatprep.subr.bf16.mxu0 %v5911_v52 }
 0x478   :  { %4099 = vmatpush2.bf16.msra.mxu1 %v5906_v53  ;;  %4142 = vmatpush2.bf16.msra.mxu0 %v5909_v54  ;;  %v4195_v54 = vpack.i.b16 %v4184_v47, %v4184_v47 }
 0x479   :  { %4100 = vmatprep.subr.bf16.mxu1 %v5914_v55  ;;  %4143 = vmatprep.subr.bf16.mxu0 %v5917_v56  ;;  %v4202_v55 = vpack.i.b16 %v4191_v49, %v4191_v49 }
 0x47c   :  { %4101 = vmatpush2.bf16.msra.mxu1 %v5912_v58  ;;  %4144 = vmatpush2.bf16.msra.mxu0 %v5915_v60 }
 0x47d   :  { %4102 = vmatprep.subr.bf16.mxu1 %v5920_v61  ;;  %4145 = vmatprep.subr.bf16.mxu0 %v5923_v62  ;;  %v4200_v62 = vrot.slane %v4195_v54, %v6337_v6 }
 0x480   :  { %4103 = vmatpush2.bf16.msra.mxu1 %v5918_v63  ;;  %4146 = vmatpush2.bf16.msra.mxu0 %v5921_v1 }
 0x481   :  { %4104 = vmatprep.subr.bf16.mxu1 %v5926_v2  ;;  %4147 = vmatprep.subr.bf16.mxu0 %v5929_v3 }
 0x484   :  { %4105 = vmatpush2.bf16.msra.mxu1 %v5924_v4  ;;  %4148 = vmatpush2.bf16.msra.mxu0 %v5927_v5  ;;  %v4207_v5 = vrot.slane %v4202_v55, %v6337_v6 }
 0x485   :  { %4106 = vmatprep.subr.bf16.mxu1 %v5932_v34  ;;  %4149 = vmatprep.subr.bf16.mxu0 %v5935_v7 }
 0x488   :  { %4107 = vmatpush2.bf16.msra.mxu1 %v5930_v32  ;;  %4150 = vmatpush2.bf16.msra.mxu0 %v5933_v8 }
 0x489   :  { %4108 = vmatprep.subr.bf16.mxu1 %v5938_v35  ;;  %4151 = vmatprep.subr.bf16.mxu0 %v5941_v57  ;;  %v4192_v35 = vcombine.high %v4184_v47, %v4184_v47  ;;  %v4193_v57 = vcombine.high %v4191_v49, %v4191_v49 }
 0x48c   :  { %4109 = vmatpush2.bf16.msra.mxu1 %v5936_v9  ;;  %4152 = vmatpush2.bf16.msra.mxu0 %v5939_v12 }
 0x48d   :  { %5132 = vmatprep.subr.bf16.mxu1 %v5942_v13  ;;  %5154 = vmatprep.subr.bf16.mxu0 %v5958_v24 }
 0x48f   :  { %4111 = vmatmul.mubr.bf16.vlgmr.msra.gmra.mxu1 %v6418_v10  ;;  %4154 = vmatmul.mubr.bf16.vlgmr.msra.gmra.mxu0 %v6421_v11  ;;  %v5959_v10 = vld [vmem:[#allocation16 + $0xb8] sm:$0xff]   ;;  %v5953_v11 = vld [vmem:[#allocation16 + $0x10] sm:$0xff]  }
 0x490   :  { %5133 = vmatpush3.bf16.msra.mxu1 %v5943_v14  ;;  %5155 = vmatpush3.bf16.msra.mxu0 %v5959_v10 }
 0x491   :  { %5134 = vmatprep.subr.bf16.mxu1 %v5944_v15  ;;  %5156 = vmatprep.subr.bf16.mxu0 %v5960_v25  ;;  %v4209_v15 = vpack.i.b16 %v4192_v35, %v4192_v35 }
 0x494   :  { %5135 = vmatpush3.bf16.msra.mxu1 %v5945_v16  ;;  %5157 = vmatpush3.bf16.msra.mxu0 %v5961_v27  ;;  %v4216_v16 = vpack.i.b16 %v4193_v57, %v4193_v57 }
 0x495   :  { %5136 = vmatprep.subr.bf16.mxu1 %v5946_v17  ;;  %5158 = vmatprep.subr.bf16.mxu0 %v5962_v28 }
 0x498   :  { %5137 = vmatpush3.bf16.msra.mxu1 %v5947_v18  ;;  %5159 = vmatpush3.bf16.msra.mxu0 %v5963_v31 }
 0x499   :  { %5138 = vmatprep.subr.bf16.mxu1 %v5948_v19  ;;  %5160 = vmatprep.subr.bf16.mxu0 %v5964_v33 }
 0x49c   :  { %5139 = vmatpush3.bf16.msra.mxu1 %v5949_v20  ;;  %5161 = vmatpush3.bf16.msra.mxu0 %v5965_v37 }
 0x49d   :  { %5140 = vmatprep.subr.bf16.mxu1 %v5950_v21  ;;  %5162 = vmatprep.subr.bf16.mxu0 %v5966_v38  ;;  %v4214_v21 = vrot.slane %v4209_v15, %v6337_v6  ;;  %v5099_v38 = vld [vmem:[%s6461_s12] ss:$0 sm:$0xff] }
 0x4a0   :  { %5141 = vmatpush3.bf16.msra.mxu1 %v5951_v22  ;;  %5163 = vmatpush3.bf16.msra.mxu0 %v5967_v39 }
 0x4a1   :  { %5142 = vmatprep.subr.bf16.mxu1 %v5952_v23  ;;  %5164 = vmatprep.subr.bf16.mxu0 %v5968_v40 }
 0x4a4   :  { %5143 = vmatpush3.bf16.msra.mxu1 %v5953_v11  ;;  %5165 = vmatpush3.bf16.msra.mxu0 %v5969_v41  ;;  %v4221_v11 = vrot.slane %v4216_v16, %v6337_v6 }
 0x4a5   :  { %5144 = vmatprep.subr.bf16.mxu1 %v5954_v26  ;;  %5166 = vmatprep.subr.bf16.mxu0 %v5970_v42 }
 0x4a8   :  { %5145 = vmatpush3.bf16.msra.mxu1 %v5955_v29  ;;  %5167 = vmatpush3.bf16.msra.mxu0 %v5971_v43 }
 0x4a9   :  { %5146 = vmatprep.subr.bf16.mxu1 %v5956_v30  ;;  %5168 = vmatprep.subr.bf16.mxu0 %v5972_v44 }
 0x4ac   :  { %5147 = vmatpush3.bf16.msra.mxu1 %v5957_v36  ;;  %5169 = vmatpush3.bf16.msra.mxu0 %v5973_v45 }
 0x50f   :  { %v4026_v50 = vpop.f32.mrf.mxu1  ;;  %v4069_v51 = vpop.f32.mrf.mxu0 }
 0x510   :  { %v4070_v60 = vadd.f32 %v4069_v51, %v4026_v50 }
 0x511   :  { %v4028_v52 = vpop.f32.mrf.mxu1  ;;  %v4071_v53 = vpop.f32.mrf.mxu0 }
 0x512   :  { %v4072_v2 = vadd.f32 %v4071_v53, %v4028_v52 }
 0x513   :  { %v4030_v56 = vpop.f32.mrf.mxu1  ;;  %v4073_v58 = vpop.f32.mrf.mxu0 }
 0x514   :  { %v4074_v61 = vadd.f32 %v4073_v58, %v4030_v56 }
 0x515   :  { %v4032_v63 = vpop.f32.mrf.mxu1  ;;  %v4075_v1 = vpop.f32.mrf.mxu0 }
 0x516   :  { %v4164_v3 = vpack.c.bf16 %v4074_v61, %v4070_v60  ;;  %v4076_v4 = vadd.f32 %v4075_v1, %v4032_v63 }
 0x518   :  { %v4165_v59 = vpack.c.bf16 %v4076_v4, %v4072_v2  ;;  %v4222_v34 = vadd.bf16 %v4200_v62, %v4164_v3 }
 0x51a   :  { %v4223_v7 = vadd.bf16 %v4207_v5, %v4165_v59  ;;  %v4226_v8 = vmax.bf16 %v6203_v0, %v4222_v34 }
 0x51c   :  { %v4227_v32 = vmax.bf16 %v6203_v0, %v4223_v7 }
 0x51e   :  { %4525 = vmatprep.mubr.bf16.mxu1 %v4227_v32 }
 0x51f   :  { %4526 = vmatmul.mubr.bf16.vlgmr.msra.gmra.mxu1 %v4226_v8 }
 0x54f   :  { %v4112_v9 = vpop.f32.mrf.mxu1  ;;  %v4155_v12 = vpop.f32.mrf.mxu0 }
 0x550   :  { %v4156_v19 = vadd.f32 %v4155_v12, %v4112_v9 }
 0x551   :  { %v4114_v13 = vpop.f32.mrf.mxu1  ;;  %v4157_v14 = vpop.f32.mrf.mxu0 }
 0x552   :  { %v4158_v24 = vadd.f32 %v4157_v14, %v4114_v13 }
 0x553   :  { %v4116_v17 = vpop.f32.mrf.mxu1  ;;  %v4159_v18 = vpop.f32.mrf.mxu0 }
 0x554   :  { %v4160_v20 = vadd.f32 %v4159_v18, %v4116_v17 }
 0x555   :  { %v4118_v22 = vpop.f32.mrf.mxu1  ;;  %v4161_v23 = vpop.f32.mrf.mxu0 }
 0x556   :  { %v4166_v10 = vpack.c.bf16 %v4160_v20, %v4156_v19  ;;  %v4162_v25 = vadd.f32 %v4161_v23, %v4118_v22 }
 0x558   :  { %v4167_v26 = vpack.c.bf16 %v4162_v25, %v4158_v24  ;;  %v4224_v27 = vadd.bf16 %v4214_v21, %v4166_v10 }
 0x55a   :  { %v4225_v28 = vadd.bf16 %v4221_v11, %v4167_v26  ;;  %v4228_v30 = vmax.bf16 %v6203_v0, %v4224_v27 }
 0x55c   :  { %v4229_v29 = vmax.bf16 %v6203_v0, %v4225_v28 }
 0x55e   :  { %4566 = vmatprep.mubr.bf16.mxu0 %v4229_v29 }
 0x55f   :  { %4567 = vmatmul.mubr.bf16.vlgmr.msra.gmra.mxu0 %v4228_v30 }
 0x5df   :  { %v5148_v31 = vpop.f32.mrf.mxu1 }
 0x5e1   :  { %v5149_v33 = vpop.f32.mrf.mxu1 }
 0x5e2   :  { %v5150_v37 = vadd.f32 %v5149_v33, %v5148_v31 }
 0x5e3   :  { %v5151_v36 = vpop.f32.mrf.mxu1 }
 0x5e4   :  { %v4528_v41 = vadd.f32 %v5150_v37, %v5099_v38 }
 0x5e5   :  { %v5152_v39 = vpop.f32.mrf.mxu1 }
 0x5e6   :  { %v5153_v42 = vadd.f32 %v5152_v39, %v5151_v36 }
 0x5e8   :  { %v4531_v0 = vadd.f32 %v5153_v42, %v5099_v38 }
 0x61f   :  { %v5170_v40 = vpop.f32.mrf.mxu0 }
 0x621   :  { %v5171_v6 = vpop.f32.mrf.mxu0 }
 0x622   :  { %v5172_v43 = vadd.f32 %v5171_v6, %v5170_v40 }
 0x623   :  { %v5173_v44 = vpop.f32.mrf.mxu0 }
 0x624   :  { %v4569_v45 = vadd.f32 %v5172_v43, %v4528_v41 }
 0x625   :  { %v5174_v46 = vpop.f32.mrf.mxu0 }
 0x626   :  { %4575 = vst [vmem:[#allocation17] sm:$0xff] %v4569_v45  ;;  %v5175_v48 = vadd.f32 %v5174_v46, %v5173_v44 }
 0x628   :  { %v4572_v47 = vadd.f32 %v5175_v48, %v4531_v0 }
 0x62a   :  { %4576 = vst [vmem:[#allocation17 + $0x8] sm:$0xff] %v4572_v47 }
 0x62b   :  { %6165 = shalt.err (!%p6162_p7)
}
 0x62c   :  { %4588 = dma.vmem_to_hbm [thread:$0]  %s4583_s1, 256, %s6462_s13, [#allocation4], %s6199_s0, %s6199_s0, %s6200_s27  }
 0x62d   :  { %6184 = dma.done.wait [#allocation4], 256  }
 0x62e   :  { %6185 = vsyncadd [#allocation4], 4294967040 }
 0x62f   :  { %4592 = vsyncpa [#allocation3], 1 }
 0x630   :  { %4593 = vsyncpa [#allocation6], 1 }
 0x631   :  { %4594 = vsyncpa [#allocation9], 1 }
 0x632   :  { %4595 = vsyncpa [#allocation12], 1 }
 0x633   :  { %4596 = vsyncpa [#allocation15], 1 }
 0x634   :  { %4597 = vsyncpa [#allocation4], 1 }

</bundles_post_ra>
